<compile_context>
chip_gen: v5e
topology: v5e:2x2
jax: 0.10.0
libtpu: 0.0.40
codegen_flags: <defaults>
</compile_context>

<pallas_src>
import functools
import numpy as np
import jax
import jax.numpy as jnp
from jax import lax
from jax.experimental import pallas as pl
from jax.experimental.pallas import tpu as pltpu


class Config:
    DICT_CODE = 50
    EMB_SIZE = 32
    ENC_SIZE = 32   # must equal EMB_SIZE (residual add in the torch module requires it)
    NUM_LAYER = 2


# ----------------------------------------------------------------------------
# Fused Pallas kernel: all layers + all timesteps, wavefront schedule, grid=(1,)
# ----------------------------------------------------------------------------
def _encoder_kernel(lens_ref, x_ref, wih_ref, whh_ref, b_ref,
                    y_ref, h_ref, c_ref, xproj_scr, *mid_refs,
                    num_layers, seq_len, batch, hidden, unroll):
    T, B, H = seq_len, batch, hidden
    G = 4 * H
    L = num_layers

    lens = lens_ref[...]                                    # (B, 1) int32, resident

    # Loop-invariant lane mask selecting the cell ("g") gate inside the 4H vreg.
    lane = lax.broadcasted_iota(jnp.int32, (B, G), 1)
    cell_mask = (lane >= 2 * H) & (lane < 3 * H)

    # Loop-invariant per-layer weights (compiler keeps them in vregs / VMEM).
    w_ih = [wih_ref[l] for l in range(L)]                   # (H, 4H), pre-transposed
    w_hh = [whh_ref[l] for l in range(L)]                   # (H, 4H), pre-transposed
    bias = [b_ref[l] for l in range(L)]                     # (1, 4H), b_ih + b_hh

    # Hoisted layer-0 input projection: one big matmul for all T timesteps.
    # B is a multiple of 8, so these reshapes are views (no relayout).
    x_flat = x_ref[...].reshape(T * B, H)
    xproj_scr[...] = (jnp.dot(x_flat, w_ih[0], preferred_element_type=jnp.float32)
                      + bias[0]).reshape(T, B, G)

    # Zero-init inter-layer activation buffers (cheap; never read garbage on
    # the wavefront warm-up/cool-down diagonal steps).
    for m in mid_refs:
        m[...] = jnp.zeros_like(m)

    def lstm_gates(gates):
        # Single EUP pass: sigmoid(x) = 0.5 * tanh(0.5 * x) + 0.5.
        pre = jnp.where(cell_mask, gates, gates * 0.5)
        th = jnp.tanh(pre)
        return jnp.where(cell_mask, th, th * 0.5 + 0.5)

    n_diag = T + L - 1                                       # wavefront length

    def step(s, carry):
        new_carry = list(carry)
        for l in range(L):                                   # static unroll over layers
            h_prev = carry[2 * l]
            c_prev = carry[2 * l + 1]
            t_log = s - l                                    # this layer's logical timestep
            t_idx = jnp.clip(t_log, 0, T - 1)
            valid = jnp.logical_and(t_log >= 0, t_log < lens)    # (B, 1) bool
            active = jnp.logical_and(t_log >= 0, t_log < T)      # scalar bool

            if l == 0:
                x_t = x_ref[t_idx]                           # (B, H) layer input / skip
                gates = xproj_scr[t_idx] + jnp.dot(
                    h_prev, w_hh[0], preferred_element_type=jnp.float32)
            else:
                x_t = mid_refs[l - 1][t_idx]                 # previous layer's output at t
                gates = (jnp.dot(x_t, w_ih[l], preferred_element_type=jnp.float32)
                         + bias[l]
                         + jnp.dot(h_prev, w_hh[l], preferred_element_type=jnp.float32))

            acts = lstm_gates(gates)                         # (B, 4H)
            i_g = acts[:, 0:H]
            f_g = acts[:, H:2 * H]
            g_g = acts[:, 2 * H:3 * H]
            o_g = acts[:, 3 * H:4 * H]
            c_new = f_g * c_prev + i_g * g_g
            h_new = o_g * jnp.tanh(c_new)

            # State advances only on valid steps (== packed-sequence semantics).
            new_carry[2 * l] = jnp.where(valid, h_new, h_prev)
            new_carry[2 * l + 1] = jnp.where(valid, c_new, c_prev)

            # pad_packed output is zero at padded positions; add residual skip.
            out_t = jnp.where(valid, h_new, 0.0) + x_t
            out_ref = y_ref if l == L - 1 else mid_refs[l]
            old = out_ref[t_idx]
            out_ref[t_idx] = jnp.where(jnp.broadcast_to(active, (B, 1)), out_t, old)
        return tuple(new_carry)

    zeros = jnp.zeros((B, H), jnp.float32)
    init = tuple(zeros for _ in range(2 * L))
    final = lax.fori_loop(0, n_diag, step, init, unroll=unroll)

    # Final (h, c) of the last layer, written once.
    h_ref[...] = final[2 * (L - 1)]
    c_ref[...] = final[2 * (L - 1) + 1]


@functools.partial(jax.jit, static_argnames=("num_layers",))
def _encoder_core(emb, ids, lens, wih_all, whh_all, b_all, *, num_layers):
    """ids: (T, B) int32 (already +1, B padded to a multiple of 8),
    lens: (B, 1) int32, stacked / pre-transposed weights."""
    x = jnp.take(emb, ids, axis=0).astype(jnp.float32)       # (T, B, E)
    T, B, E = x.shape
    H = whh_all.shape[1]
    G = 4 * H
    L = num_layers
    n_diag = T + L - 1

    kernel = functools.partial(
        _encoder_kernel, num_layers=L, seq_len=T, batch=B, hidden=H,
        unroll=(True if n_diag <= 16 else 8))                 # bounded unroll when long

    y, h, c = pl.pallas_call(
        kernel,
        out_shape=(jax.ShapeDtypeStruct((T, B, H), jnp.float32),
                   jax.ShapeDtypeStruct((B, H), jnp.float32),
                   jax.ShapeDtypeStruct((B, H), jnp.float32)),
        grid_spec=pltpu.PrefetchScalarGridSpec(
            num_scalar_prefetch=0,
            grid=(1,),                                        # everything VMEM-resident
            in_specs=[
                pl.BlockSpec((B, 1), lambda i: (0, 0)),         # lengths
                pl.BlockSpec((T, B, E), lambda i: (0, 0, 0)),   # embedded input
                pl.BlockSpec((L, E, G), lambda i: (0, 0, 0)),   # W_ih^T stacked
                pl.BlockSpec((L, H, G), lambda i: (0, 0, 0)),   # W_hh^T stacked
                pl.BlockSpec((L, 1, G), lambda i: (0, 0, 0)),   # biases stacked
            ],
            out_specs=[
                pl.BlockSpec((T, B, H), lambda i: (0, 0, 0)),   # full-sequence output
                pl.BlockSpec((B, H), lambda i: (0, 0)),         # final h (last layer)
                pl.BlockSpec((B, H), lambda i: (0, 0)),         # final c (last layer)
            ],
            scratch_shapes=(
                [pltpu.VMEM((T, B, G), jnp.float32)]            # hoisted layer-0 xproj
                + [pltpu.VMEM((T, B, H), jnp.float32)           # inter-layer activations
                   for _ in range(L - 1)]),
        ),
        compiler_params=pltpu.CompilerParams(
            dimension_semantics=("arbitrary",),
            vmem_limit_bytes=32 * 1024 * 1024),
    )(lens, x, wih_all, whh_all, b_all)
    return y, h, c


# ----------------------------------------------------------------------------
# Parameter init (matches torch nn.LSTM parameter shapes) and wrapper glue
# ----------------------------------------------------------------------------
def init_params(config, key):
    keys = jax.random.split(key, 1 + 4 * config.NUM_LAYER)
    params = {"embedding": jax.random.normal(
        keys[0], (config.DICT_CODE, config.EMB_SIZE), jnp.float32)}
    H = config.ENC_SIZE
    k = 1.0 / np.sqrt(H)
    for i in range(config.NUM_LAYER):
        b = 1 + 4 * i
        params["layer_{}".format(i)] = (
            jax.random.uniform(keys[b + 0], (4 * H, config.ENC_SIZE), jnp.float32, -k, k),
            jax.random.uniform(keys[b + 1], (4 * H, H), jnp.float32, -k, k),
            jax.random.uniform(keys[b + 2], (4 * H,), jnp.float32, -k, k),
            jax.random.uniform(keys[b + 3], (4 * H,), jnp.float32, -k, k),
        )
    return params


def _stack_layer_params(params, num_layers):
    wih, whh, bias = [], [], []
    for i in range(num_layers):
        w_ih, w_hh, b_ih, b_hh = params["layer_{}".format(i)]
        wih.append(jnp.asarray(w_ih).T)                      # (E, 4H)
        whh.append(jnp.asarray(w_hh).T)                      # (H, 4H)
        bias.append((b_ih + b_hh).reshape(1, -1))            # (1, 4H)
    return jnp.stack(wih), jnp.stack(whh), jnp.stack(bias)


def _pad_inputs(inputs):
    lengths = [len(s) for s in inputs]
    B, T = len(inputs), max(lengths)
    padded = np.zeros((T, B), dtype=np.int32)                # pad value 0 (like torch)
    for b, seq in enumerate(inputs):
        padded[: len(seq), b] = np.asarray(seq, dtype=np.int32)
    return padded, lengths


def encoder_forward(params, inputs, config):
    # TODO(synk): ragged-list padding / embedding gather / per-sequence truncation
    # stay in plain JAX (no clean single-kernel Pallas equivalent for ragged I/O).
    padded, lengths = _pad_inputs(inputs)
    B = len(inputs)
    T = padded.shape[0]

    # Pad batch to a multiple of 8 sublanes: in-kernel reshapes stay views and
    # all stores are unmasked.  Padded rows have length 0 -> zero state/output.
    B_pad = ((B + 7) // 8) * 8
    ids = np.zeros((T, B_pad), dtype=np.int32)
    ids[:, :B] = padded
    lens = np.zeros((B_pad, 1), dtype=np.int32)
    lens[:B, 0] = np.asarray(lengths, dtype=np.int32)

    assert config.EMB_SIZE == config.ENC_SIZE, "residual add requires EMB_SIZE == ENC_SIZE"
    wih_all, whh_all, b_all = _stack_layer_params(params, config.NUM_LAYER)
    y, h, c = _encoder_core(params["embedding"], jnp.asarray(ids) + 1,
                            jnp.asarray(lens), wih_all, whh_all, b_all,
                            num_layers=config.NUM_LAYER)

    hx, cx = h[None, :B], c[None, :B]                        # (1, B, H) like torch LSTM
    ys = [y[: lengths[b], b, :] for b in range(B)]           # truncate per sequence
    return ys, (hx, cx)


# ----------------------------------------------------------------------------
# Pure-JAX reference of the same math (sanity check)
# ----------------------------------------------------------------------------
def _ref_layer(x, mask, w_ih, w_hh, b_ih, b_hh):
    T, B, E = x.shape
    H = w_hh.shape[1]
    hi = lax.Precision.HIGHEST

    def step(carry, inp):
        h, c = carry
        xt, mt = inp
        gates = (jnp.dot(xt, w_ih.T, precision=hi)
                 + jnp.dot(h, w_hh.T, precision=hi) + b_ih + b_hh)
        i = jax.nn.sigmoid(gates[:, :H])
        f = jax.nn.sigmoid(gates[:, H:2 * H])
        g = jnp.tanh(gates[:, 2 * H:3 * H])
        o = jax.nn.sigmoid(gates[:, 3 * H:])
        c_new = f * c + i * g
        h_new = o * jnp.tanh(c_new)
        c = mt * c_new + (1.0 - mt) * c
        h = mt * h_new + (1.0 - mt) * h
        return (h, c), mt * h_new + xt

    init = (jnp.zeros((B, H), jnp.float32), jnp.zeros((B, H), jnp.float32))
    (h, c), ys = lax.scan(step, init, (x, mask))
    return ys, h, c


def _ref_forward(params, inputs, config):
    padded, lengths = _pad_inputs(inputs)
    B, T = len(inputs), max(lengths)
    ids = jnp.asarray(padded) + 1
    tensor = jnp.take(params["embedding"], ids, axis=0)
    lens = jnp.asarray(lengths, jnp.int32)
    mask = (jnp.arange(T)[:, None] < lens[None, :]).astype(jnp.float32)[..., None]
    h = c = None
    for i in range(config.NUM_LAYER):
        w_ih, w_hh, b_ih, b_hh = params["layer_{}".format(i)]
        tensor, h, c = _ref_layer(tensor, mask, w_ih, w_hh, b_ih, b_hh)
    ys = [tensor[: lengths[b], b, :] for b in range(B)]
    return ys, (h[None], c[None])


if __name__ == "__main__":
    cfg = Config()
    key = jax.random.PRNGKey(0)
    pkey, dkey = jax.random.split(key)
    params = init_params(cfg, pkey)

    # small synthetic variable-length integer sequences (seq<=8, batch=3)
    lengths = [5, 8, 3]
    Tmax, B = max(lengths), len(lengths)
    toks = np.asarray(jax.random.randint(dkey, (Tmax, B), 0, cfg.DICT_CODE - 1))
    inputs = [toks[: lengths[b], b].tolist() for b in range(B)]

    ys, (hx, cx) = encoder_forward(params, inputs, cfg)
    ys = [jax.block_until_ready(y) for y in ys]
    hx = jax.block_until_ready(hx)
    cx = jax.block_until_ready(cx)

    # sanity check against a pure-JAX reference of the same math
    ys_ref, (hx_ref, cx_ref) = _ref_forward(params, inputs, cfg)
    np.testing.assert_allclose(np.asarray(hx), np.asarray(hx_ref), rtol=2e-3, atol=2e-3)
    np.testing.assert_allclose(np.asarray(cx), np.asarray(cx_ref), rtol=2e-3, atol=2e-3)
    for a, b in zip(ys, ys_ref):
        np.testing.assert_allclose(np.asarray(a), np.asarray(b), rtol=2e-3, atol=2e-3)

    assert hx.shape == (1, B, cfg.ENC_SIZE) and cx.shape == (1, B, cfg.ENC_SIZE)
    assert all(y.shape == (lengths[b], cfg.ENC_SIZE) for b, y in enumerate(ys))
    print("KERNEL_OK")
</pallas_src>

<mosaic_0001>
module attributes {stable_mosaic.version = 11 : i64} {
  func.func @_encoder_kernel(%arg0: i32, %arg1: memref<8x1xi32, #tpu.memory_space<vmem>>, %arg2: memref<8x8x32xf32, #tpu.memory_space<vmem>>, %arg3: memref<2x32x128xf32, #tpu.memory_space<vmem>>, %arg4: memref<2x32x128xf32, #tpu.memory_space<vmem>>, %arg5: memref<2x1x128xf32, #tpu.memory_space<vmem>>, %arg6: memref<8x8x32xf32, #tpu.memory_space<vmem>>, %arg7: memref<8x32xf32, #tpu.memory_space<vmem>>, %arg8: memref<8x32xf32, #tpu.memory_space<vmem>>, %arg9: memref<8x8x128xf32, #tpu.memory_space<vmem>>, %arg10: memref<8x8x32xf32, #tpu.memory_space<vmem>>) attributes {dimension_semantics = [#tpu.dimension_semantics<arbitrary>], iteration_bounds = array<i64: 1>, scalar_prefetch = 0 : i64, scratch_operands = 2 : i64, tpu.core_type = #tpu.core_type<tc>, window_params = [{pipeline_mode = #tpu.pipeline_mode<synchronous>, transform_indices = @transform_0, window_bounds = array<i64: 8, 1>}, {pipeline_mode = #tpu.pipeline_mode<synchronous>, transform_indices = @transform_1, window_bounds = array<i64: 8, 8, 32>}, {pipeline_mode = #tpu.pipeline_mode<synchronous>, transform_indices = @transform_2, window_bounds = array<i64: 2, 32, 128>}, {pipeline_mode = #tpu.pipeline_mode<synchronous>, transform_indices = @transform_3, window_bounds = array<i64: 2, 32, 128>}, {pipeline_mode = #tpu.pipeline_mode<synchronous>, transform_indices = @transform_4, window_bounds = array<i64: 2, 1, 128>}, {pipeline_mode = #tpu.pipeline_mode<synchronous>, transform_indices = @transform_5, window_bounds = array<i64: 8, 8, 32>}, {pipeline_mode = #tpu.pipeline_mode<synchronous>, transform_indices = @transform_6, window_bounds = array<i64: 8, 32>}, {pipeline_mode = #tpu.pipeline_mode<synchronous>, transform_indices = @transform_7, window_bounds = array<i64: 8, 32>}]} {
    %c0 = arith.constant 0 : index
    %c0_0 = arith.constant 0 : index
    %0 = vector.load %arg1[%c0, %c0_0] : memref<8x1xi32, #tpu.memory_space<vmem>>, vector<8x1xi32>
    %1 = tpu.iota {dimensions = array<i32: 1>} : vector<8x128xi32>
    %c64_i32 = arith.constant 64 : i32
    %2 = vector.broadcast %c64_i32 : i32 to vector<8x128xi32>
    %3 = arith.cmpi sge, %1, %2 : vector<8x128xi32>
    %c96_i32 = arith.constant 96 : i32
    %4 = vector.broadcast %c96_i32 : i32 to vector<8x128xi32>
    %5 = arith.cmpi slt, %1, %4 : vector<8x128xi32>
    %6 = arith.andi %3, %5 : vector<8x128xi1>
    %c0_1 = arith.constant 0 : index
    %c0_2 = arith.constant 0 : index
    %c0_3 = arith.constant 0 : index
    %7 = vector.load %arg3[%c0_1, %c0_2, %c0_3] : memref<2x32x128xf32, #tpu.memory_space<vmem>>, vector<1x32x128xf32>
    %8 = vector.shape_cast %7 : vector<1x32x128xf32> to vector<32x128xf32>
    %c1 = arith.constant 1 : index
    %c0_4 = arith.constant 0 : index
    %c0_5 = arith.constant 0 : index
    %9 = vector.load %arg3[%c1, %c0_4, %c0_5] : memref<2x32x128xf32, #tpu.memory_space<vmem>>, vector<1x32x128xf32>
    %10 = vector.shape_cast %9 : vector<1x32x128xf32> to vector<32x128xf32>
    %c0_6 = arith.constant 0 : index
    %c0_7 = arith.constant 0 : index
    %c0_8 = arith.constant 0 : index
    %11 = vector.load %arg4[%c0_6, %c0_7, %c0_8] : memref<2x32x128xf32, #tpu.memory_space<vmem>>, vector<1x32x128xf32>
    %12 = vector.shape_cast %11 : vector<1x32x128xf32> to vector<32x128xf32>
    %c1_9 = arith.constant 1 : index
    %c0_10 = arith.constant 0 : index
    %c0_11 = arith.constant 0 : index
    %13 = vector.load %arg4[%c1_9, %c0_10, %c0_11] : memref<2x32x128xf32, #tpu.memory_space<vmem>>, vector<1x32x128xf32>
    %14 = vector.shape_cast %13 : vector<1x32x128xf32> to vector<32x128xf32>
    %c0_12 = arith.constant 0 : index
    %c0_13 = arith.constant 0 : index
    %c0_14 = arith.constant 0 : index
    %15 = vector.load %arg5[%c0_12, %c0_13, %c0_14] : memref<2x1x128xf32, #tpu.memory_space<vmem>>, vector<1x1x128xf32>
    %16 = vector.shape_cast %15 : vector<1x1x128xf32> to vector<1x128xf32>
    %c1_15 = arith.constant 1 : index
    %c0_16 = arith.constant 0 : index
    %c0_17 = arith.constant 0 : index
    %17 = vector.load %arg5[%c1_15, %c0_16, %c0_17] : memref<2x1x128xf32, #tpu.memory_space<vmem>>, vector<1x1x128xf32>
    %18 = vector.shape_cast %17 : vector<1x1x128xf32> to vector<1x128xf32>
    %c0_18 = arith.constant 0 : index
    %c0_19 = arith.constant 0 : index
    %c0_20 = arith.constant 0 : index
    %19 = vector.load %arg2[%c0_18, %c0_19, %c0_20] : memref<8x8x32xf32, #tpu.memory_space<vmem>>, vector<8x8x32xf32>
    %20 = vector.shape_cast %19 : vector<8x8x32xf32> to vector<64x32xf32>
    %cst = arith.constant dense<0.000000e+00> : vector<64x128xf32>
    %21 = tpu.matmul %20, %8, %cst {dimension_numbers = #tpu.dot_dimension_numbers<[1], [0], [0], [1], [0, 0, 1, 1], [], []>} : vector<64x32xf32>, vector<32x128xf32>, vector<64x128xf32> -> vector<64x128xf32>
    %22 = vector.broadcast %16 : vector<1x128xf32> to vector<64x128xf32>
    %23 = arith.addf %21, %22 : vector<64x128xf32>
    %24 = vector.shape_cast %23 : vector<64x128xf32> to vector<8x8x128xf32>
    %c0_21 = arith.constant 0 : index
    %c0_22 = arith.constant 0 : index
    %c0_23 = arith.constant 0 : index
    %25 = vector.load %arg9[%c0_21, %c0_22, %c0_23] : memref<8x8x128xf32, #tpu.memory_space<vmem>>, vector<8x8x128xf32>
    tpu.vector_store %arg9[%c0_21, %c0_22, %c0_23], %24 {strides = array<i32>} : memref<8x8x128xf32, #tpu.memory_space<vmem>>, vector<8x8x128xf32>,
    %cst_24 = arith.constant 0.000000e+00 : f32
    %26 = vector.broadcast %cst_24 : f32 to vector<8x8x32xf32>
    %c0_25 = arith.constant 0 : index
    %c0_26 = arith.constant 0 : index
    %c0_27 = arith.constant 0 : index
    %27 = vector.load %arg10[%c0_25, %c0_26, %c0_27] : memref<8x8x32xf32, #tpu.memory_space<vmem>>, vector<8x8x32xf32>
    tpu.vector_store %arg10[%c0_25, %c0_26, %c0_27], %26 {strides = array<i32>} : memref<8x8x32xf32, #tpu.memory_space<vmem>>, vector<8x8x32xf32>,
    %cst_28 = arith.constant 0.000000e+00 : f32
    %28 = vector.broadcast %cst_28 : f32 to vector<8x32xf32>
    %c0_i32 = arith.constant 0 : i32
    %c0_i32_29 = arith.constant 0 : i32
    %29 = arith.subi %c0_i32, %c0_i32_29 : i32
    %c0_i32_30 = arith.constant 0 : i32
    %c7_i32 = arith.constant 7 : i32
    %30 = arith.maxsi %c0_i32_30, %29 : i32
    %31 = arith.minsi %c7_i32, %30 : i32
    %c0_i32_31 = arith.constant 0 : i32
    %32 = arith.cmpi sge, %29, %c0_i32_31 : i32
    %33 = vector.broadcast %29 : i32 to vector<8x1xi32>
    %34 = arith.cmpi slt, %33, %0 : vector<8x1xi32>
    %35 = vector.broadcast %32 : i1 to vector<8x1xi1>
    %36 = arith.andi %35, %34 : vector<8x1xi1>
    %c0_i32_32 = arith.constant 0 : i32
    %37 = arith.cmpi sge, %29, %c0_i32_32 : i32
    %c8_i32 = arith.constant 8 : i32
    %38 = arith.cmpi slt, %29, %c8_i32 : i32
    %39 = arith.andi %37, %38 : i1
    %40 = arith.index_cast %31 : i32 to index
    %c0_33 = arith.constant 0 : index
    %c0_34 = arith.constant 0 : index
    %41 = vector.load %arg2[%40, %c0_33, %c0_34] : memref<8x8x32xf32, #tpu.memory_space<vmem>>, vector<1x8x32xf32>
    %42 = vector.shape_cast %41 : vector<1x8x32xf32> to vector<8x32xf32>
    %43 = arith.index_cast %31 : i32 to index
    %c0_35 = arith.constant 0 : index
    %c0_36 = arith.constant 0 : index
    %44 = vector.load %arg9[%43, %c0_35, %c0_36] : memref<8x8x128xf32, #tpu.memory_space<vmem>>, vector<1x8x128xf32>
    %45 = vector.shape_cast %44 : vector<1x8x128xf32> to vector<8x128xf32>
    %cst_37 = arith.constant dense<0.000000e+00> : vector<8x128xf32>
    %46 = tpu.matmul %28, %12, %cst_37 {dimension_numbers = #tpu.dot_dimension_numbers<[1], [0], [0], [1], [0, 0, 1, 1], [], []>} : vector<8x32xf32>, vector<32x128xf32>, vector<8x128xf32> -> vector<8x128xf32>
    %47 = arith.addf %45, %46 : vector<8x128xf32>
    %cst_38 = arith.constant 5.000000e-01 : f32
    %48 = vector.broadcast %cst_38 : f32 to vector<8x128xf32>
    %49 = arith.mulf %47, %48 : vector<8x128xf32>
    %50 = arith.select %6, %47, %49 : vector<8x128xi1>, vector<8x128xf32>
    %51 = math.tanh %50 : vector<8x128xf32>
    %cst_39 = arith.constant 5.000000e-01 : f32
    %52 = vector.broadcast %cst_39 : f32 to vector<8x128xf32>
    %53 = arith.mulf %51, %52 : vector<8x128xf32>
    %cst_40 = arith.constant 5.000000e-01 : f32
    %54 = vector.broadcast %cst_40 : f32 to vector<8x128xf32>
    %55 = arith.addf %53, %54 : vector<8x128xf32>
    %56 = arith.select %6, %51, %55 : vector<8x128xi1>, vector<8x128xf32>
    %57 = vector.extract_strided_slice %56 {offsets = [0, 0], sizes = [8, 32], strides = [1, 1]} : vector<8x128xf32> to vector<8x32xf32>
    %58 = vector.extract_strided_slice %56 {offsets = [0, 32], sizes = [8, 32], strides = [1, 1]} : vector<8x128xf32> to vector<8x32xf32>
    %59 = vector.extract_strided_slice %56 {offsets = [0, 64], sizes = [8, 32], strides = [1, 1]} : vector<8x128xf32> to vector<8x32xf32>
    %60 = vector.extract_strided_slice %56 {offsets = [0, 96], sizes = [8, 32], strides = [1, 1]} : vector<8x128xf32> to vector<8x32xf32>
    %61 = arith.mulf %58, %28 : vector<8x32xf32>
    %62 = arith.mulf %57, %59 : vector<8x32xf32>
    %63 = arith.addf %61, %62 : vector<8x32xf32>
    %64 = math.tanh %63 : vector<8x32xf32>
    %65 = arith.mulf %60, %64 : vector<8x32xf32>
    %66 = vector.shape_cast %36 : vector<8x1xi1> to vector<8x1xi1>
    %67 = vector.broadcast %66 : vector<8x1xi1> to vector<8x32xi1>
    %68 = arith.select %67, %65, %28 : vector<8x32xi1>, vector<8x32xf32>
    %69 = vector.shape_cast %36 : vector<8x1xi1> to vector<8x1xi1>
    %70 = vector.broadcast %69 : vector<8x1xi1> to vector<8x32xi1>
    %71 = arith.select %70, %63, %28 : vector<8x32xi1>, vector<8x32xf32>
    %cst_41 = arith.constant 0.000000e+00 : f32
    %72 = vector.shape_cast %36 : vector<8x1xi1> to vector<8x1xi1>
    %73 = vector.broadcast %72 : vector<8x1xi1> to vector<8x32xi1>
    %74 = vector.broadcast %cst_41 : f32 to vector<8x32xf32>
    %75 = arith.select %73, %65, %74 : vector<8x32xi1>, vector<8x32xf32>
    %76 = arith.addf %75, %42 : vector<8x32xf32>
    %77 = arith.index_cast %31 : i32 to index
    %c0_42 = arith.constant 0 : index
    %c0_43 = arith.constant 0 : index
    %78 = vector.load %arg10[%77, %c0_42, %c0_43] : memref<8x8x32xf32, #tpu.memory_space<vmem>>, vector<1x8x32xf32>
    %79 = vector.shape_cast %78 : vector<1x8x32xf32> to vector<8x32xf32>
    %80 = vector.broadcast %39 : i1 to vector<8x1xi1>
    %81 = vector.shape_cast %80 : vector<8x1xi1> to vector<8x1xi1>
    %82 = vector.broadcast %81 : vector<8x1xi1> to vector<8x32xi1>
    %83 = arith.select %82, %76, %79 : vector<8x32xi1>, vector<8x32xf32>
    %84 = arith.index_cast %31 : i32 to index
    %c0_44 = arith.constant 0 : index
    %c0_45 = arith.constant 0 : index
    %85 = vector.load %arg10[%84, %c0_44, %c0_45] : memref<8x8x32xf32, #tpu.memory_space<vmem>>, vector<1x8x32xf32>
    %86 = vector.shape_cast %85 : vector<1x8x32xf32> to vector<8x32xf32>
    %87 = vector.shape_cast %83 : vector<8x32xf32> to vector<1x8x32xf32>
    tpu.vector_store %arg10[%84, %c0_44, %c0_45], %87 {strides = array<i32>} : memref<8x8x32xf32, #tpu.memory_space<vmem>>, vector<1x8x32xf32>,
    %c1_i32 = arith.constant 1 : i32
    %88 = arith.subi %c0_i32, %c1_i32 : i32
    %c0_i32_46 = arith.constant 0 : i32
    %c7_i32_47 = arith.constant 7 : i32
    %89 = arith.maxsi %c0_i32_46, %88 : i32
    %90 = arith.minsi %c7_i32_47, %89 : i32
    %c0_i32_48 = arith.constant 0 : i32
    %91 = arith.cmpi sge, %88, %c0_i32_48 : i32
    %92 = vector.broadcast %88 : i32 to vector<8x1xi32>
    %93 = arith.cmpi slt, %92, %0 : vector<8x1xi32>
    %94 = vector.broadcast %91 : i1 to vector<8x1xi1>
    %95 = arith.andi %94, %93 : vector<8x1xi1>
    %c0_i32_49 = arith.constant 0 : i32
    %96 = arith.cmpi sge, %88, %c0_i32_49 : i32
    %c8_i32_50 = arith.constant 8 : i32
    %97 = arith.cmpi slt, %88, %c8_i32_50 : i32
    %98 = arith.andi %96, %97 : i1
    %99 = arith.index_cast %90 : i32 to index
    %c0_51 = arith.constant 0 : index
    %c0_52 = arith.constant 0 : index
    %100 = vector.load %arg10[%99, %c0_51, %c0_52] : memref<8x8x32xf32, #tpu.memory_space<vmem>>, vector<1x8x32xf32>
    %101 = vector.shape_cast %100 : vector<1x8x32xf32> to vector<8x32xf32>
    %cst_53 = arith.constant dense<0.000000e+00> : vector<8x128xf32>
    %102 = tpu.matmul %101, %10, %cst_53 {dimension_numbers = #tpu.dot_dimension_numbers<[1], [0], [0], [1], [0, 0, 1, 1], [], []>} : vector<8x32xf32>, vector<32x128xf32>, vector<8x128xf32> -> vector<8x128xf32>
    %103 = vector.broadcast %18 : vector<1x128xf32> to vector<8x128xf32>
    %104 = arith.addf %102, %103 : vector<8x128xf32>
    %cst_54 = arith.constant dense<0.000000e+00> : vector<8x128xf32>
    %105 = tpu.matmul %28, %14, %cst_54 {dimension_numbers = #tpu.dot_dimension_numbers<[1], [0], [0], [1], [0, 0, 1, 1], [], []>} : vector<8x32xf32>, vector<32x128xf32>, vector<8x128xf32> -> vector<8x128xf32>
    %106 = arith.addf %104, %105 : vector<8x128xf32>
    %cst_55 = arith.constant 5.000000e-01 : f32
    %107 = vector.broadcast %cst_55 : f32 to vector<8x128xf32>
    %108 = arith.mulf %106, %107 : vector<8x128xf32>
    %109 = arith.select %6, %106, %108 : vector<8x128xi1>, vector<8x128xf32>
    %110 = math.tanh %109 : vector<8x128xf32>
    %cst_56 = arith.constant 5.000000e-01 : f32
    %111 = vector.broadcast %cst_56 : f32 to vector<8x128xf32>
    %112 = arith.mulf %110, %111 : vector<8x128xf32>
    %cst_57 = arith.constant 5.000000e-01 : f32
    %113 = vector.broadcast %cst_57 : f32 to vector<8x128xf32>
    %114 = arith.addf %112, %113 : vector<8x128xf32>
    %115 = arith.select %6, %110, %114 : vector<8x128xi1>, vector<8x128xf32>
    %116 = vector.extract_strided_slice %115 {offsets = [0, 0], sizes = [8, 32], strides = [1, 1]} : vector<8x128xf32> to vector<8x32xf32>
    %117 = vector.extract_strided_slice %115 {offsets = [0, 32], sizes = [8, 32], strides = [1, 1]} : vector<8x128xf32> to vector<8x32xf32>
    %118 = vector.extract_strided_slice %115 {offsets = [0, 64], sizes = [8, 32], strides = [1, 1]} : vector<8x128xf32> to vector<8x32xf32>
    %119 = vector.extract_strided_slice %115 {offsets = [0, 96], sizes = [8, 32], strides = [1, 1]} : vector<8x128xf32> to vector<8x32xf32>
    %120 = arith.mulf %117, %28 : vector<8x32xf32>
    %121 = arith.mulf %116, %118 : vector<8x32xf32>
    %122 = arith.addf %120, %121 : vector<8x32xf32>
    %123 = math.tanh %122 : vector<8x32xf32>
    %124 = arith.mulf %119, %123 : vector<8x32xf32>
    %125 = vector.shape_cast %95 : vector<8x1xi1> to vector<8x1xi1>
    %126 = vector.broadcast %125 : vector<8x1xi1> to vector<8x32xi1>
    %127 = arith.select %126, %124, %28 : vector<8x32xi1>, vector<8x32xf32>
    %128 = vector.shape_cast %95 : vector<8x1xi1> to vector<8x1xi1>
    %129 = vector.broadcast %128 : vector<8x1xi1> to vector<8x32xi1>
    %130 = arith.select %129, %122, %28 : vector<8x32xi1>, vector<8x32xf32>
    %cst_58 = arith.constant 0.000000e+00 : f32
    %131 = vector.shape_cast %95 : vector<8x1xi1> to vector<8x1xi1>
    %132 = vector.broadcast %131 : vector<8x1xi1> to vector<8x32xi1>
    %133 = vector.broadcast %cst_58 : f32 to vector<8x32xf32>
    %134 = arith.select %132, %124, %133 : vector<8x32xi1>, vector<8x32xf32>
    %135 = arith.addf %134, %101 : vector<8x32xf32>
    %136 = arith.index_cast %90 : i32 to index
    %c0_59 = arith.constant 0 : index
    %c0_60 = arith.constant 0 : index
    %137 = vector.load %arg6[%136, %c0_59, %c0_60] : memref<8x8x32xf32, #tpu.memory_space<vmem>>, vector<1x8x32xf32>
    %138 = vector.shape_cast %137 : vector<1x8x32xf32> to vector<8x32xf32>
    %139 = vector.broadcast %98 : i1 to vector<8x1xi1>
    %140 = vector.shape_cast %139 : vector<8x1xi1> to vector<8x1xi1>
    %141 = vector.broadcast %140 : vector<8x1xi1> to vector<8x32xi1>
    %142 = arith.select %141, %135, %138 : vector<8x32xi1>, vector<8x32xf32>
    %143 = arith.index_cast %90 : i32 to index
    %c0_61 = arith.constant 0 : index
    %c0_62 = arith.constant 0 : index
    %144 = vector.load %arg6[%143, %c0_61, %c0_62] : memref<8x8x32xf32, #tpu.memory_space<vmem>>, vector<1x8x32xf32>
    %145 = vector.shape_cast %144 : vector<1x8x32xf32> to vector<8x32xf32>
    %146 = vector.shape_cast %142 : vector<8x32xf32> to vector<1x8x32xf32>
    tpu.vector_store %arg6[%143, %c0_61, %c0_62], %146 {strides = array<i32>} : memref<8x8x32xf32, #tpu.memory_space<vmem>>, vector<1x8x32xf32>,
    %c1_i32_63 = arith.constant 1 : i32
    %c0_i32_64 = arith.constant 0 : i32
    %147 = arith.subi %c1_i32_63, %c0_i32_64 : i32
    %c0_i32_65 = arith.constant 0 : i32
    %c7_i32_66 = arith.constant 7 : i32
    %148 = arith.maxsi %c0_i32_65, %147 : i32
    %149 = arith.minsi %c7_i32_66, %148 : i32
    %c0_i32_67 = arith.constant 0 : i32
    %150 = arith.cmpi sge, %147, %c0_i32_67 : i32
    %151 = vector.broadcast %147 : i32 to vector<8x1xi32>
    %152 = arith.cmpi slt, %151, %0 : vector<8x1xi32>
    %153 = vector.broadcast %150 : i1 to vector<8x1xi1>
    %154 = arith.andi %153, %152 : vector<8x1xi1>
    %c0_i32_68 = arith.constant 0 : i32
    %155 = arith.cmpi sge, %147, %c0_i32_68 : i32
    %c8_i32_69 = arith.constant 8 : i32
    %156 = arith.cmpi slt, %147, %c8_i32_69 : i32
    %157 = arith.andi %155, %156 : i1
    %158 = arith.index_cast %149 : i32 to index
    %c0_70 = arith.constant 0 : index
    %c0_71 = arith.constant 0 : index
    %159 = vector.load %arg2[%158, %c0_70, %c0_71] : memref<8x8x32xf32, #tpu.memory_space<vmem>>, vector<1x8x32xf32>
    %160 = vector.shape_cast %159 : vector<1x8x32xf32> to vector<8x32xf32>
    %161 = arith.index_cast %149 : i32 to index
    %c0_72 = arith.constant 0 : index
    %c0_73 = arith.constant 0 : index
    %162 = vector.load %arg9[%161, %c0_72, %c0_73] : memref<8x8x128xf32, #tpu.memory_space<vmem>>, vector<1x8x128xf32>
    %163 = vector.shape_cast %162 : vector<1x8x128xf32> to vector<8x128xf32>
    %cst_74 = arith.constant dense<0.000000e+00> : vector<8x128xf32>
    %164 = tpu.matmul %68, %12, %cst_74 {dimension_numbers = #tpu.dot_dimension_numbers<[1], [0], [0], [1], [0, 0, 1, 1], [], []>} : vector<8x32xf32>, vector<32x128xf32>, vector<8x128xf32> -> vector<8x128xf32>
    %165 = arith.addf %163, %164 : vector<8x128xf32>
    %cst_75 = arith.constant 5.000000e-01 : f32
    %166 = vector.broadcast %cst_75 : f32 to vector<8x128xf32>
    %167 = arith.mulf %165, %166 : vector<8x128xf32>
    %168 = arith.select %6, %165, %167 : vector<8x128xi1>, vector<8x128xf32>
    %169 = math.tanh %168 : vector<8x128xf32>
    %cst_76 = arith.constant 5.000000e-01 : f32
    %170 = vector.broadcast %cst_76 : f32 to vector<8x128xf32>
    %171 = arith.mulf %169, %170 : vector<8x128xf32>
    %cst_77 = arith.constant 5.000000e-01 : f32
    %172 = vector.broadcast %cst_77 : f32 to vector<8x128xf32>
    %173 = arith.addf %171, %172 : vector<8x128xf32>
    %174 = arith.select %6, %169, %173 : vector<8x128xi1>, vector<8x128xf32>
    %175 = vector.extract_strided_slice %174 {offsets = [0, 0], sizes = [8, 32], strides = [1, 1]} : vector<8x128xf32> to vector<8x32xf32>
    %176 = vector.extract_strided_slice %174 {offsets = [0, 32], sizes = [8, 32], strides = [1, 1]} : vector<8x128xf32> to vector<8x32xf32>
    %177 = vector.extract_strided_slice %174 {offsets = [0, 64], sizes = [8, 32], strides = [1, 1]} : vector<8x128xf32> to vector<8x32xf32>
    %178 = vector.extract_strided_slice %174 {offsets = [0, 96], sizes = [8, 32], strides = [1, 1]} : vector<8x128xf32> to vector<8x32xf32>
    %179 = arith.mulf %176, %71 : vector<8x32xf32>
    %180 = arith.mulf %175, %177 : vector<8x32xf32>
    %181 = arith.addf %179, %180 : vector<8x32xf32>
    %182 = math.tanh %181 : vector<8x32xf32>
    %183 = arith.mulf %178, %182 : vector<8x32xf32>
    %184 = vector.shape_cast %154 : vector<8x1xi1> to vector<8x1xi1>
    %185 = vector.broadcast %184 : vector<8x1xi1> to vector<8x32xi1>
    %186 = arith.select %185, %183, %68 : vector<8x32xi1>, vector<8x32xf32>
    %187 = vector.shape_cast %154 : vector<8x1xi1> to vector<8x1xi1>
    %188 = vector.broadcast %187 : vector<8x1xi1> to vector<8x32xi1>
    %189 = arith.select %188, %181, %71 : vector<8x32xi1>, vector<8x32xf32>
    %cst_78 = arith.constant 0.000000e+00 : f32
    %190 = vector.shape_cast %154 : vector<8x1xi1> to vector<8x1xi1>
    %191 = vector.broadcast %190 : vector<8x1xi1> to vector<8x32xi1>
    %192 = vector.broadcast %cst_78 : f32 to vector<8x32xf32>
    %193 = arith.select %191, %183, %192 : vector<8x32xi1>, vector<8x32xf32>
    %194 = arith.addf %193, %160 : vector<8x32xf32>
    %195 = arith.index_cast %149 : i32 to index
    %c0_79 = arith.constant 0 : index
    %c0_80 = arith.constant 0 : index
    %196 = vector.load %arg10[%195, %c0_79, %c0_80] : memref<8x8x32xf32, #tpu.memory_space<vmem>>, vector<1x8x32xf32>
    %197 = vector.shape_cast %196 : vector<1x8x32xf32> to vector<8x32xf32>
    %198 = vector.broadcast %157 : i1 to vector<8x1xi1>
    %199 = vector.shape_cast %198 : vector<8x1xi1> to vector<8x1xi1>
    %200 = vector.broadcast %199 : vector<8x1xi1> to vector<8x32xi1>
    %201 = arith.select %200, %194, %197 : vector<8x32xi1>, vector<8x32xf32>
    %202 = arith.index_cast %149 : i32 to index
    %c0_81 = arith.constant 0 : index
    %c0_82 = arith.constant 0 : index
    %203 = vector.load %arg10[%202, %c0_81, %c0_82] : memref<8x8x32xf32, #tpu.memory_space<vmem>>, vector<1x8x32xf32>
    %204 = vector.shape_cast %203 : vector<1x8x32xf32> to vector<8x32xf32>
    %205 = vector.shape_cast %201 : vector<8x32xf32> to vector<1x8x32xf32>
    tpu.vector_store %arg10[%202, %c0_81, %c0_82], %205 {strides = array<i32>} : memref<8x8x32xf32, #tpu.memory_space<vmem>>, vector<1x8x32xf32>,
    %c1_i32_83 = arith.constant 1 : i32
    %206 = arith.subi %c1_i32_63, %c1_i32_83 : i32
    %c0_i32_84 = arith.constant 0 : i32
    %c7_i32_85 = arith.constant 7 : i32
    %207 = arith.maxsi %c0_i32_84, %206 : i32
    %208 = arith.minsi %c7_i32_85, %207 : i32
    %c0_i32_86 = arith.constant 0 : i32
    %209 = arith.cmpi sge, %206, %c0_i32_86 : i32
    %210 = vector.broadcast %206 : i32 to vector<8x1xi32>
    %211 = arith.cmpi slt, %210, %0 : vector<8x1xi32>
    %212 = vector.broadcast %209 : i1 to vector<8x1xi1>
    %213 = arith.andi %212, %211 : vector<8x1xi1>
    %c0_i32_87 = arith.constant 0 : i32
    %214 = arith.cmpi sge, %206, %c0_i32_87 : i32
    %c8_i32_88 = arith.constant 8 : i32
    %215 = arith.cmpi slt, %206, %c8_i32_88 : i32
    %216 = arith.andi %214, %215 : i1
    %217 = arith.index_cast %208 : i32 to index
    %c0_89 = arith.constant 0 : index
    %c0_90 = arith.constant 0 : index
    %218 = vector.load %arg10[%217, %c0_89, %c0_90] : memref<8x8x32xf32, #tpu.memory_space<vmem>>, vector<1x8x32xf32>
    %219 = vector.shape_cast %218 : vector<1x8x32xf32> to vector<8x32xf32>
    %cst_91 = arith.constant dense<0.000000e+00> : vector<8x128xf32>
    %220 = tpu.matmul %219, %10, %cst_91 {dimension_numbers = #tpu.dot_dimension_numbers<[1], [0], [0], [1], [0, 0, 1, 1], [], []>} : vector<8x32xf32>, vector<32x128xf32>, vector<8x128xf32> -> vector<8x128xf32>
    %221 = vector.broadcast %18 : vector<1x128xf32> to vector<8x128xf32>
    %222 = arith.addf %220, %221 : vector<8x128xf32>
    %cst_92 = arith.constant dense<0.000000e+00> : vector<8x128xf32>
    %223 = tpu.matmul %127, %14, %cst_92 {dimension_numbers = #tpu.dot_dimension_numbers<[1], [0], [0], [1], [0, 0, 1, 1], [], []>} : vector<8x32xf32>, vector<32x128xf32>, vector<8x128xf32> -> vector<8x128xf32>
    %224 = arith.addf %222, %223 : vector<8x128xf32>
    %cst_93 = arith.constant 5.000000e-01 : f32
    %225 = vector.broadcast %cst_93 : f32 to vector<8x128xf32>
    %226 = arith.mulf %224, %225 : vector<8x128xf32>
    %227 = arith.select %6, %224, %226 : vector<8x128xi1>, vector<8x128xf32>
    %228 = math.tanh %227 : vector<8x128xf32>
    %cst_94 = arith.constant 5.000000e-01 : f32
    %229 = vector.broadcast %cst_94 : f32 to vector<8x128xf32>
    %230 = arith.mulf %228, %229 : vector<8x128xf32>
    %cst_95 = arith.constant 5.000000e-01 : f32
    %231 = vector.broadcast %cst_95 : f32 to vector<8x128xf32>
    %232 = arith.addf %230, %231 : vector<8x128xf32>
    %233 = arith.select %6, %228, %232 : vector<8x128xi1>, vector<8x128xf32>
    %234 = vector.extract_strided_slice %233 {offsets = [0, 0], sizes = [8, 32], strides = [1, 1]} : vector<8x128xf32> to vector<8x32xf32>
    %235 = vector.extract_strided_slice %233 {offsets = [0, 32], sizes = [8, 32], strides = [1, 1]} : vector<8x128xf32> to vector<8x32xf32>
    %236 = vector.extract_strided_slice %233 {offsets = [0, 64], sizes = [8, 32], strides = [1, 1]} : vector<8x128xf32> to vector<8x32xf32>
    %237 = vector.extract_strided_slice %233 {offsets = [0, 96], sizes = [8, 32], strides = [1, 1]} : vector<8x128xf32> to vector<8x32xf32>
    %238 = arith.mulf %235, %130 : vector<8x32xf32>
    %239 = arith.mulf %234, %236 : vector<8x32xf32>
    %240 = arith.addf %238, %239 : vector<8x32xf32>
    %241 = math.tanh %240 : vector<8x32xf32>
    %242 = arith.mulf %237, %241 : vector<8x32xf32>
    %243 = vector.shape_cast %213 : vector<8x1xi1> to vector<8x1xi1>
    %244 = vector.broadcast %243 : vector<8x1xi1> to vector<8x32xi1>
    %245 = arith.select %244, %242, %127 : vector<8x32xi1>, vector<8x32xf32>
    %246 = vector.shape_cast %213 : vector<8x1xi1> to vector<8x1xi1>
    %247 = vector.broadcast %246 : vector<8x1xi1> to vector<8x32xi1>
    %248 = arith.select %247, %240, %130 : vector<8x32xi1>, vector<8x32xf32>
    %cst_96 = arith.constant 0.000000e+00 : f32
    %249 = vector.shape_cast %213 : vector<8x1xi1> to vector<8x1xi1>
    %250 = vector.broadcast %249 : vector<8x1xi1> to vector<8x32xi1>
    %251 = vector.broadcast %cst_96 : f32 to vector<8x32xf32>
    %252 = arith.select %250, %242, %251 : vector<8x32xi1>, vector<8x32xf32>
    %253 = arith.addf %252, %219 : vector<8x32xf32>
    %254 = arith.index_cast %208 : i32 to index
    %c0_97 = arith.constant 0 : index
    %c0_98 = arith.constant 0 : index
    %255 = vector.load %arg6[%254, %c0_97, %c0_98] : memref<8x8x32xf32, #tpu.memory_space<vmem>>, vector<1x8x32xf32>
    %256 = vector.shape_cast %255 : vector<1x8x32xf32> to vector<8x32xf32>
    %257 = vector.broadcast %216 : i1 to vector<8x1xi1>
    %258 = vector.shape_cast %257 : vector<8x1xi1> to vector<8x1xi1>
    %259 = vector.broadcast %258 : vector<8x1xi1> to vector<8x32xi1>
    %260 = arith.select %259, %253, %256 : vector<8x32xi1>, vector<8x32xf32>
    %261 = arith.index_cast %208 : i32 to index
    %c0_99 = arith.constant 0 : index
    %c0_100 = arith.constant 0 : index
    %262 = vector.load %arg6[%261, %c0_99, %c0_100] : memref<8x8x32xf32, #tpu.memory_space<vmem>>, vector<1x8x32xf32>
    %263 = vector.shape_cast %262 : vector<1x8x32xf32> to vector<8x32xf32>
    %264 = vector.shape_cast %260 : vector<8x32xf32> to vector<1x8x32xf32>
    tpu.vector_store %arg6[%261, %c0_99, %c0_100], %264 {strides = array<i32>} : memref<8x8x32xf32, #tpu.memory_space<vmem>>, vector<1x8x32xf32>,
    %c2_i32 = arith.constant 2 : i32
    %c0_i32_101 = arith.constant 0 : i32
    %265 = arith.subi %c2_i32, %c0_i32_101 : i32
    %c0_i32_102 = arith.constant 0 : i32
    %c7_i32_103 = arith.constant 7 : i32
    %266 = arith.maxsi %c0_i32_102, %265 : i32
    %267 = arith.minsi %c7_i32_103, %266 : i32
    %c0_i32_104 = arith.constant 0 : i32
    %268 = arith.cmpi sge, %265, %c0_i32_104 : i32
    %269 = vector.broadcast %265 : i32 to vector<8x1xi32>
    %270 = arith.cmpi slt, %269, %0 : vector<8x1xi32>
    %271 = vector.broadcast %268 : i1 to vector<8x1xi1>
    %272 = arith.andi %271, %270 : vector<8x1xi1>
    %c0_i32_105 = arith.constant 0 : i32
    %273 = arith.cmpi sge, %265, %c0_i32_105 : i32
    %c8_i32_106 = arith.constant 8 : i32
    %274 = arith.cmpi slt, %265, %c8_i32_106 : i32
    %275 = arith.andi %273, %274 : i1
    %276 = arith.index_cast %267 : i32 to index
    %c0_107 = arith.constant 0 : index
    %c0_108 = arith.constant 0 : index
    %277 = vector.load %arg2[%276, %c0_107, %c0_108] : memref<8x8x32xf32, #tpu.memory_space<vmem>>, vector<1x8x32xf32>
    %278 = vector.shape_cast %277 : vector<1x8x32xf32> to vector<8x32xf32>
    %279 = arith.index_cast %267 : i32 to index
    %c0_109 = arith.constant 0 : index
    %c0_110 = arith.constant 0 : index
    %280 = vector.load %arg9[%279, %c0_109, %c0_110] : memref<8x8x128xf32, #tpu.memory_space<vmem>>, vector<1x8x128xf32>
    %281 = vector.shape_cast %280 : vector<1x8x128xf32> to vector<8x128xf32>
    %cst_111 = arith.constant dense<0.000000e+00> : vector<8x128xf32>
    %282 = tpu.matmul %186, %12, %cst_111 {dimension_numbers = #tpu.dot_dimension_numbers<[1], [0], [0], [1], [0, 0, 1, 1], [], []>} : vector<8x32xf32>, vector<32x128xf32>, vector<8x128xf32> -> vector<8x128xf32>
    %283 = arith.addf %281, %282 : vector<8x128xf32>
    %cst_112 = arith.constant 5.000000e-01 : f32
    %284 = vector.broadcast %cst_112 : f32 to vector<8x128xf32>
    %285 = arith.mulf %283, %284 : vector<8x128xf32>
    %286 = arith.select %6, %283, %285 : vector<8x128xi1>, vector<8x128xf32>
    %287 = math.tanh %286 : vector<8x128xf32>
    %cst_113 = arith.constant 5.000000e-01 : f32
    %288 = vector.broadcast %cst_113 : f32 to vector<8x128xf32>
    %289 = arith.mulf %287, %288 : vector<8x128xf32>
    %cst_114 = arith.constant 5.000000e-01 : f32
    %290 = vector.broadcast %cst_114 : f32 to vector<8x128xf32>
    %291 = arith.addf %289, %290 : vector<8x128xf32>
    %292 = arith.select %6, %287, %291 : vector<8x128xi1>, vector<8x128xf32>
    %293 = vector.extract_strided_slice %292 {offsets = [0, 0], sizes = [8, 32], strides = [1, 1]} : vector<8x128xf32> to vector<8x32xf32>
    %294 = vector.extract_strided_slice %292 {offsets = [0, 32], sizes = [8, 32], strides = [1, 1]} : vector<8x128xf32> to vector<8x32xf32>
    %295 = vector.extract_strided_slice %292 {offsets = [0, 64], sizes = [8, 32], strides = [1, 1]} : vector<8x128xf32> to vector<8x32xf32>
    %296 = vector.extract_strided_slice %292 {offsets = [0, 96], sizes = [8, 32], strides = [1, 1]} : vector<8x128xf32> to vector<8x32xf32>
    %297 = arith.mulf %294, %189 : vector<8x32xf32>
    %298 = arith.mulf %293, %295 : vector<8x32xf32>
    %299 = arith.addf %297, %298 : vector<8x32xf32>
    %300 = math.tanh %299 : vector<8x32xf32>
    %301 = arith.mulf %296, %300 : vector<8x32xf32>
    %302 = vector.shape_cast %272 : vector<8x1xi1> to vector<8x1xi1>
    %303 = vector.broadcast %302 : vector<8x1xi1> to vector<8x32xi1>
    %304 = arith.select %303, %301, %186 : vector<8x32xi1>, vector<8x32xf32>
    %305 = vector.shape_cast %272 : vector<8x1xi1> to vector<8x1xi1>
    %306 = vector.broadcast %305 : vector<8x1xi1> to vector<8x32xi1>
    %307 = arith.select %306, %299, %189 : vector<8x32xi1>, vector<8x32xf32>
    %cst_115 = arith.constant 0.000000e+00 : f32
    %308 = vector.shape_cast %272 : vector<8x1xi1> to vector<8x1xi1>
    %309 = vector.broadcast %308 : vector<8x1xi1> to vector<8x32xi1>
    %310 = vector.broadcast %cst_115 : f32 to vector<8x32xf32>
    %311 = arith.select %309, %301, %310 : vector<8x32xi1>, vector<8x32xf32>
    %312 = arith.addf %311, %278 : vector<8x32xf32>
    %313 = arith.index_cast %267 : i32 to index
    %c0_116 = arith.constant 0 : index
    %c0_117 = arith.constant 0 : index
    %314 = vector.load %arg10[%313, %c0_116, %c0_117] : memref<8x8x32xf32, #tpu.memory_space<vmem>>, vector<1x8x32xf32>
    %315 = vector.shape_cast %314 : vector<1x8x32xf32> to vector<8x32xf32>
    %316 = vector.broadcast %275 : i1 to vector<8x1xi1>
    %317 = vector.shape_cast %316 : vector<8x1xi1> to vector<8x1xi1>
    %318 = vector.broadcast %317 : vector<8x1xi1> to vector<8x32xi1>
    %319 = arith.select %318, %312, %315 : vector<8x32xi1>, vector<8x32xf32>
    %320 = arith.index_cast %267 : i32 to index
    %c0_118 = arith.constant 0 : index
    %c0_119 = arith.constant 0 : index
    %321 = vector.load %arg10[%320, %c0_118, %c0_119] : memref<8x8x32xf32, #tpu.memory_space<vmem>>, vector<1x8x32xf32>
    %322 = vector.shape_cast %321 : vector<1x8x32xf32> to vector<8x32xf32>
    %323 = vector.shape_cast %319 : vector<8x32xf32> to vector<1x8x32xf32>
    tpu.vector_store %arg10[%320, %c0_118, %c0_119], %323 {strides = array<i32>} : memref<8x8x32xf32, #tpu.memory_space<vmem>>, vector<1x8x32xf32>,
    %c1_i32_120 = arith.constant 1 : i32
    %324 = arith.subi %c2_i32, %c1_i32_120 : i32
    %c0_i32_121 = arith.constant 0 : i32
    %c7_i32_122 = arith.constant 7 : i32
    %325 = arith.maxsi %c0_i32_121, %324 : i32
    %326 = arith.minsi %c7_i32_122, %325 : i32
    %c0_i32_123 = arith.constant 0 : i32
    %327 = arith.cmpi sge, %324, %c0_i32_123 : i32
    %328 = vector.broadcast %324 : i32 to vector<8x1xi32>
    %329 = arith.cmpi slt, %328, %0 : vector<8x1xi32>
    %330 = vector.broadcast %327 : i1 to vector<8x1xi1>
    %331 = arith.andi %330, %329 : vector<8x1xi1>
    %c0_i32_124 = arith.constant 0 : i32
    %332 = arith.cmpi sge, %324, %c0_i32_124 : i32
    %c8_i32_125 = arith.constant 8 : i32
    %333 = arith.cmpi slt, %324, %c8_i32_125 : i32
    %334 = arith.andi %332, %333 : i1
    %335 = arith.index_cast %326 : i32 to index
    %c0_126 = arith.constant 0 : index
    %c0_127 = arith.constant 0 : index
    %336 = vector.load %arg10[%335, %c0_126, %c0_127] : memref<8x8x32xf32, #tpu.memory_space<vmem>>, vector<1x8x32xf32>
    %337 = vector.shape_cast %336 : vector<1x8x32xf32> to vector<8x32xf32>
    %cst_128 = arith.constant dense<0.000000e+00> : vector<8x128xf32>
    %338 = tpu.matmul %337, %10, %cst_128 {dimension_numbers = #tpu.dot_dimension_numbers<[1], [0], [0], [1], [0, 0, 1, 1], [], []>} : vector<8x32xf32>, vector<32x128xf32>, vector<8x128xf32> -> vector<8x128xf32>
    %339 = vector.broadcast %18 : vector<1x128xf32> to vector<8x128xf32>
    %340 = arith.addf %338, %339 : vector<8x128xf32>
    %cst_129 = arith.constant dense<0.000000e+00> : vector<8x128xf32>
    %341 = tpu.matmul %245, %14, %cst_129 {dimension_numbers = #tpu.dot_dimension_numbers<[1], [0], [0], [1], [0, 0, 1, 1], [], []>} : vector<8x32xf32>, vector<32x128xf32>, vector<8x128xf32> -> vector<8x128xf32>
    %342 = arith.addf %340, %341 : vector<8x128xf32>
    %cst_130 = arith.constant 5.000000e-01 : f32
    %343 = vector.broadcast %cst_130 : f32 to vector<8x128xf32>
    %344 = arith.mulf %342, %343 : vector<8x128xf32>
    %345 = arith.select %6, %342, %344 : vector<8x128xi1>, vector<8x128xf32>
    %346 = math.tanh %345 : vector<8x128xf32>
    %cst_131 = arith.constant 5.000000e-01 : f32
    %347 = vector.broadcast %cst_131 : f32 to vector<8x128xf32>
    %348 = arith.mulf %346, %347 : vector<8x128xf32>
    %cst_132 = arith.constant 5.000000e-01 : f32
    %349 = vector.broadcast %cst_132 : f32 to vector<8x128xf32>
    %350 = arith.addf %348, %349 : vector<8x128xf32>
    %351 = arith.select %6, %346, %350 : vector<8x128xi1>, vector<8x128xf32>
    %352 = vector.extract_strided_slice %351 {offsets = [0, 0], sizes = [8, 32], strides = [1, 1]} : vector<8x128xf32> to vector<8x32xf32>
    %353 = vector.extract_strided_slice %351 {offsets = [0, 32], sizes = [8, 32], strides = [1, 1]} : vector<8x128xf32> to vector<8x32xf32>
    %354 = vector.extract_strided_slice %351 {offsets = [0, 64], sizes = [8, 32], strides = [1, 1]} : vector<8x128xf32> to vector<8x32xf32>
    %355 = vector.extract_strided_slice %351 {offsets = [0, 96], sizes = [8, 32], strides = [1, 1]} : vector<8x128xf32> to vector<8x32xf32>
    %356 = arith.mulf %353, %248 : vector<8x32xf32>
    %357 = arith.mulf %352, %354 : vector<8x32xf32>
    %358 = arith.addf %356, %357 : vector<8x32xf32>
    %359 = math.tanh %358 : vector<8x32xf32>
    %360 = arith.mulf %355, %359 : vector<8x32xf32>
    %361 = vector.shape_cast %331 : vector<8x1xi1> to vector<8x1xi1>
    %362 = vector.broadcast %361 : vector<8x1xi1> to vector<8x32xi1>
    %363 = arith.select %362, %360, %245 : vector<8x32xi1>, vector<8x32xf32>
    %364 = vector.shape_cast %331 : vector<8x1xi1> to vector<8x1xi1>
    %365 = vector.broadcast %364 : vector<8x1xi1> to vector<8x32xi1>
    %366 = arith.select %365, %358, %248 : vector<8x32xi1>, vector<8x32xf32>
    %cst_133 = arith.constant 0.000000e+00 : f32
    %367 = vector.shape_cast %331 : vector<8x1xi1> to vector<8x1xi1>
    %368 = vector.broadcast %367 : vector<8x1xi1> to vector<8x32xi1>
    %369 = vector.broadcast %cst_133 : f32 to vector<8x32xf32>
    %370 = arith.select %368, %360, %369 : vector<8x32xi1>, vector<8x32xf32>
    %371 = arith.addf %370, %337 : vector<8x32xf32>
    %372 = arith.index_cast %326 : i32 to index
    %c0_134 = arith.constant 0 : index
    %c0_135 = arith.constant 0 : index
    %373 = vector.load %arg6[%372, %c0_134, %c0_135] : memref<8x8x32xf32, #tpu.memory_space<vmem>>, vector<1x8x32xf32>
    %374 = vector.shape_cast %373 : vector<1x8x32xf32> to vector<8x32xf32>
    %375 = vector.broadcast %334 : i1 to vector<8x1xi1>
    %376 = vector.shape_cast %375 : vector<8x1xi1> to vector<8x1xi1>
    %377 = vector.broadcast %376 : vector<8x1xi1> to vector<8x32xi1>
    %378 = arith.select %377, %371, %374 : vector<8x32xi1>, vector<8x32xf32>
    %379 = arith.index_cast %326 : i32 to index
    %c0_136 = arith.constant 0 : index
    %c0_137 = arith.constant 0 : index
    %380 = vector.load %arg6[%379, %c0_136, %c0_137] : memref<8x8x32xf32, #tpu.memory_space<vmem>>, vector<1x8x32xf32>
    %381 = vector.shape_cast %380 : vector<1x8x32xf32> to vector<8x32xf32>
    %382 = vector.shape_cast %378 : vector<8x32xf32> to vector<1x8x32xf32>
    tpu.vector_store %arg6[%379, %c0_136, %c0_137], %382 {strides = array<i32>} : memref<8x8x32xf32, #tpu.memory_space<vmem>>, vector<1x8x32xf32>,
    %c3_i32 = arith.constant 3 : i32
    %c0_i32_138 = arith.constant 0 : i32
    %383 = arith.subi %c3_i32, %c0_i32_138 : i32
    %c0_i32_139 = arith.constant 0 : i32
    %c7_i32_140 = arith.constant 7 : i32
    %384 = arith.maxsi %c0_i32_139, %383 : i32
    %385 = arith.minsi %c7_i32_140, %384 : i32
    %c0_i32_141 = arith.constant 0 : i32
    %386 = arith.cmpi sge, %383, %c0_i32_141 : i32
    %387 = vector.broadcast %383 : i32 to vector<8x1xi32>
    %388 = arith.cmpi slt, %387, %0 : vector<8x1xi32>
    %389 = vector.broadcast %386 : i1 to vector<8x1xi1>
    %390 = arith.andi %389, %388 : vector<8x1xi1>
    %c0_i32_142 = arith.constant 0 : i32
    %391 = arith.cmpi sge, %383, %c0_i32_142 : i32
    %c8_i32_143 = arith.constant 8 : i32
    %392 = arith.cmpi slt, %383, %c8_i32_143 : i32
    %393 = arith.andi %391, %392 : i1
    %394 = arith.index_cast %385 : i32 to index
    %c0_144 = arith.constant 0 : index
    %c0_145 = arith.constant 0 : index
    %395 = vector.load %arg2[%394, %c0_144, %c0_145] : memref<8x8x32xf32, #tpu.memory_space<vmem>>, vector<1x8x32xf32>
    %396 = vector.shape_cast %395 : vector<1x8x32xf32> to vector<8x32xf32>
    %397 = arith.index_cast %385 : i32 to index
    %c0_146 = arith.constant 0 : index
    %c0_147 = arith.constant 0 : index
    %398 = vector.load %arg9[%397, %c0_146, %c0_147] : memref<8x8x128xf32, #tpu.memory_space<vmem>>, vector<1x8x128xf32>
    %399 = vector.shape_cast %398 : vector<1x8x128xf32> to vector<8x128xf32>
    %cst_148 = arith.constant dense<0.000000e+00> : vector<8x128xf32>
    %400 = tpu.matmul %304, %12, %cst_148 {dimension_numbers = #tpu.dot_dimension_numbers<[1], [0], [0], [1], [0, 0, 1, 1], [], []>} : vector<8x32xf32>, vector<32x128xf32>, vector<8x128xf32> -> vector<8x128xf32>
    %401 = arith.addf %399, %400 : vector<8x128xf32>
    %cst_149 = arith.constant 5.000000e-01 : f32
    %402 = vector.broadcast %cst_149 : f32 to vector<8x128xf32>
    %403 = arith.mulf %401, %402 : vector<8x128xf32>
    %404 = arith.select %6, %401, %403 : vector<8x128xi1>, vector<8x128xf32>
    %405 = math.tanh %404 : vector<8x128xf32>
    %cst_150 = arith.constant 5.000000e-01 : f32
    %406 = vector.broadcast %cst_150 : f32 to vector<8x128xf32>
    %407 = arith.mulf %405, %406 : vector<8x128xf32>
    %cst_151 = arith.constant 5.000000e-01 : f32
    %408 = vector.broadcast %cst_151 : f32 to vector<8x128xf32>
    %409 = arith.addf %407, %408 : vector<8x128xf32>
    %410 = arith.select %6, %405, %409 : vector<8x128xi1>, vector<8x128xf32>
    %411 = vector.extract_strided_slice %410 {offsets = [0, 0], sizes = [8, 32], strides = [1, 1]} : vector<8x128xf32> to vector<8x32xf32>
    %412 = vector.extract_strided_slice %410 {offsets = [0, 32], sizes = [8, 32], strides = [1, 1]} : vector<8x128xf32> to vector<8x32xf32>
    %413 = vector.extract_strided_slice %410 {offsets = [0, 64], sizes = [8, 32], strides = [1, 1]} : vector<8x128xf32> to vector<8x32xf32>
    %414 = vector.extract_strided_slice %410 {offsets = [0, 96], sizes = [8, 32], strides = [1, 1]} : vector<8x128xf32> to vector<8x32xf32>
    %415 = arith.mulf %412, %307 : vector<8x32xf32>
    %416 = arith.mulf %411, %413 : vector<8x32xf32>
    %417 = arith.addf %415, %416 : vector<8x32xf32>
    %418 = math.tanh %417 : vector<8x32xf32>
    %419 = arith.mulf %414, %418 : vector<8x32xf32>
    %420 = vector.shape_cast %390 : vector<8x1xi1> to vector<8x1xi1>
    %421 = vector.broadcast %420 : vector<8x1xi1> to vector<8x32xi1>
    %422 = arith.select %421, %419, %304 : vector<8x32xi1>, vector<8x32xf32>
    %423 = vector.shape_cast %390 : vector<8x1xi1> to vector<8x1xi1>
    %424 = vector.broadcast %423 : vector<8x1xi1> to vector<8x32xi1>
    %425 = arith.select %424, %417, %307 : vector<8x32xi1>, vector<8x32xf32>
    %cst_152 = arith.constant 0.000000e+00 : f32
    %426 = vector.shape_cast %390 : vector<8x1xi1> to vector<8x1xi1>
    %427 = vector.broadcast %426 : vector<8x1xi1> to vector<8x32xi1>
    %428 = vector.broadcast %cst_152 : f32 to vector<8x32xf32>
    %429 = arith.select %427, %419, %428 : vector<8x32xi1>, vector<8x32xf32>
    %430 = arith.addf %429, %396 : vector<8x32xf32>
    %431 = arith.index_cast %385 : i32 to index
    %c0_153 = arith.constant 0 : index
    %c0_154 = arith.constant 0 : index
    %432 = vector.load %arg10[%431, %c0_153, %c0_154] : memref<8x8x32xf32, #tpu.memory_space<vmem>>, vector<1x8x32xf32>
    %433 = vector.shape_cast %432 : vector<1x8x32xf32> to vector<8x32xf32>
    %434 = vector.broadcast %393 : i1 to vector<8x1xi1>
    %435 = vector.shape_cast %434 : vector<8x1xi1> to vector<8x1xi1>
    %436 = vector.broadcast %435 : vector<8x1xi1> to vector<8x32xi1>
    %437 = arith.select %436, %430, %433 : vector<8x32xi1>, vector<8x32xf32>
    %438 = arith.index_cast %385 : i32 to index
    %c0_155 = arith.constant 0 : index
    %c0_156 = arith.constant 0 : index
    %439 = vector.load %arg10[%438, %c0_155, %c0_156] : memref<8x8x32xf32, #tpu.memory_space<vmem>>, vector<1x8x32xf32>
    %440 = vector.shape_cast %439 : vector<1x8x32xf32> to vector<8x32xf32>
    %441 = vector.shape_cast %437 : vector<8x32xf32> to vector<1x8x32xf32>
    tpu.vector_store %arg10[%438, %c0_155, %c0_156], %441 {strides = array<i32>} : memref<8x8x32xf32, #tpu.memory_space<vmem>>, vector<1x8x32xf32>,
    %c1_i32_157 = arith.constant 1 : i32
    %442 = arith.subi %c3_i32, %c1_i32_157 : i32
    %c0_i32_158 = arith.constant 0 : i32
    %c7_i32_159 = arith.constant 7 : i32
    %443 = arith.maxsi %c0_i32_158, %442 : i32
    %444 = arith.minsi %c7_i32_159, %443 : i32
    %c0_i32_160 = arith.constant 0 : i32
    %445 = arith.cmpi sge, %442, %c0_i32_160 : i32
    %446 = vector.broadcast %442 : i32 to vector<8x1xi32>
    %447 = arith.cmpi slt, %446, %0 : vector<8x1xi32>
    %448 = vector.broadcast %445 : i1 to vector<8x1xi1>
    %449 = arith.andi %448, %447 : vector<8x1xi1>
    %c0_i32_161 = arith.constant 0 : i32
    %450 = arith.cmpi sge, %442, %c0_i32_161 : i32
    %c8_i32_162 = arith.constant 8 : i32
    %451 = arith.cmpi slt, %442, %c8_i32_162 : i32
    %452 = arith.andi %450, %451 : i1
    %453 = arith.index_cast %444 : i32 to index
    %c0_163 = arith.constant 0 : index
    %c0_164 = arith.constant 0 : index
    %454 = vector.load %arg10[%453, %c0_163, %c0_164] : memref<8x8x32xf32, #tpu.memory_space<vmem>>, vector<1x8x32xf32>
    %455 = vector.shape_cast %454 : vector<1x8x32xf32> to vector<8x32xf32>
    %cst_165 = arith.constant dense<0.000000e+00> : vector<8x128xf32>
    %456 = tpu.matmul %455, %10, %cst_165 {dimension_numbers = #tpu.dot_dimension_numbers<[1], [0], [0], [1], [0, 0, 1, 1], [], []>} : vector<8x32xf32>, vector<32x128xf32>, vector<8x128xf32> -> vector<8x128xf32>
    %457 = vector.broadcast %18 : vector<1x128xf32> to vector<8x128xf32>
    %458 = arith.addf %456, %457 : vector<8x128xf32>
    %cst_166 = arith.constant dense<0.000000e+00> : vector<8x128xf32>
    %459 = tpu.matmul %363, %14, %cst_166 {dimension_numbers = #tpu.dot_dimension_numbers<[1], [0], [0], [1], [0, 0, 1, 1], [], []>} : vector<8x32xf32>, vector<32x128xf32>, vector<8x128xf32> -> vector<8x128xf32>
    %460 = arith.addf %458, %459 : vector<8x128xf32>
    %cst_167 = arith.constant 5.000000e-01 : f32
    %461 = vector.broadcast %cst_167 : f32 to vector<8x128xf32>
    %462 = arith.mulf %460, %461 : vector<8x128xf32>
    %463 = arith.select %6, %460, %462 : vector<8x128xi1>, vector<8x128xf32>
    %464 = math.tanh %463 : vector<8x128xf32>
    %cst_168 = arith.constant 5.000000e-01 : f32
    %465 = vector.broadcast %cst_168 : f32 to vector<8x128xf32>
    %466 = arith.mulf %464, %465 : vector<8x128xf32>
    %cst_169 = arith.constant 5.000000e-01 : f32
    %467 = vector.broadcast %cst_169 : f32 to vector<8x128xf32>
    %468 = arith.addf %466, %467 : vector<8x128xf32>
    %469 = arith.select %6, %464, %468 : vector<8x128xi1>, vector<8x128xf32>
    %470 = vector.extract_strided_slice %469 {offsets = [0, 0], sizes = [8, 32], strides = [1, 1]} : vector<8x128xf32> to vector<8x32xf32>
    %471 = vector.extract_strided_slice %469 {offsets = [0, 32], sizes = [8, 32], strides = [1, 1]} : vector<8x128xf32> to vector<8x32xf32>
    %472 = vector.extract_strided_slice %469 {offsets = [0, 64], sizes = [8, 32], strides = [1, 1]} : vector<8x128xf32> to vector<8x32xf32>
    %473 = vector.extract_strided_slice %469 {offsets = [0, 96], sizes = [8, 32], strides = [1, 1]} : vector<8x128xf32> to vector<8x32xf32>
    %474 = arith.mulf %471, %366 : vector<8x32xf32>
    %475 = arith.mulf %470, %472 : vector<8x32xf32>
    %476 = arith.addf %474, %475 : vector<8x32xf32>
    %477 = math.tanh %476 : vector<8x32xf32>
    %478 = arith.mulf %473, %477 : vector<8x32xf32>
    %479 = vector.shape_cast %449 : vector<8x1xi1> to vector<8x1xi1>
    %480 = vector.broadcast %479 : vector<8x1xi1> to vector<8x32xi1>
    %481 = arith.select %480, %478, %363 : vector<8x32xi1>, vector<8x32xf32>
    %482 = vector.shape_cast %449 : vector<8x1xi1> to vector<8x1xi1>
    %483 = vector.broadcast %482 : vector<8x1xi1> to vector<8x32xi1>
    %484 = arith.select %483, %476, %366 : vector<8x32xi1>, vector<8x32xf32>
    %cst_170 = arith.constant 0.000000e+00 : f32
    %485 = vector.shape_cast %449 : vector<8x1xi1> to vector<8x1xi1>
    %486 = vector.broadcast %485 : vector<8x1xi1> to vector<8x32xi1>
    %487 = vector.broadcast %cst_170 : f32 to vector<8x32xf32>
    %488 = arith.select %486, %478, %487 : vector<8x32xi1>, vector<8x32xf32>
    %489 = arith.addf %488, %455 : vector<8x32xf32>
    %490 = arith.index_cast %444 : i32 to index
    %c0_171 = arith.constant 0 : index
    %c0_172 = arith.constant 0 : index
    %491 = vector.load %arg6[%490, %c0_171, %c0_172] : memref<8x8x32xf32, #tpu.memory_space<vmem>>, vector<1x8x32xf32>
    %492 = vector.shape_cast %491 : vector<1x8x32xf32> to vector<8x32xf32>
    %493 = vector.broadcast %452 : i1 to vector<8x1xi1>
    %494 = vector.shape_cast %493 : vector<8x1xi1> to vector<8x1xi1>
    %495 = vector.broadcast %494 : vector<8x1xi1> to vector<8x32xi1>
    %496 = arith.select %495, %489, %492 : vector<8x32xi1>, vector<8x32xf32>
    %497 = arith.index_cast %444 : i32 to index
    %c0_173 = arith.constant 0 : index
    %c0_174 = arith.constant 0 : index
    %498 = vector.load %arg6[%497, %c0_173, %c0_174] : memref<8x8x32xf32, #tpu.memory_space<vmem>>, vector<1x8x32xf32>
    %499 = vector.shape_cast %498 : vector<1x8x32xf32> to vector<8x32xf32>
    %500 = vector.shape_cast %496 : vector<8x32xf32> to vector<1x8x32xf32>
    tpu.vector_store %arg6[%497, %c0_173, %c0_174], %500 {strides = array<i32>} : memref<8x8x32xf32, #tpu.memory_space<vmem>>, vector<1x8x32xf32>,
    %c4_i32 = arith.constant 4 : i32
    %c0_i32_175 = arith.constant 0 : i32
    %501 = arith.subi %c4_i32, %c0_i32_175 : i32
    %c0_i32_176 = arith.constant 0 : i32
    %c7_i32_177 = arith.constant 7 : i32
    %502 = arith.maxsi %c0_i32_176, %501 : i32
    %503 = arith.minsi %c7_i32_177, %502 : i32
    %c0_i32_178 = arith.constant 0 : i32
    %504 = arith.cmpi sge, %501, %c0_i32_178 : i32
    %505 = vector.broadcast %501 : i32 to vector<8x1xi32>
    %506 = arith.cmpi slt, %505, %0 : vector<8x1xi32>
    %507 = vector.broadcast %504 : i1 to vector<8x1xi1>
    %508 = arith.andi %507, %506 : vector<8x1xi1>
    %c0_i32_179 = arith.constant 0 : i32
    %509 = arith.cmpi sge, %501, %c0_i32_179 : i32
    %c8_i32_180 = arith.constant 8 : i32
    %510 = arith.cmpi slt, %501, %c8_i32_180 : i32
    %511 = arith.andi %509, %510 : i1
    %512 = arith.index_cast %503 : i32 to index
    %c0_181 = arith.constant 0 : index
    %c0_182 = arith.constant 0 : index
    %513 = vector.load %arg2[%512, %c0_181, %c0_182] : memref<8x8x32xf32, #tpu.memory_space<vmem>>, vector<1x8x32xf32>
    %514 = vector.shape_cast %513 : vector<1x8x32xf32> to vector<8x32xf32>
    %515 = arith.index_cast %503 : i32 to index
    %c0_183 = arith.constant 0 : index
    %c0_184 = arith.constant 0 : index
    %516 = vector.load %arg9[%515, %c0_183, %c0_184] : memref<8x8x128xf32, #tpu.memory_space<vmem>>, vector<1x8x128xf32>
    %517 = vector.shape_cast %516 : vector<1x8x128xf32> to vector<8x128xf32>
    %cst_185 = arith.constant dense<0.000000e+00> : vector<8x128xf32>
    %518 = tpu.matmul %422, %12, %cst_185 {dimension_numbers = #tpu.dot_dimension_numbers<[1], [0], [0], [1], [0, 0, 1, 1], [], []>} : vector<8x32xf32>, vector<32x128xf32>, vector<8x128xf32> -> vector<8x128xf32>
    %519 = arith.addf %517, %518 : vector<8x128xf32>
    %cst_186 = arith.constant 5.000000e-01 : f32
    %520 = vector.broadcast %cst_186 : f32 to vector<8x128xf32>
    %521 = arith.mulf %519, %520 : vector<8x128xf32>
    %522 = arith.select %6, %519, %521 : vector<8x128xi1>, vector<8x128xf32>
    %523 = math.tanh %522 : vector<8x128xf32>
    %cst_187 = arith.constant 5.000000e-01 : f32
    %524 = vector.broadcast %cst_187 : f32 to vector<8x128xf32>
    %525 = arith.mulf %523, %524 : vector<8x128xf32>
    %cst_188 = arith.constant 5.000000e-01 : f32
    %526 = vector.broadcast %cst_188 : f32 to vector<8x128xf32>
    %527 = arith.addf %525, %526 : vector<8x128xf32>
    %528 = arith.select %6, %523, %527 : vector<8x128xi1>, vector<8x128xf32>
    %529 = vector.extract_strided_slice %528 {offsets = [0, 0], sizes = [8, 32], strides = [1, 1]} : vector<8x128xf32> to vector<8x32xf32>
    %530 = vector.extract_strided_slice %528 {offsets = [0, 32], sizes = [8, 32], strides = [1, 1]} : vector<8x128xf32> to vector<8x32xf32>
    %531 = vector.extract_strided_slice %528 {offsets = [0, 64], sizes = [8, 32], strides = [1, 1]} : vector<8x128xf32> to vector<8x32xf32>
    %532 = vector.extract_strided_slice %528 {offsets = [0, 96], sizes = [8, 32], strides = [1, 1]} : vector<8x128xf32> to vector<8x32xf32>
    %533 = arith.mulf %530, %425 : vector<8x32xf32>
    %534 = arith.mulf %529, %531 : vector<8x32xf32>
    %535 = arith.addf %533, %534 : vector<8x32xf32>
    %536 = math.tanh %535 : vector<8x32xf32>
    %537 = arith.mulf %532, %536 : vector<8x32xf32>
    %538 = vector.shape_cast %508 : vector<8x1xi1> to vector<8x1xi1>
    %539 = vector.broadcast %538 : vector<8x1xi1> to vector<8x32xi1>
    %540 = arith.select %539, %537, %422 : vector<8x32xi1>, vector<8x32xf32>
    %541 = vector.shape_cast %508 : vector<8x1xi1> to vector<8x1xi1>
    %542 = vector.broadcast %541 : vector<8x1xi1> to vector<8x32xi1>
    %543 = arith.select %542, %535, %425 : vector<8x32xi1>, vector<8x32xf32>
    %cst_189 = arith.constant 0.000000e+00 : f32
    %544 = vector.shape_cast %508 : vector<8x1xi1> to vector<8x1xi1>
    %545 = vector.broadcast %544 : vector<8x1xi1> to vector<8x32xi1>
    %546 = vector.broadcast %cst_189 : f32 to vector<8x32xf32>
    %547 = arith.select %545, %537, %546 : vector<8x32xi1>, vector<8x32xf32>
    %548 = arith.addf %547, %514 : vector<8x32xf32>
    %549 = arith.index_cast %503 : i32 to index
    %c0_190 = arith.constant 0 : index
    %c0_191 = arith.constant 0 : index
    %550 = vector.load %arg10[%549, %c0_190, %c0_191] : memref<8x8x32xf32, #tpu.memory_space<vmem>>, vector<1x8x32xf32>
    %551 = vector.shape_cast %550 : vector<1x8x32xf32> to vector<8x32xf32>
    %552 = vector.broadcast %511 : i1 to vector<8x1xi1>
    %553 = vector.shape_cast %552 : vector<8x1xi1> to vector<8x1xi1>
    %554 = vector.broadcast %553 : vector<8x1xi1> to vector<8x32xi1>
    %555 = arith.select %554, %548, %551 : vector<8x32xi1>, vector<8x32xf32>
    %556 = arith.index_cast %503 : i32 to index
    %c0_192 = arith.constant 0 : index
    %c0_193 = arith.constant 0 : index
    %557 = vector.load %arg10[%556, %c0_192, %c0_193] : memref<8x8x32xf32, #tpu.memory_space<vmem>>, vector<1x8x32xf32>
    %558 = vector.shape_cast %557 : vector<1x8x32xf32> to vector<8x32xf32>
    %559 = vector.shape_cast %555 : vector<8x32xf32> to vector<1x8x32xf32>
    tpu.vector_store %arg10[%556, %c0_192, %c0_193], %559 {strides = array<i32>} : memref<8x8x32xf32, #tpu.memory_space<vmem>>, vector<1x8x32xf32>,
    %c1_i32_194 = arith.constant 1 : i32
    %560 = arith.subi %c4_i32, %c1_i32_194 : i32
    %c0_i32_195 = arith.constant 0 : i32
    %c7_i32_196 = arith.constant 7 : i32
    %561 = arith.maxsi %c0_i32_195, %560 : i32
    %562 = arith.minsi %c7_i32_196, %561 : i32
    %c0_i32_197 = arith.constant 0 : i32
    %563 = arith.cmpi sge, %560, %c0_i32_197 : i32
    %564 = vector.broadcast %560 : i32 to vector<8x1xi32>
    %565 = arith.cmpi slt, %564, %0 : vector<8x1xi32>
    %566 = vector.broadcast %563 : i1 to vector<8x1xi1>
    %567 = arith.andi %566, %565 : vector<8x1xi1>
    %c0_i32_198 = arith.constant 0 : i32
    %568 = arith.cmpi sge, %560, %c0_i32_198 : i32
    %c8_i32_199 = arith.constant 8 : i32
    %569 = arith.cmpi slt, %560, %c8_i32_199 : i32
    %570 = arith.andi %568, %569 : i1
    %571 = arith.index_cast %562 : i32 to index
    %c0_200 = arith.constant 0 : index
    %c0_201 = arith.constant 0 : index
    %572 = vector.load %arg10[%571, %c0_200, %c0_201] : memref<8x8x32xf32, #tpu.memory_space<vmem>>, vector<1x8x32xf32>
    %573 = vector.shape_cast %572 : vector<1x8x32xf32> to vector<8x32xf32>
    %cst_202 = arith.constant dense<0.000000e+00> : vector<8x128xf32>
    %574 = tpu.matmul %573, %10, %cst_202 {dimension_numbers = #tpu.dot_dimension_numbers<[1], [0], [0], [1], [0, 0, 1, 1], [], []>} : vector<8x32xf32>, vector<32x128xf32>, vector<8x128xf32> -> vector<8x128xf32>
    %575 = vector.broadcast %18 : vector<1x128xf32> to vector<8x128xf32>
    %576 = arith.addf %574, %575 : vector<8x128xf32>
    %cst_203 = arith.constant dense<0.000000e+00> : vector<8x128xf32>
    %577 = tpu.matmul %481, %14, %cst_203 {dimension_numbers = #tpu.dot_dimension_numbers<[1], [0], [0], [1], [0, 0, 1, 1], [], []>} : vector<8x32xf32>, vector<32x128xf32>, vector<8x128xf32> -> vector<8x128xf32>
    %578 = arith.addf %576, %577 : vector<8x128xf32>
    %cst_204 = arith.constant 5.000000e-01 : f32
    %579 = vector.broadcast %cst_204 : f32 to vector<8x128xf32>
    %580 = arith.mulf %578, %579 : vector<8x128xf32>
    %581 = arith.select %6, %578, %580 : vector<8x128xi1>, vector<8x128xf32>
    %582 = math.tanh %581 : vector<8x128xf32>
    %cst_205 = arith.constant 5.000000e-01 : f32
    %583 = vector.broadcast %cst_205 : f32 to vector<8x128xf32>
    %584 = arith.mulf %582, %583 : vector<8x128xf32>
    %cst_206 = arith.constant 5.000000e-01 : f32
    %585 = vector.broadcast %cst_206 : f32 to vector<8x128xf32>
    %586 = arith.addf %584, %585 : vector<8x128xf32>
    %587 = arith.select %6, %582, %586 : vector<8x128xi1>, vector<8x128xf32>
    %588 = vector.extract_strided_slice %587 {offsets = [0, 0], sizes = [8, 32], strides = [1, 1]} : vector<8x128xf32> to vector<8x32xf32>
    %589 = vector.extract_strided_slice %587 {offsets = [0, 32], sizes = [8, 32], strides = [1, 1]} : vector<8x128xf32> to vector<8x32xf32>
    %590 = vector.extract_strided_slice %587 {offsets = [0, 64], sizes = [8, 32], strides = [1, 1]} : vector<8x128xf32> to vector<8x32xf32>
    %591 = vector.extract_strided_slice %587 {offsets = [0, 96], sizes = [8, 32], strides = [1, 1]} : vector<8x128xf32> to vector<8x32xf32>
    %592 = arith.mulf %589, %484 : vector<8x32xf32>
    %593 = arith.mulf %588, %590 : vector<8x32xf32>
    %594 = arith.addf %592, %593 : vector<8x32xf32>
    %595 = math.tanh %594 : vector<8x32xf32>
    %596 = arith.mulf %591, %595 : vector<8x32xf32>
    %597 = vector.shape_cast %567 : vector<8x1xi1> to vector<8x1xi1>
    %598 = vector.broadcast %597 : vector<8x1xi1> to vector<8x32xi1>
    %599 = arith.select %598, %596, %481 : vector<8x32xi1>, vector<8x32xf32>
    %600 = vector.shape_cast %567 : vector<8x1xi1> to vector<8x1xi1>
    %601 = vector.broadcast %600 : vector<8x1xi1> to vector<8x32xi1>
    %602 = arith.select %601, %594, %484 : vector<8x32xi1>, vector<8x32xf32>
    %cst_207 = arith.constant 0.000000e+00 : f32
    %603 = vector.shape_cast %567 : vector<8x1xi1> to vector<8x1xi1>
    %604 = vector.broadcast %603 : vector<8x1xi1> to vector<8x32xi1>
    %605 = vector.broadcast %cst_207 : f32 to vector<8x32xf32>
    %606 = arith.select %604, %596, %605 : vector<8x32xi1>, vector<8x32xf32>
    %607 = arith.addf %606, %573 : vector<8x32xf32>
    %608 = arith.index_cast %562 : i32 to index
    %c0_208 = arith.constant 0 : index
    %c0_209 = arith.constant 0 : index
    %609 = vector.load %arg6[%608, %c0_208, %c0_209] : memref<8x8x32xf32, #tpu.memory_space<vmem>>, vector<1x8x32xf32>
    %610 = vector.shape_cast %609 : vector<1x8x32xf32> to vector<8x32xf32>
    %611 = vector.broadcast %570 : i1 to vector<8x1xi1>
    %612 = vector.shape_cast %611 : vector<8x1xi1> to vector<8x1xi1>
    %613 = vector.broadcast %612 : vector<8x1xi1> to vector<8x32xi1>
    %614 = arith.select %613, %607, %610 : vector<8x32xi1>, vector<8x32xf32>
    %615 = arith.index_cast %562 : i32 to index
    %c0_210 = arith.constant 0 : index
    %c0_211 = arith.constant 0 : index
    %616 = vector.load %arg6[%615, %c0_210, %c0_211] : memref<8x8x32xf32, #tpu.memory_space<vmem>>, vector<1x8x32xf32>
    %617 = vector.shape_cast %616 : vector<1x8x32xf32> to vector<8x32xf32>
    %618 = vector.shape_cast %614 : vector<8x32xf32> to vector<1x8x32xf32>
    tpu.vector_store %arg6[%615, %c0_210, %c0_211], %618 {strides = array<i32>} : memref<8x8x32xf32, #tpu.memory_space<vmem>>, vector<1x8x32xf32>,
    %c5_i32 = arith.constant 5 : i32
    %c0_i32_212 = arith.constant 0 : i32
    %619 = arith.subi %c5_i32, %c0_i32_212 : i32
    %c0_i32_213 = arith.constant 0 : i32
    %c7_i32_214 = arith.constant 7 : i32
    %620 = arith.maxsi %c0_i32_213, %619 : i32
    %621 = arith.minsi %c7_i32_214, %620 : i32
    %c0_i32_215 = arith.constant 0 : i32
    %622 = arith.cmpi sge, %619, %c0_i32_215 : i32
    %623 = vector.broadcast %619 : i32 to vector<8x1xi32>
    %624 = arith.cmpi slt, %623, %0 : vector<8x1xi32>
    %625 = vector.broadcast %622 : i1 to vector<8x1xi1>
    %626 = arith.andi %625, %624 : vector<8x1xi1>
    %c0_i32_216 = arith.constant 0 : i32
    %627 = arith.cmpi sge, %619, %c0_i32_216 : i32
    %c8_i32_217 = arith.constant 8 : i32
    %628 = arith.cmpi slt, %619, %c8_i32_217 : i32
    %629 = arith.andi %627, %628 : i1
    %630 = arith.index_cast %621 : i32 to index
    %c0_218 = arith.constant 0 : index
    %c0_219 = arith.constant 0 : index
    %631 = vector.load %arg2[%630, %c0_218, %c0_219] : memref<8x8x32xf32, #tpu.memory_space<vmem>>, vector<1x8x32xf32>
    %632 = vector.shape_cast %631 : vector<1x8x32xf32> to vector<8x32xf32>
    %633 = arith.index_cast %621 : i32 to index
    %c0_220 = arith.constant 0 : index
    %c0_221 = arith.constant 0 : index
    %634 = vector.load %arg9[%633, %c0_220, %c0_221] : memref<8x8x128xf32, #tpu.memory_space<vmem>>, vector<1x8x128xf32>
    %635 = vector.shape_cast %634 : vector<1x8x128xf32> to vector<8x128xf32>
    %cst_222 = arith.constant dense<0.000000e+00> : vector<8x128xf32>
    %636 = tpu.matmul %540, %12, %cst_222 {dimension_numbers = #tpu.dot_dimension_numbers<[1], [0], [0], [1], [0, 0, 1, 1], [], []>} : vector<8x32xf32>, vector<32x128xf32>, vector<8x128xf32> -> vector<8x128xf32>
    %637 = arith.addf %635, %636 : vector<8x128xf32>
    %cst_223 = arith.constant 5.000000e-01 : f32
    %638 = vector.broadcast %cst_223 : f32 to vector<8x128xf32>
    %639 = arith.mulf %637, %638 : vector<8x128xf32>
    %640 = arith.select %6, %637, %639 : vector<8x128xi1>, vector<8x128xf32>
    %641 = math.tanh %640 : vector<8x128xf32>
    %cst_224 = arith.constant 5.000000e-01 : f32
    %642 = vector.broadcast %cst_224 : f32 to vector<8x128xf32>
    %643 = arith.mulf %641, %642 : vector<8x128xf32>
    %cst_225 = arith.constant 5.000000e-01 : f32
    %644 = vector.broadcast %cst_225 : f32 to vector<8x128xf32>
    %645 = arith.addf %643, %644 : vector<8x128xf32>
    %646 = arith.select %6, %641, %645 : vector<8x128xi1>, vector<8x128xf32>
    %647 = vector.extract_strided_slice %646 {offsets = [0, 0], sizes = [8, 32], strides = [1, 1]} : vector<8x128xf32> to vector<8x32xf32>
    %648 = vector.extract_strided_slice %646 {offsets = [0, 32], sizes = [8, 32], strides = [1, 1]} : vector<8x128xf32> to vector<8x32xf32>
    %649 = vector.extract_strided_slice %646 {offsets = [0, 64], sizes = [8, 32], strides = [1, 1]} : vector<8x128xf32> to vector<8x32xf32>
    %650 = vector.extract_strided_slice %646 {offsets = [0, 96], sizes = [8, 32], strides = [1, 1]} : vector<8x128xf32> to vector<8x32xf32>
    %651 = arith.mulf %648, %543 : vector<8x32xf32>
    %652 = arith.mulf %647, %649 : vector<8x32xf32>
    %653 = arith.addf %651, %652 : vector<8x32xf32>
    %654 = math.tanh %653 : vector<8x32xf32>
    %655 = arith.mulf %650, %654 : vector<8x32xf32>
    %656 = vector.shape_cast %626 : vector<8x1xi1> to vector<8x1xi1>
    %657 = vector.broadcast %656 : vector<8x1xi1> to vector<8x32xi1>
    %658 = arith.select %657, %655, %540 : vector<8x32xi1>, vector<8x32xf32>
    %659 = vector.shape_cast %626 : vector<8x1xi1> to vector<8x1xi1>
    %660 = vector.broadcast %659 : vector<8x1xi1> to vector<8x32xi1>
    %661 = arith.select %660, %653, %543 : vector<8x32xi1>, vector<8x32xf32>
    %cst_226 = arith.constant 0.000000e+00 : f32
    %662 = vector.shape_cast %626 : vector<8x1xi1> to vector<8x1xi1>
    %663 = vector.broadcast %662 : vector<8x1xi1> to vector<8x32xi1>
    %664 = vector.broadcast %cst_226 : f32 to vector<8x32xf32>
    %665 = arith.select %663, %655, %664 : vector<8x32xi1>, vector<8x32xf32>
    %666 = arith.addf %665, %632 : vector<8x32xf32>
    %667 = arith.index_cast %621 : i32 to index
    %c0_227 = arith.constant 0 : index
    %c0_228 = arith.constant 0 : index
    %668 = vector.load %arg10[%667, %c0_227, %c0_228] : memref<8x8x32xf32, #tpu.memory_space<vmem>>, vector<1x8x32xf32>
    %669 = vector.shape_cast %668 : vector<1x8x32xf32> to vector<8x32xf32>
    %670 = vector.broadcast %629 : i1 to vector<8x1xi1>
    %671 = vector.shape_cast %670 : vector<8x1xi1> to vector<8x1xi1>
    %672 = vector.broadcast %671 : vector<8x1xi1> to vector<8x32xi1>
    %673 = arith.select %672, %666, %669 : vector<8x32xi1>, vector<8x32xf32>
    %674 = arith.index_cast %621 : i32 to index
    %c0_229 = arith.constant 0 : index
    %c0_230 = arith.constant 0 : index
    %675 = vector.load %arg10[%674, %c0_229, %c0_230] : memref<8x8x32xf32, #tpu.memory_space<vmem>>, vector<1x8x32xf32>
    %676 = vector.shape_cast %675 : vector<1x8x32xf32> to vector<8x32xf32>
    %677 = vector.shape_cast %673 : vector<8x32xf32> to vector<1x8x32xf32>
    tpu.vector_store %arg10[%674, %c0_229, %c0_230], %677 {strides = array<i32>} : memref<8x8x32xf32, #tpu.memory_space<vmem>>, vector<1x8x32xf32>,
    %c1_i32_231 = arith.constant 1 : i32
    %678 = arith.subi %c5_i32, %c1_i32_231 : i32
    %c0_i32_232 = arith.constant 0 : i32
    %c7_i32_233 = arith.constant 7 : i32
    %679 = arith.maxsi %c0_i32_232, %678 : i32
    %680 = arith.minsi %c7_i32_233, %679 : i32
    %c0_i32_234 = arith.constant 0 : i32
    %681 = arith.cmpi sge, %678, %c0_i32_234 : i32
    %682 = vector.broadcast %678 : i32 to vector<8x1xi32>
    %683 = arith.cmpi slt, %682, %0 : vector<8x1xi32>
    %684 = vector.broadcast %681 : i1 to vector<8x1xi1>
    %685 = arith.andi %684, %683 : vector<8x1xi1>
    %c0_i32_235 = arith.constant 0 : i32
    %686 = arith.cmpi sge, %678, %c0_i32_235 : i32
    %c8_i32_236 = arith.constant 8 : i32
    %687 = arith.cmpi slt, %678, %c8_i32_236 : i32
    %688 = arith.andi %686, %687 : i1
    %689 = arith.index_cast %680 : i32 to index
    %c0_237 = arith.constant 0 : index
    %c0_238 = arith.constant 0 : index
    %690 = vector.load %arg10[%689, %c0_237, %c0_238] : memref<8x8x32xf32, #tpu.memory_space<vmem>>, vector<1x8x32xf32>
    %691 = vector.shape_cast %690 : vector<1x8x32xf32> to vector<8x32xf32>
    %cst_239 = arith.constant dense<0.000000e+00> : vector<8x128xf32>
    %692 = tpu.matmul %691, %10, %cst_239 {dimension_numbers = #tpu.dot_dimension_numbers<[1], [0], [0], [1], [0, 0, 1, 1], [], []>} : vector<8x32xf32>, vector<32x128xf32>, vector<8x128xf32> -> vector<8x128xf32>
    %693 = vector.broadcast %18 : vector<1x128xf32> to vector<8x128xf32>
    %694 = arith.addf %692, %693 : vector<8x128xf32>
    %cst_240 = arith.constant dense<0.000000e+00> : vector<8x128xf32>
    %695 = tpu.matmul %599, %14, %cst_240 {dimension_numbers = #tpu.dot_dimension_numbers<[1], [0], [0], [1], [0, 0, 1, 1], [], []>} : vector<8x32xf32>, vector<32x128xf32>, vector<8x128xf32> -> vector<8x128xf32>
    %696 = arith.addf %694, %695 : vector<8x128xf32>
    %cst_241 = arith.constant 5.000000e-01 : f32
    %697 = vector.broadcast %cst_241 : f32 to vector<8x128xf32>
    %698 = arith.mulf %696, %697 : vector<8x128xf32>
    %699 = arith.select %6, %696, %698 : vector<8x128xi1>, vector<8x128xf32>
    %700 = math.tanh %699 : vector<8x128xf32>
    %cst_242 = arith.constant 5.000000e-01 : f32
    %701 = vector.broadcast %cst_242 : f32 to vector<8x128xf32>
    %702 = arith.mulf %700, %701 : vector<8x128xf32>
    %cst_243 = arith.constant 5.000000e-01 : f32
    %703 = vector.broadcast %cst_243 : f32 to vector<8x128xf32>
    %704 = arith.addf %702, %703 : vector<8x128xf32>
    %705 = arith.select %6, %700, %704 : vector<8x128xi1>, vector<8x128xf32>
    %706 = vector.extract_strided_slice %705 {offsets = [0, 0], sizes = [8, 32], strides = [1, 1]} : vector<8x128xf32> to vector<8x32xf32>
    %707 = vector.extract_strided_slice %705 {offsets = [0, 32], sizes = [8, 32], strides = [1, 1]} : vector<8x128xf32> to vector<8x32xf32>
    %708 = vector.extract_strided_slice %705 {offsets = [0, 64], sizes = [8, 32], strides = [1, 1]} : vector<8x128xf32> to vector<8x32xf32>
    %709 = vector.extract_strided_slice %705 {offsets = [0, 96], sizes = [8, 32], strides = [1, 1]} : vector<8x128xf32> to vector<8x32xf32>
    %710 = arith.mulf %707, %602 : vector<8x32xf32>
    %711 = arith.mulf %706, %708 : vector<8x32xf32>
    %712 = arith.addf %710, %711 : vector<8x32xf32>
    %713 = math.tanh %712 : vector<8x32xf32>
    %714 = arith.mulf %709, %713 : vector<8x32xf32>
    %715 = vector.shape_cast %685 : vector<8x1xi1> to vector<8x1xi1>
    %716 = vector.broadcast %715 : vector<8x1xi1> to vector<8x32xi1>
    %717 = arith.select %716, %714, %599 : vector<8x32xi1>, vector<8x32xf32>
    %718 = vector.shape_cast %685 : vector<8x1xi1> to vector<8x1xi1>
    %719 = vector.broadcast %718 : vector<8x1xi1> to vector<8x32xi1>
    %720 = arith.select %719, %712, %602 : vector<8x32xi1>, vector<8x32xf32>
    %cst_244 = arith.constant 0.000000e+00 : f32
    %721 = vector.shape_cast %685 : vector<8x1xi1> to vector<8x1xi1>
    %722 = vector.broadcast %721 : vector<8x1xi1> to vector<8x32xi1>
    %723 = vector.broadcast %cst_244 : f32 to vector<8x32xf32>
    %724 = arith.select %722, %714, %723 : vector<8x32xi1>, vector<8x32xf32>
    %725 = arith.addf %724, %691 : vector<8x32xf32>
    %726 = arith.index_cast %680 : i32 to index
    %c0_245 = arith.constant 0 : index
    %c0_246 = arith.constant 0 : index
    %727 = vector.load %arg6[%726, %c0_245, %c0_246] : memref<8x8x32xf32, #tpu.memory_space<vmem>>, vector<1x8x32xf32>
    %728 = vector.shape_cast %727 : vector<1x8x32xf32> to vector<8x32xf32>
    %729 = vector.broadcast %688 : i1 to vector<8x1xi1>
    %730 = vector.shape_cast %729 : vector<8x1xi1> to vector<8x1xi1>
    %731 = vector.broadcast %730 : vector<8x1xi1> to vector<8x32xi1>
    %732 = arith.select %731, %725, %728 : vector<8x32xi1>, vector<8x32xf32>
    %733 = arith.index_cast %680 : i32 to index
    %c0_247 = arith.constant 0 : index
    %c0_248 = arith.constant 0 : index
    %734 = vector.load %arg6[%733, %c0_247, %c0_248] : memref<8x8x32xf32, #tpu.memory_space<vmem>>, vector<1x8x32xf32>
    %735 = vector.shape_cast %734 : vector<1x8x32xf32> to vector<8x32xf32>
    %736 = vector.shape_cast %732 : vector<8x32xf32> to vector<1x8x32xf32>
    tpu.vector_store %arg6[%733, %c0_247, %c0_248], %736 {strides = array<i32>} : memref<8x8x32xf32, #tpu.memory_space<vmem>>, vector<1x8x32xf32>,
    %c6_i32 = arith.constant 6 : i32
    %c0_i32_249 = arith.constant 0 : i32
    %737 = arith.subi %c6_i32, %c0_i32_249 : i32
    %c0_i32_250 = arith.constant 0 : i32
    %c7_i32_251 = arith.constant 7 : i32
    %738 = arith.maxsi %c0_i32_250, %737 : i32
    %739 = arith.minsi %c7_i32_251, %738 : i32
    %c0_i32_252 = arith.constant 0 : i32
    %740 = arith.cmpi sge, %737, %c0_i32_252 : i32
    %741 = vector.broadcast %737 : i32 to vector<8x1xi32>
    %742 = arith.cmpi slt, %741, %0 : vector<8x1xi32>
    %743 = vector.broadcast %740 : i1 to vector<8x1xi1>
    %744 = arith.andi %743, %742 : vector<8x1xi1>
    %c0_i32_253 = arith.constant 0 : i32
    %745 = arith.cmpi sge, %737, %c0_i32_253 : i32
    %c8_i32_254 = arith.constant 8 : i32
    %746 = arith.cmpi slt, %737, %c8_i32_254 : i32
    %747 = arith.andi %745, %746 : i1
    %748 = arith.index_cast %739 : i32 to index
    %c0_255 = arith.constant 0 : index
    %c0_256 = arith.constant 0 : index
    %749 = vector.load %arg2[%748, %c0_255, %c0_256] : memref<8x8x32xf32, #tpu.memory_space<vmem>>, vector<1x8x32xf32>
    %750 = vector.shape_cast %749 : vector<1x8x32xf32> to vector<8x32xf32>
    %751 = arith.index_cast %739 : i32 to index
    %c0_257 = arith.constant 0 : index
    %c0_258 = arith.constant 0 : index
    %752 = vector.load %arg9[%751, %c0_257, %c0_258] : memref<8x8x128xf32, #tpu.memory_space<vmem>>, vector<1x8x128xf32>
    %753 = vector.shape_cast %752 : vector<1x8x128xf32> to vector<8x128xf32>
    %cst_259 = arith.constant dense<0.000000e+00> : vector<8x128xf32>
    %754 = tpu.matmul %658, %12, %cst_259 {dimension_numbers = #tpu.dot_dimension_numbers<[1], [0], [0], [1], [0, 0, 1, 1], [], []>} : vector<8x32xf32>, vector<32x128xf32>, vector<8x128xf32> -> vector<8x128xf32>
    %755 = arith.addf %753, %754 : vector<8x128xf32>
    %cst_260 = arith.constant 5.000000e-01 : f32
    %756 = vector.broadcast %cst_260 : f32 to vector<8x128xf32>
    %757 = arith.mulf %755, %756 : vector<8x128xf32>
    %758 = arith.select %6, %755, %757 : vector<8x128xi1>, vector<8x128xf32>
    %759 = math.tanh %758 : vector<8x128xf32>
    %cst_261 = arith.constant 5.000000e-01 : f32
    %760 = vector.broadcast %cst_261 : f32 to vector<8x128xf32>
    %761 = arith.mulf %759, %760 : vector<8x128xf32>
    %cst_262 = arith.constant 5.000000e-01 : f32
    %762 = vector.broadcast %cst_262 : f32 to vector<8x128xf32>
    %763 = arith.addf %761, %762 : vector<8x128xf32>
    %764 = arith.select %6, %759, %763 : vector<8x128xi1>, vector<8x128xf32>
    %765 = vector.extract_strided_slice %764 {offsets = [0, 0], sizes = [8, 32], strides = [1, 1]} : vector<8x128xf32> to vector<8x32xf32>
    %766 = vector.extract_strided_slice %764 {offsets = [0, 32], sizes = [8, 32], strides = [1, 1]} : vector<8x128xf32> to vector<8x32xf32>
    %767 = vector.extract_strided_slice %764 {offsets = [0, 64], sizes = [8, 32], strides = [1, 1]} : vector<8x128xf32> to vector<8x32xf32>
    %768 = vector.extract_strided_slice %764 {offsets = [0, 96], sizes = [8, 32], strides = [1, 1]} : vector<8x128xf32> to vector<8x32xf32>
    %769 = arith.mulf %766, %661 : vector<8x32xf32>
    %770 = arith.mulf %765, %767 : vector<8x32xf32>
    %771 = arith.addf %769, %770 : vector<8x32xf32>
    %772 = math.tanh %771 : vector<8x32xf32>
    %773 = arith.mulf %768, %772 : vector<8x32xf32>
    %774 = vector.shape_cast %744 : vector<8x1xi1> to vector<8x1xi1>
    %775 = vector.broadcast %774 : vector<8x1xi1> to vector<8x32xi1>
    %776 = arith.select %775, %773, %658 : vector<8x32xi1>, vector<8x32xf32>
    %777 = vector.shape_cast %744 : vector<8x1xi1> to vector<8x1xi1>
    %778 = vector.broadcast %777 : vector<8x1xi1> to vector<8x32xi1>
    %779 = arith.select %778, %771, %661 : vector<8x32xi1>, vector<8x32xf32>
    %cst_263 = arith.constant 0.000000e+00 : f32
    %780 = vector.shape_cast %744 : vector<8x1xi1> to vector<8x1xi1>
    %781 = vector.broadcast %780 : vector<8x1xi1> to vector<8x32xi1>
    %782 = vector.broadcast %cst_263 : f32 to vector<8x32xf32>
    %783 = arith.select %781, %773, %782 : vector<8x32xi1>, vector<8x32xf32>
    %784 = arith.addf %783, %750 : vector<8x32xf32>
    %785 = arith.index_cast %739 : i32 to index
    %c0_264 = arith.constant 0 : index
    %c0_265 = arith.constant 0 : index
    %786 = vector.load %arg10[%785, %c0_264, %c0_265] : memref<8x8x32xf32, #tpu.memory_space<vmem>>, vector<1x8x32xf32>
    %787 = vector.shape_cast %786 : vector<1x8x32xf32> to vector<8x32xf32>
    %788 = vector.broadcast %747 : i1 to vector<8x1xi1>
    %789 = vector.shape_cast %788 : vector<8x1xi1> to vector<8x1xi1>
    %790 = vector.broadcast %789 : vector<8x1xi1> to vector<8x32xi1>
    %791 = arith.select %790, %784, %787 : vector<8x32xi1>, vector<8x32xf32>
    %792 = arith.index_cast %739 : i32 to index
    %c0_266 = arith.constant 0 : index
    %c0_267 = arith.constant 0 : index
    %793 = vector.load %arg10[%792, %c0_266, %c0_267] : memref<8x8x32xf32, #tpu.memory_space<vmem>>, vector<1x8x32xf32>
    %794 = vector.shape_cast %793 : vector<1x8x32xf32> to vector<8x32xf32>
    %795 = vector.shape_cast %791 : vector<8x32xf32> to vector<1x8x32xf32>
    tpu.vector_store %arg10[%792, %c0_266, %c0_267], %795 {strides = array<i32>} : memref<8x8x32xf32, #tpu.memory_space<vmem>>, vector<1x8x32xf32>,
    %c1_i32_268 = arith.constant 1 : i32
    %796 = arith.subi %c6_i32, %c1_i32_268 : i32
    %c0_i32_269 = arith.constant 0 : i32
    %c7_i32_270 = arith.constant 7 : i32
    %797 = arith.maxsi %c0_i32_269, %796 : i32
    %798 = arith.minsi %c7_i32_270, %797 : i32
    %c0_i32_271 = arith.constant 0 : i32
    %799 = arith.cmpi sge, %796, %c0_i32_271 : i32
    %800 = vector.broadcast %796 : i32 to vector<8x1xi32>
    %801 = arith.cmpi slt, %800, %0 : vector<8x1xi32>
    %802 = vector.broadcast %799 : i1 to vector<8x1xi1>
    %803 = arith.andi %802, %801 : vector<8x1xi1>
    %c0_i32_272 = arith.constant 0 : i32
    %804 = arith.cmpi sge, %796, %c0_i32_272 : i32
    %c8_i32_273 = arith.constant 8 : i32
    %805 = arith.cmpi slt, %796, %c8_i32_273 : i32
    %806 = arith.andi %804, %805 : i1
    %807 = arith.index_cast %798 : i32 to index
    %c0_274 = arith.constant 0 : index
    %c0_275 = arith.constant 0 : index
    %808 = vector.load %arg10[%807, %c0_274, %c0_275] : memref<8x8x32xf32, #tpu.memory_space<vmem>>, vector<1x8x32xf32>
    %809 = vector.shape_cast %808 : vector<1x8x32xf32> to vector<8x32xf32>
    %cst_276 = arith.constant dense<0.000000e+00> : vector<8x128xf32>
    %810 = tpu.matmul %809, %10, %cst_276 {dimension_numbers = #tpu.dot_dimension_numbers<[1], [0], [0], [1], [0, 0, 1, 1], [], []>} : vector<8x32xf32>, vector<32x128xf32>, vector<8x128xf32> -> vector<8x128xf32>
    %811 = vector.broadcast %18 : vector<1x128xf32> to vector<8x128xf32>
    %812 = arith.addf %810, %811 : vector<8x128xf32>
    %cst_277 = arith.constant dense<0.000000e+00> : vector<8x128xf32>
    %813 = tpu.matmul %717, %14, %cst_277 {dimension_numbers = #tpu.dot_dimension_numbers<[1], [0], [0], [1], [0, 0, 1, 1], [], []>} : vector<8x32xf32>, vector<32x128xf32>, vector<8x128xf32> -> vector<8x128xf32>
    %814 = arith.addf %812, %813 : vector<8x128xf32>
    %cst_278 = arith.constant 5.000000e-01 : f32
    %815 = vector.broadcast %cst_278 : f32 to vector<8x128xf32>
    %816 = arith.mulf %814, %815 : vector<8x128xf32>
    %817 = arith.select %6, %814, %816 : vector<8x128xi1>, vector<8x128xf32>
    %818 = math.tanh %817 : vector<8x128xf32>
    %cst_279 = arith.constant 5.000000e-01 : f32
    %819 = vector.broadcast %cst_279 : f32 to vector<8x128xf32>
    %820 = arith.mulf %818, %819 : vector<8x128xf32>
    %cst_280 = arith.constant 5.000000e-01 : f32
    %821 = vector.broadcast %cst_280 : f32 to vector<8x128xf32>
    %822 = arith.addf %820, %821 : vector<8x128xf32>
    %823 = arith.select %6, %818, %822 : vector<8x128xi1>, vector<8x128xf32>
    %824 = vector.extract_strided_slice %823 {offsets = [0, 0], sizes = [8, 32], strides = [1, 1]} : vector<8x128xf32> to vector<8x32xf32>
    %825 = vector.extract_strided_slice %823 {offsets = [0, 32], sizes = [8, 32], strides = [1, 1]} : vector<8x128xf32> to vector<8x32xf32>
    %826 = vector.extract_strided_slice %823 {offsets = [0, 64], sizes = [8, 32], strides = [1, 1]} : vector<8x128xf32> to vector<8x32xf32>
    %827 = vector.extract_strided_slice %823 {offsets = [0, 96], sizes = [8, 32], strides = [1, 1]} : vector<8x128xf32> to vector<8x32xf32>
    %828 = arith.mulf %825, %720 : vector<8x32xf32>
    %829 = arith.mulf %824, %826 : vector<8x32xf32>
    %830 = arith.addf %828, %829 : vector<8x32xf32>
    %831 = math.tanh %830 : vector<8x32xf32>
    %832 = arith.mulf %827, %831 : vector<8x32xf32>
    %833 = vector.shape_cast %803 : vector<8x1xi1> to vector<8x1xi1>
    %834 = vector.broadcast %833 : vector<8x1xi1> to vector<8x32xi1>
    %835 = arith.select %834, %832, %717 : vector<8x32xi1>, vector<8x32xf32>
    %836 = vector.shape_cast %803 : vector<8x1xi1> to vector<8x1xi1>
    %837 = vector.broadcast %836 : vector<8x1xi1> to vector<8x32xi1>
    %838 = arith.select %837, %830, %720 : vector<8x32xi1>, vector<8x32xf32>
    %cst_281 = arith.constant 0.000000e+00 : f32
    %839 = vector.shape_cast %803 : vector<8x1xi1> to vector<8x1xi1>
    %840 = vector.broadcast %839 : vector<8x1xi1> to vector<8x32xi1>
    %841 = vector.broadcast %cst_281 : f32 to vector<8x32xf32>
    %842 = arith.select %840, %832, %841 : vector<8x32xi1>, vector<8x32xf32>
    %843 = arith.addf %842, %809 : vector<8x32xf32>
    %844 = arith.index_cast %798 : i32 to index
    %c0_282 = arith.constant 0 : index
    %c0_283 = arith.constant 0 : index
    %845 = vector.load %arg6[%844, %c0_282, %c0_283] : memref<8x8x32xf32, #tpu.memory_space<vmem>>, vector<1x8x32xf32>
    %846 = vector.shape_cast %845 : vector<1x8x32xf32> to vector<8x32xf32>
    %847 = vector.broadcast %806 : i1 to vector<8x1xi1>
    %848 = vector.shape_cast %847 : vector<8x1xi1> to vector<8x1xi1>
    %849 = vector.broadcast %848 : vector<8x1xi1> to vector<8x32xi1>
    %850 = arith.select %849, %843, %846 : vector<8x32xi1>, vector<8x32xf32>
    %851 = arith.index_cast %798 : i32 to index
    %c0_284 = arith.constant 0 : index
    %c0_285 = arith.constant 0 : index
    %852 = vector.load %arg6[%851, %c0_284, %c0_285] : memref<8x8x32xf32, #tpu.memory_space<vmem>>, vector<1x8x32xf32>
    %853 = vector.shape_cast %852 : vector<1x8x32xf32> to vector<8x32xf32>
    %854 = vector.shape_cast %850 : vector<8x32xf32> to vector<1x8x32xf32>
    tpu.vector_store %arg6[%851, %c0_284, %c0_285], %854 {strides = array<i32>} : memref<8x8x32xf32, #tpu.memory_space<vmem>>, vector<1x8x32xf32>,
    %c7_i32_286 = arith.constant 7 : i32
    %c0_i32_287 = arith.constant 0 : i32
    %855 = arith.subi %c7_i32_286, %c0_i32_287 : i32
    %c0_i32_288 = arith.constant 0 : i32
    %c7_i32_289 = arith.constant 7 : i32
    %856 = arith.maxsi %c0_i32_288, %855 : i32
    %857 = arith.minsi %c7_i32_289, %856 : i32
    %c0_i32_290 = arith.constant 0 : i32
    %858 = arith.cmpi sge, %855, %c0_i32_290 : i32
    %859 = vector.broadcast %855 : i32 to vector<8x1xi32>
    %860 = arith.cmpi slt, %859, %0 : vector<8x1xi32>
    %861 = vector.broadcast %858 : i1 to vector<8x1xi1>
    %862 = arith.andi %861, %860 : vector<8x1xi1>
    %c0_i32_291 = arith.constant 0 : i32
    %863 = arith.cmpi sge, %855, %c0_i32_291 : i32
    %c8_i32_292 = arith.constant 8 : i32
    %864 = arith.cmpi slt, %855, %c8_i32_292 : i32
    %865 = arith.andi %863, %864 : i1
    %866 = arith.index_cast %857 : i32 to index
    %c0_293 = arith.constant 0 : index
    %c0_294 = arith.constant 0 : index
    %867 = vector.load %arg2[%866, %c0_293, %c0_294] : memref<8x8x32xf32, #tpu.memory_space<vmem>>, vector<1x8x32xf32>
    %868 = vector.shape_cast %867 : vector<1x8x32xf32> to vector<8x32xf32>
    %869 = arith.index_cast %857 : i32 to index
    %c0_295 = arith.constant 0 : index
    %c0_296 = arith.constant 0 : index
    %870 = vector.load %arg9[%869, %c0_295, %c0_296] : memref<8x8x128xf32, #tpu.memory_space<vmem>>, vector<1x8x128xf32>
    %871 = vector.shape_cast %870 : vector<1x8x128xf32> to vector<8x128xf32>
    %cst_297 = arith.constant dense<0.000000e+00> : vector<8x128xf32>
    %872 = tpu.matmul %776, %12, %cst_297 {dimension_numbers = #tpu.dot_dimension_numbers<[1], [0], [0], [1], [0, 0, 1, 1], [], []>} : vector<8x32xf32>, vector<32x128xf32>, vector<8x128xf32> -> vector<8x128xf32>
    %873 = arith.addf %871, %872 : vector<8x128xf32>
    %cst_298 = arith.constant 5.000000e-01 : f32
    %874 = vector.broadcast %cst_298 : f32 to vector<8x128xf32>
    %875 = arith.mulf %873, %874 : vector<8x128xf32>
    %876 = arith.select %6, %873, %875 : vector<8x128xi1>, vector<8x128xf32>
    %877 = math.tanh %876 : vector<8x128xf32>
    %cst_299 = arith.constant 5.000000e-01 : f32
    %878 = vector.broadcast %cst_299 : f32 to vector<8x128xf32>
    %879 = arith.mulf %877, %878 : vector<8x128xf32>
    %cst_300 = arith.constant 5.000000e-01 : f32
    %880 = vector.broadcast %cst_300 : f32 to vector<8x128xf32>
    %881 = arith.addf %879, %880 : vector<8x128xf32>
    %882 = arith.select %6, %877, %881 : vector<8x128xi1>, vector<8x128xf32>
    %883 = vector.extract_strided_slice %882 {offsets = [0, 0], sizes = [8, 32], strides = [1, 1]} : vector<8x128xf32> to vector<8x32xf32>
    %884 = vector.extract_strided_slice %882 {offsets = [0, 32], sizes = [8, 32], strides = [1, 1]} : vector<8x128xf32> to vector<8x32xf32>
    %885 = vector.extract_strided_slice %882 {offsets = [0, 64], sizes = [8, 32], strides = [1, 1]} : vector<8x128xf32> to vector<8x32xf32>
    %886 = vector.extract_strided_slice %882 {offsets = [0, 96], sizes = [8, 32], strides = [1, 1]} : vector<8x128xf32> to vector<8x32xf32>
    %887 = arith.mulf %884, %779 : vector<8x32xf32>
    %888 = arith.mulf %883, %885 : vector<8x32xf32>
    %889 = arith.addf %887, %888 : vector<8x32xf32>
    %890 = math.tanh %889 : vector<8x32xf32>
    %891 = arith.mulf %886, %890 : vector<8x32xf32>
    %892 = vector.shape_cast %862 : vector<8x1xi1> to vector<8x1xi1>
    %893 = vector.broadcast %892 : vector<8x1xi1> to vector<8x32xi1>
    %894 = arith.select %893, %891, %776 : vector<8x32xi1>, vector<8x32xf32>
    %895 = vector.shape_cast %862 : vector<8x1xi1> to vector<8x1xi1>
    %896 = vector.broadcast %895 : vector<8x1xi1> to vector<8x32xi1>
    %897 = arith.select %896, %889, %779 : vector<8x32xi1>, vector<8x32xf32>
    %cst_301 = arith.constant 0.000000e+00 : f32
    %898 = vector.shape_cast %862 : vector<8x1xi1> to vector<8x1xi1>
    %899 = vector.broadcast %898 : vector<8x1xi1> to vector<8x32xi1>
    %900 = vector.broadcast %cst_301 : f32 to vector<8x32xf32>
    %901 = arith.select %899, %891, %900 : vector<8x32xi1>, vector<8x32xf32>
    %902 = arith.addf %901, %868 : vector<8x32xf32>
    %903 = arith.index_cast %857 : i32 to index
    %c0_302 = arith.constant 0 : index
    %c0_303 = arith.constant 0 : index
    %904 = vector.load %arg10[%903, %c0_302, %c0_303] : memref<8x8x32xf32, #tpu.memory_space<vmem>>, vector<1x8x32xf32>
    %905 = vector.shape_cast %904 : vector<1x8x32xf32> to vector<8x32xf32>
    %906 = vector.broadcast %865 : i1 to vector<8x1xi1>
    %907 = vector.shape_cast %906 : vector<8x1xi1> to vector<8x1xi1>
    %908 = vector.broadcast %907 : vector<8x1xi1> to vector<8x32xi1>
    %909 = arith.select %908, %902, %905 : vector<8x32xi1>, vector<8x32xf32>
    %910 = arith.index_cast %857 : i32 to index
    %c0_304 = arith.constant 0 : index
    %c0_305 = arith.constant 0 : index
    %911 = vector.load %arg10[%910, %c0_304, %c0_305] : memref<8x8x32xf32, #tpu.memory_space<vmem>>, vector<1x8x32xf32>
    %912 = vector.shape_cast %911 : vector<1x8x32xf32> to vector<8x32xf32>
    %913 = vector.shape_cast %909 : vector<8x32xf32> to vector<1x8x32xf32>
    tpu.vector_store %arg10[%910, %c0_304, %c0_305], %913 {strides = array<i32>} : memref<8x8x32xf32, #tpu.memory_space<vmem>>, vector<1x8x32xf32>,
    %c1_i32_306 = arith.constant 1 : i32
    %914 = arith.subi %c7_i32_286, %c1_i32_306 : i32
    %c0_i32_307 = arith.constant 0 : i32
    %c7_i32_308 = arith.constant 7 : i32
    %915 = arith.maxsi %c0_i32_307, %914 : i32
    %916 = arith.minsi %c7_i32_308, %915 : i32
    %c0_i32_309 = arith.constant 0 : i32
    %917 = arith.cmpi sge, %914, %c0_i32_309 : i32
    %918 = vector.broadcast %914 : i32 to vector<8x1xi32>
    %919 = arith.cmpi slt, %918, %0 : vector<8x1xi32>
    %920 = vector.broadcast %917 : i1 to vector<8x1xi1>
    %921 = arith.andi %920, %919 : vector<8x1xi1>
    %c0_i32_310 = arith.constant 0 : i32
    %922 = arith.cmpi sge, %914, %c0_i32_310 : i32
    %c8_i32_311 = arith.constant 8 : i32
    %923 = arith.cmpi slt, %914, %c8_i32_311 : i32
    %924 = arith.andi %922, %923 : i1
    %925 = arith.index_cast %916 : i32 to index
    %c0_312 = arith.constant 0 : index
    %c0_313 = arith.constant 0 : index
    %926 = vector.load %arg10[%925, %c0_312, %c0_313] : memref<8x8x32xf32, #tpu.memory_space<vmem>>, vector<1x8x32xf32>
    %927 = vector.shape_cast %926 : vector<1x8x32xf32> to vector<8x32xf32>
    %cst_314 = arith.constant dense<0.000000e+00> : vector<8x128xf32>
    %928 = tpu.matmul %927, %10, %cst_314 {dimension_numbers = #tpu.dot_dimension_numbers<[1], [0], [0], [1], [0, 0, 1, 1], [], []>} : vector<8x32xf32>, vector<32x128xf32>, vector<8x128xf32> -> vector<8x128xf32>
    %929 = vector.broadcast %18 : vector<1x128xf32> to vector<8x128xf32>
    %930 = arith.addf %928, %929 : vector<8x128xf32>
    %cst_315 = arith.constant dense<0.000000e+00> : vector<8x128xf32>
    %931 = tpu.matmul %835, %14, %cst_315 {dimension_numbers = #tpu.dot_dimension_numbers<[1], [0], [0], [1], [0, 0, 1, 1], [], []>} : vector<8x32xf32>, vector<32x128xf32>, vector<8x128xf32> -> vector<8x128xf32>
    %932 = arith.addf %930, %931 : vector<8x128xf32>
    %cst_316 = arith.constant 5.000000e-01 : f32
    %933 = vector.broadcast %cst_316 : f32 to vector<8x128xf32>
    %934 = arith.mulf %932, %933 : vector<8x128xf32>
    %935 = arith.select %6, %932, %934 : vector<8x128xi1>, vector<8x128xf32>
    %936 = math.tanh %935 : vector<8x128xf32>
    %cst_317 = arith.constant 5.000000e-01 : f32
    %937 = vector.broadcast %cst_317 : f32 to vector<8x128xf32>
    %938 = arith.mulf %936, %937 : vector<8x128xf32>
    %cst_318 = arith.constant 5.000000e-01 : f32
    %939 = vector.broadcast %cst_318 : f32 to vector<8x128xf32>
    %940 = arith.addf %938, %939 : vector<8x128xf32>
    %941 = arith.select %6, %936, %940 : vector<8x128xi1>, vector<8x128xf32>
    %942 = vector.extract_strided_slice %941 {offsets = [0, 0], sizes = [8, 32], strides = [1, 1]} : vector<8x128xf32> to vector<8x32xf32>
    %943 = vector.extract_strided_slice %941 {offsets = [0, 32], sizes = [8, 32], strides = [1, 1]} : vector<8x128xf32> to vector<8x32xf32>
    %944 = vector.extract_strided_slice %941 {offsets = [0, 64], sizes = [8, 32], strides = [1, 1]} : vector<8x128xf32> to vector<8x32xf32>
    %945 = vector.extract_strided_slice %941 {offsets = [0, 96], sizes = [8, 32], strides = [1, 1]} : vector<8x128xf32> to vector<8x32xf32>
    %946 = arith.mulf %943, %838 : vector<8x32xf32>
    %947 = arith.mulf %942, %944 : vector<8x32xf32>
    %948 = arith.addf %946, %947 : vector<8x32xf32>
    %949 = math.tanh %948 : vector<8x32xf32>
    %950 = arith.mulf %945, %949 : vector<8x32xf32>
    %951 = vector.shape_cast %921 : vector<8x1xi1> to vector<8x1xi1>
    %952 = vector.broadcast %951 : vector<8x1xi1> to vector<8x32xi1>
    %953 = arith.select %952, %950, %835 : vector<8x32xi1>, vector<8x32xf32>
    %954 = vector.shape_cast %921 : vector<8x1xi1> to vector<8x1xi1>
    %955 = vector.broadcast %954 : vector<8x1xi1> to vector<8x32xi1>
    %956 = arith.select %955, %948, %838 : vector<8x32xi1>, vector<8x32xf32>
    %cst_319 = arith.constant 0.000000e+00 : f32
    %957 = vector.shape_cast %921 : vector<8x1xi1> to vector<8x1xi1>
    %958 = vector.broadcast %957 : vector<8x1xi1> to vector<8x32xi1>
    %959 = vector.broadcast %cst_319 : f32 to vector<8x32xf32>
    %960 = arith.select %958, %950, %959 : vector<8x32xi1>, vector<8x32xf32>
    %961 = arith.addf %960, %927 : vector<8x32xf32>
    %962 = arith.index_cast %916 : i32 to index
    %c0_320 = arith.constant 0 : index
    %c0_321 = arith.constant 0 : index
    %963 = vector.load %arg6[%962, %c0_320, %c0_321] : memref<8x8x32xf32, #tpu.memory_space<vmem>>, vector<1x8x32xf32>
    %964 = vector.shape_cast %963 : vector<1x8x32xf32> to vector<8x32xf32>
    %965 = vector.broadcast %924 : i1 to vector<8x1xi1>
    %966 = vector.shape_cast %965 : vector<8x1xi1> to vector<8x1xi1>
    %967 = vector.broadcast %966 : vector<8x1xi1> to vector<8x32xi1>
    %968 = arith.select %967, %961, %964 : vector<8x32xi1>, vector<8x32xf32>
    %969 = arith.index_cast %916 : i32 to index
    %c0_322 = arith.constant 0 : index
    %c0_323 = arith.constant 0 : index
    %970 = vector.load %arg6[%969, %c0_322, %c0_323] : memref<8x8x32xf32, #tpu.memory_space<vmem>>, vector<1x8x32xf32>
    %971 = vector.shape_cast %970 : vector<1x8x32xf32> to vector<8x32xf32>
    %972 = vector.shape_cast %968 : vector<8x32xf32> to vector<1x8x32xf32>
    tpu.vector_store %arg6[%969, %c0_322, %c0_323], %972 {strides = array<i32>} : memref<8x8x32xf32, #tpu.memory_space<vmem>>, vector<1x8x32xf32>,
    %c8_i32_324 = arith.constant 8 : i32
    %c0_i32_325 = arith.constant 0 : i32
    %973 = arith.subi %c8_i32_324, %c0_i32_325 : i32
    %c0_i32_326 = arith.constant 0 : i32
    %c7_i32_327 = arith.constant 7 : i32
    %974 = arith.maxsi %c0_i32_326, %973 : i32
    %975 = arith.minsi %c7_i32_327, %974 : i32
    %c0_i32_328 = arith.constant 0 : i32
    %976 = arith.cmpi sge, %973, %c0_i32_328 : i32
    %977 = vector.broadcast %973 : i32 to vector<8x1xi32>
    %978 = arith.cmpi slt, %977, %0 : vector<8x1xi32>
    %979 = vector.broadcast %976 : i1 to vector<8x1xi1>
    %980 = arith.andi %979, %978 : vector<8x1xi1>
    %c0_i32_329 = arith.constant 0 : i32
    %981 = arith.cmpi sge, %973, %c0_i32_329 : i32
    %c8_i32_330 = arith.constant 8 : i32
    %982 = arith.cmpi slt, %973, %c8_i32_330 : i32
    %983 = arith.andi %981, %982 : i1
    %984 = arith.index_cast %975 : i32 to index
    %c0_331 = arith.constant 0 : index
    %c0_332 = arith.constant 0 : index
    %985 = vector.load %arg2[%984, %c0_331, %c0_332] : memref<8x8x32xf32, #tpu.memory_space<vmem>>, vector<1x8x32xf32>
    %986 = vector.shape_cast %985 : vector<1x8x32xf32> to vector<8x32xf32>
    %987 = arith.index_cast %975 : i32 to index
    %c0_333 = arith.constant 0 : index
    %c0_334 = arith.constant 0 : index
    %988 = vector.load %arg9[%987, %c0_333, %c0_334] : memref<8x8x128xf32, #tpu.memory_space<vmem>>, vector<1x8x128xf32>
    %989 = vector.shape_cast %988 : vector<1x8x128xf32> to vector<8x128xf32>
    %cst_335 = arith.constant dense<0.000000e+00> : vector<8x128xf32>
    %990 = tpu.matmul %894, %12, %cst_335 {dimension_numbers = #tpu.dot_dimension_numbers<[1], [0], [0], [1], [0, 0, 1, 1], [], []>} : vector<8x32xf32>, vector<32x128xf32>, vector<8x128xf32> -> vector<8x128xf32>
    %991 = arith.addf %989, %990 : vector<8x128xf32>
    %cst_336 = arith.constant 5.000000e-01 : f32
    %992 = vector.broadcast %cst_336 : f32 to vector<8x128xf32>
    %993 = arith.mulf %991, %992 : vector<8x128xf32>
    %994 = arith.select %6, %991, %993 : vector<8x128xi1>, vector<8x128xf32>
    %995 = math.tanh %994 : vector<8x128xf32>
    %cst_337 = arith.constant 5.000000e-01 : f32
    %996 = vector.broadcast %cst_337 : f32 to vector<8x128xf32>
    %997 = arith.mulf %995, %996 : vector<8x128xf32>
    %cst_338 = arith.constant 5.000000e-01 : f32
    %998 = vector.broadcast %cst_338 : f32 to vector<8x128xf32>
    %999 = arith.addf %997, %998 : vector<8x128xf32>
    %1000 = arith.select %6, %995, %999 : vector<8x128xi1>, vector<8x128xf32>
    %1001 = vector.extract_strided_slice %1000 {offsets = [0, 0], sizes = [8, 32], strides = [1, 1]} : vector<8x128xf32> to vector<8x32xf32>
    %1002 = vector.extract_strided_slice %1000 {offsets = [0, 32], sizes = [8, 32], strides = [1, 1]} : vector<8x128xf32> to vector<8x32xf32>
    %1003 = vector.extract_strided_slice %1000 {offsets = [0, 64], sizes = [8, 32], strides = [1, 1]} : vector<8x128xf32> to vector<8x32xf32>
    %1004 = vector.extract_strided_slice %1000 {offsets = [0, 96], sizes = [8, 32], strides = [1, 1]} : vector<8x128xf32> to vector<8x32xf32>
    %1005 = arith.mulf %1002, %897 : vector<8x32xf32>
    %1006 = arith.mulf %1001, %1003 : vector<8x32xf32>
    %1007 = arith.addf %1005, %1006 : vector<8x32xf32>
    %1008 = math.tanh %1007 : vector<8x32xf32>
    %1009 = arith.mulf %1004, %1008 : vector<8x32xf32>
    %1010 = vector.shape_cast %980 : vector<8x1xi1> to vector<8x1xi1>
    %1011 = vector.broadcast %1010 : vector<8x1xi1> to vector<8x32xi1>
    %1012 = arith.select %1011, %1009, %894 : vector<8x32xi1>, vector<8x32xf32>
    %1013 = vector.shape_cast %980 : vector<8x1xi1> to vector<8x1xi1>
    %1014 = vector.broadcast %1013 : vector<8x1xi1> to vector<8x32xi1>
    %1015 = arith.select %1014, %1007, %897 : vector<8x32xi1>, vector<8x32xf32>
    %cst_339 = arith.constant 0.000000e+00 : f32
    %1016 = vector.shape_cast %980 : vector<8x1xi1> to vector<8x1xi1>
    %1017 = vector.broadcast %1016 : vector<8x1xi1> to vector<8x32xi1>
    %1018 = vector.broadcast %cst_339 : f32 to vector<8x32xf32>
    %1019 = arith.select %1017, %1009, %1018 : vector<8x32xi1>, vector<8x32xf32>
    %1020 = arith.addf %1019, %986 : vector<8x32xf32>
    %1021 = arith.index_cast %975 : i32 to index
    %c0_340 = arith.constant 0 : index
    %c0_341 = arith.constant 0 : index
    %1022 = vector.load %arg10[%1021, %c0_340, %c0_341] : memref<8x8x32xf32, #tpu.memory_space<vmem>>, vector<1x8x32xf32>
    %1023 = vector.shape_cast %1022 : vector<1x8x32xf32> to vector<8x32xf32>
    %1024 = vector.broadcast %983 : i1 to vector<8x1xi1>
    %1025 = vector.shape_cast %1024 : vector<8x1xi1> to vector<8x1xi1>
    %1026 = vector.broadcast %1025 : vector<8x1xi1> to vector<8x32xi1>
    %1027 = arith.select %1026, %1020, %1023 : vector<8x32xi1>, vector<8x32xf32>
    %1028 = arith.index_cast %975 : i32 to index
    %c0_342 = arith.constant 0 : index
    %c0_343 = arith.constant 0 : index
    %1029 = vector.load %arg10[%1028, %c0_342, %c0_343] : memref<8x8x32xf32, #tpu.memory_space<vmem>>, vector<1x8x32xf32>
    %1030 = vector.shape_cast %1029 : vector<1x8x32xf32> to vector<8x32xf32>
    %1031 = vector.shape_cast %1027 : vector<8x32xf32> to vector<1x8x32xf32>
    tpu.vector_store %arg10[%1028, %c0_342, %c0_343], %1031 {strides = array<i32>} : memref<8x8x32xf32, #tpu.memory_space<vmem>>, vector<1x8x32xf32>,
    %c1_i32_344 = arith.constant 1 : i32
    %1032 = arith.subi %c8_i32_324, %c1_i32_344 : i32
    %c0_i32_345 = arith.constant 0 : i32
    %c7_i32_346 = arith.constant 7 : i32
    %1033 = arith.maxsi %c0_i32_345, %1032 : i32
    %1034 = arith.minsi %c7_i32_346, %1033 : i32
    %c0_i32_347 = arith.constant 0 : i32
    %1035 = arith.cmpi sge, %1032, %c0_i32_347 : i32
    %1036 = vector.broadcast %1032 : i32 to vector<8x1xi32>
    %1037 = arith.cmpi slt, %1036, %0 : vector<8x1xi32>
    %1038 = vector.broadcast %1035 : i1 to vector<8x1xi1>
    %1039 = arith.andi %1038, %1037 : vector<8x1xi1>
    %c0_i32_348 = arith.constant 0 : i32
    %1040 = arith.cmpi sge, %1032, %c0_i32_348 : i32
    %c8_i32_349 = arith.constant 8 : i32
    %1041 = arith.cmpi slt, %1032, %c8_i32_349 : i32
    %1042 = arith.andi %1040, %1041 : i1
    %1043 = arith.index_cast %1034 : i32 to index
    %c0_350 = arith.constant 0 : index
    %c0_351 = arith.constant 0 : index
    %1044 = vector.load %arg10[%1043, %c0_350, %c0_351] : memref<8x8x32xf32, #tpu.memory_space<vmem>>, vector<1x8x32xf32>
    %1045 = vector.shape_cast %1044 : vector<1x8x32xf32> to vector<8x32xf32>
    %cst_352 = arith.constant dense<0.000000e+00> : vector<8x128xf32>
    %1046 = tpu.matmul %1045, %10, %cst_352 {dimension_numbers = #tpu.dot_dimension_numbers<[1], [0], [0], [1], [0, 0, 1, 1], [], []>} : vector<8x32xf32>, vector<32x128xf32>, vector<8x128xf32> -> vector<8x128xf32>
    %1047 = vector.broadcast %18 : vector<1x128xf32> to vector<8x128xf32>
    %1048 = arith.addf %1046, %1047 : vector<8x128xf32>
    %cst_353 = arith.constant dense<0.000000e+00> : vector<8x128xf32>
    %1049 = tpu.matmul %953, %14, %cst_353 {dimension_numbers = #tpu.dot_dimension_numbers<[1], [0], [0], [1], [0, 0, 1, 1], [], []>} : vector<8x32xf32>, vector<32x128xf32>, vector<8x128xf32> -> vector<8x128xf32>
    %1050 = arith.addf %1048, %1049 : vector<8x128xf32>
    %cst_354 = arith.constant 5.000000e-01 : f32
    %1051 = vector.broadcast %cst_354 : f32 to vector<8x128xf32>
    %1052 = arith.mulf %1050, %1051 : vector<8x128xf32>
    %1053 = arith.select %6, %1050, %1052 : vector<8x128xi1>, vector<8x128xf32>
    %1054 = math.tanh %1053 : vector<8x128xf32>
    %cst_355 = arith.constant 5.000000e-01 : f32
    %1055 = vector.broadcast %cst_355 : f32 to vector<8x128xf32>
    %1056 = arith.mulf %1054, %1055 : vector<8x128xf32>
    %cst_356 = arith.constant 5.000000e-01 : f32
    %1057 = vector.broadcast %cst_356 : f32 to vector<8x128xf32>
    %1058 = arith.addf %1056, %1057 : vector<8x128xf32>
    %1059 = arith.select %6, %1054, %1058 : vector<8x128xi1>, vector<8x128xf32>
    %1060 = vector.extract_strided_slice %1059 {offsets = [0, 0], sizes = [8, 32], strides = [1, 1]} : vector<8x128xf32> to vector<8x32xf32>
    %1061 = vector.extract_strided_slice %1059 {offsets = [0, 32], sizes = [8, 32], strides = [1, 1]} : vector<8x128xf32> to vector<8x32xf32>
    %1062 = vector.extract_strided_slice %1059 {offsets = [0, 64], sizes = [8, 32], strides = [1, 1]} : vector<8x128xf32> to vector<8x32xf32>
    %1063 = vector.extract_strided_slice %1059 {offsets = [0, 96], sizes = [8, 32], strides = [1, 1]} : vector<8x128xf32> to vector<8x32xf32>
    %1064 = arith.mulf %1061, %956 : vector<8x32xf32>
    %1065 = arith.mulf %1060, %1062 : vector<8x32xf32>
    %1066 = arith.addf %1064, %1065 : vector<8x32xf32>
    %1067 = math.tanh %1066 : vector<8x32xf32>
    %1068 = arith.mulf %1063, %1067 : vector<8x32xf32>
    %1069 = vector.shape_cast %1039 : vector<8x1xi1> to vector<8x1xi1>
    %1070 = vector.broadcast %1069 : vector<8x1xi1> to vector<8x32xi1>
    %1071 = arith.select %1070, %1068, %953 : vector<8x32xi1>, vector<8x32xf32>
    %1072 = vector.shape_cast %1039 : vector<8x1xi1> to vector<8x1xi1>
    %1073 = vector.broadcast %1072 : vector<8x1xi1> to vector<8x32xi1>
    %1074 = arith.select %1073, %1066, %956 : vector<8x32xi1>, vector<8x32xf32>
    %cst_357 = arith.constant 0.000000e+00 : f32
    %1075 = vector.shape_cast %1039 : vector<8x1xi1> to vector<8x1xi1>
    %1076 = vector.broadcast %1075 : vector<8x1xi1> to vector<8x32xi1>
    %1077 = vector.broadcast %cst_357 : f32 to vector<8x32xf32>
    %1078 = arith.select %1076, %1068, %1077 : vector<8x32xi1>, vector<8x32xf32>
    %1079 = arith.addf %1078, %1045 : vector<8x32xf32>
    %1080 = arith.index_cast %1034 : i32 to index
    %c0_358 = arith.constant 0 : index
    %c0_359 = arith.constant 0 : index
    %1081 = vector.load %arg6[%1080, %c0_358, %c0_359] : memref<8x8x32xf32, #tpu.memory_space<vmem>>, vector<1x8x32xf32>
    %1082 = vector.shape_cast %1081 : vector<1x8x32xf32> to vector<8x32xf32>
    %1083 = vector.broadcast %1042 : i1 to vector<8x1xi1>
    %1084 = vector.shape_cast %1083 : vector<8x1xi1> to vector<8x1xi1>
    %1085 = vector.broadcast %1084 : vector<8x1xi1> to vector<8x32xi1>
    %1086 = arith.select %1085, %1079, %1082 : vector<8x32xi1>, vector<8x32xf32>
    %1087 = arith.index_cast %1034 : i32 to index
    %c0_360 = arith.constant 0 : index
    %c0_361 = arith.constant 0 : index
    %1088 = vector.load %arg6[%1087, %c0_360, %c0_361] : memref<8x8x32xf32, #tpu.memory_space<vmem>>, vector<1x8x32xf32>
    %1089 = vector.shape_cast %1088 : vector<1x8x32xf32> to vector<8x32xf32>
    %1090 = vector.shape_cast %1086 : vector<8x32xf32> to vector<1x8x32xf32>
    tpu.vector_store %arg6[%1087, %c0_360, %c0_361], %1090 {strides = array<i32>} : memref<8x8x32xf32, #tpu.memory_space<vmem>>, vector<1x8x32xf32>,
    %c9_i32 = arith.constant 9 : i32
    %c0_362 = arith.constant 0 : index
    %c0_363 = arith.constant 0 : index
    %1091 = vector.load %arg7[%c0_362, %c0_363] : memref<8x32xf32, #tpu.memory_space<vmem>>, vector<8x32xf32>
    tpu.vector_store %arg7[%c0_362, %c0_363], %1071 {strides = array<i32>} : memref<8x32xf32, #tpu.memory_space<vmem>>, vector<8x32xf32>,
    %c0_364 = arith.constant 0 : index
    %c0_365 = arith.constant 0 : index
    %1092 = vector.load %arg8[%c0_364, %c0_365] : memref<8x32xf32, #tpu.memory_space<vmem>>, vector<8x32xf32>
    tpu.vector_store %arg8[%c0_364, %c0_365], %1074 {strides = array<i32>} : memref<8x32xf32, #tpu.memory_space<vmem>>, vector<8x32xf32>,
    return
  }
  func.func @transform_0(%arg0: i32) -> (i32, i32) {
    %c0_i32 = arith.constant 0 : i32
    %c0_i32_0 = arith.constant 0 : i32
    %c0_i32_1 = arith.constant 0 : i32
    return %c0_i32, %c0_i32_0 : i32, i32
  }
  func.func @transform_1(%arg0: i32) -> (i32, i32, i32) {
    %c0_i32 = arith.constant 0 : i32
    %c0_i32_0 = arith.constant 0 : i32
    %c0_i32_1 = arith.constant 0 : i32
    %c0_i32_2 = arith.constant 0 : i32
    return %c0_i32, %c0_i32_0, %c0_i32_1 : i32, i32, i32
  }
  func.func @transform_2(%arg0: i32) -> (i32, i32, i32) {
    %c0_i32 = arith.constant 0 : i32
    %c0_i32_0 = arith.constant 0 : i32
    %c0_i32_1 = arith.constant 0 : i32
    %c0_i32_2 = arith.constant 0 : i32
    return %c0_i32, %c0_i32_0, %c0_i32_1 : i32, i32, i32
  }
  func.func @transform_3(%arg0: i32) -> (i32, i32, i32) {
    %c0_i32 = arith.constant 0 : i32
    %c0_i32_0 = arith.constant 0 : i32
    %c0_i32_1 = arith.constant 0 : i32
    %c0_i32_2 = arith.constant 0 : i32
    return %c0_i32, %c0_i32_0, %c0_i32_1 : i32, i32, i32
  }
  func.func @transform_4(%arg0: i32) -> (i32, i32, i32) {
    %c0_i32 = arith.constant 0 : i32
    %c0_i32_0 = arith.constant 0 : i32
    %c0_i32_1 = arith.constant 0 : i32
    %c0_i32_2 = arith.constant 0 : i32
    return %c0_i32, %c0_i32_0, %c0_i32_1 : i32, i32, i32
  }
  func.func @transform_5(%arg0: i32) -> (i32, i32, i32) {
    %c0_i32 = arith.constant 0 : i32
    %c0_i32_0 = arith.constant 0 : i32
    %c0_i32_1 = arith.constant 0 : i32
    %c0_i32_2 = arith.constant 0 : i32
    return %c0_i32, %c0_i32_0, %c0_i32_1 : i32, i32, i32
  }
  func.func @transform_6(%arg0: i32) -> (i32, i32) {
    %c0_i32 = arith.constant 0 : i32
    %c0_i32_0 = arith.constant 0 : i32
    %c0_i32_1 = arith.constant 0 : i32
    return %c0_i32, %c0_i32_0 : i32, i32
  }
  func.func @transform_7(%arg0: i32) -> (i32, i32) {
    %c0_i32 = arith.constant 0 : i32
    %c0_i32_0 = arith.constant 0 : i32
    %c0_i32_1 = arith.constant 0 : i32
    return %c0_i32, %c0_i32_0 : i32, i32
  }
}

</mosaic_0001>

<bundles_post_ra>
// kernel: _encoder_core.1
= control target key start
LH: loop header
LB: loop body
LE: loop exit
PB: predicated region body
PF: predicated region fallthrough
CT: control target
= control target key end

     0   :  { %13 = vsyncpa [#allocation5], 0  ;;  %vm63_vm0 = vcmask 261120   ;;  %v1673_v4 = vmov 0.0   ;;  %s2530_s0 = inlined_call_operand.vmem [shape: s32[8,1], index: 0, kind: input, shape index: {}]   ;;  %s2531_s1 = inlined_call_operand.vmem [shape: f32[8,8,32], index: 1, kind: input, shape index: {}]   ;;  %s2532_s2 = inlined_call_operand.vmem [shape: f32[2,32,128], index: 2, kind: input, shape index: {}]   ;;  %s2533_s3 = inlined_call_operand.vmem [shape: f32[2,32,128], index: 3, kind: input, shape index: {}]   ;;  %s2534_s4 = inlined_call_operand.vmem [shape: f32[2,1,128], index: 4, kind: input, shape index: {}]   ;;  %s2535_s5 = inlined_call_operand.hbm [shape: f32[8,8,32], index: 5, kind: output, shape index: {0}]   ;;  %s2536_s6 = inlined_call_operand.hbm [shape: f32[8,32], index: 6, kind: output, shape index: {1}]   ;;  %s2537_s7 = inlined_call_operand.hbm [shape: f32[8,32], index: 7, kind: output, shape index: {2}]  }
   0x1   :  { %v34_v0 = vld [vmem:[%s2532_s2 + $0x18] sm:$0xff]  ;;  %v33_v1 = vld [vmem:[%s2532_s2 + $0x10] sm:$0xff]  ;;  %137 = vst.msk [vmem:[#allocation3] sm:$0xff] %vm63_vm0, %v1673_v4  ;;  %v32_v5 = vld [vmem:[%s2532_s2 + $0x8] sm:$0xff] }
   0x2   :  { %v1732_v2 = vld [vmem:[%s2533_s3 + $0x18] sm:$0xff]  ;;  %100 = vmatpush.msra.mxu0 %v34_v0  ;;  %v1738_v3 = vld [vmem:[%s2533_s3 + $0x10] sm:$0xff]  ;;  %v1748_v6 = vld [vmem:[%s2533_s3 + $0x8] sm:$0xff]  ;;  %138 = vst.msk [vmem:[#allocation3 + $0x8] sm:$0xff] %vm63_vm0, %v1673_v4 }
   0x3   :  { %163 = vmatpush.msra.mxu1 %v1732_v2  ;;  %236 = vmatpush.msra.mxu2 %v1732_v2  ;;  %v31_v7 = vld [vmem:[%s2532_s2] sm:$0xff]  ;;  %139 = vst.msk [vmem:[#allocation3 + $0x10] sm:$0xff] %vm63_vm0, %v1673_v4 }
   0x4   :  { %101 = vmatpush.msra.mxu0 %v33_v1  ;;  %v1762_v8 = vld [vmem:[%s2533_s3] sm:$0xff]  ;;  %140 = vst.msk [vmem:[#allocation3 + $0x18] sm:$0xff] %vm63_vm0, %v1673_v4 }
   0x5   :  { %164 = vmatpush.msra.mxu1 %v1738_v3  ;;  %237 = vmatpush.msra.mxu2 %v1738_v3 }
   0x6   :  { %14 = vsyncpa [#allocation7], 0  ;;  %102 = vmatpush.msra.mxu0 %v32_v5  ;;  %v52_v9 = vld [vmem:[%s2531_s1] sm:$0xff]  ;;  %141 = vst.msk [vmem:[#allocation3 + $0x20] sm:$0xff] %vm63_vm0, %v1673_v4  ;;  %v26_v10 = vlaneseq  ;;  %s1674_s21 = smov 64   ;;  %s1675_s22 = smov 32  }
   0x7   :  { %165 = vmatpush.msra.mxu1 %v1748_v6  ;;  %142 = vst.msk [vmem:[#allocation3 + $0x28] sm:$0xff] %vm63_vm0, %v1673_v4  ;;  %238 = vmatpush.msra.mxu2 %v1748_v6  ;;  %v1791_v11 = vld [vmem:[%s2534_s4] ss:$0 sm:$0xff]  ;;  %v1676_v26 = vmov 0   ;;  %s1677_s25 = smov 96   ;;  %v1831_v37 = vld [vmem:[%s2531_s1 + $0x8] sm:$0xff] }
   0x8   :  { %103 = vmatpush.msra.mxu0 %v31_v7  ;;  %143 = vst.msk [vmem:[#allocation3 + $0x30] sm:$0xff] %vm63_vm0, %v1673_v4  ;;  %v27_v12 = vand.u32 127, %v26_v10  ;;  %1524 = vset.pattern.permute.xlu1 %v1676_v26  ;;  %v1813_v31 = vld [vmem:[%s2530_s0] sm:$0xff]  ;;  %v1845_v41 = vld [vmem:[%s2532_s2 + $0x38] sm:$0xff]  ;;  %v1850_v42 = vld [vmem:[%s2532_s2 + $0x30] sm:$0xff]  ;;  %s1679_s18 = smov [#allocation8]  }
   0x9   :  { %166 = vmatpush.msra.mxu1 %v1762_v8  ;;  %1477 = vmatmul.msk.f32.vlgmr.msra.gmra.mxu0 %vm63_vm0, %v52_v9  ;;  %144 = vst.msk [vmem:[#allocation3 + $0x38] sm:$0xff] %vm63_vm0, %v1673_v4  ;;  %vm145_vm4 = vcmp.gt.s32.totalorder %v1813_v31, 0  ;;  %v1856_v43 = vld [vmem:[%s2532_s2 + $0x28] sm:$0xff]  ;;  %v1863_v44 = vld [vmem:[%s2532_s2 + $0x20] sm:$0xff]  ;;  %v1869_v45 = vld [vmem:[%s2533_s3 + $0x38] sm:$0xff]  ;;  %vm214_vm6 = vcmp.gt.s32.totalorder %v1813_v31, 1 }
   0xa   :  { %167 = vmatmul.f32.vlgmr.msra.gmra.mxu1 %v1673_v4  ;;  %239 = vmatpush.msra.mxu2 %v1762_v8  ;;  %vm28_vm1 = vcmp.ge.s32.totalorder %v27_v12, 64  ;;  %vm29_vm2 = vcmp.lt.s32.totalorder %v27_v12, 96  ;;  %v195_v32 = vsel %vm145_vm4, 1, %v1676_v26  ;;  %v1876_v46 = vld [vmem:[%s2533_s3 + $0x30] sm:$0xff]  ;;  %v1883_v47 = vld [vmem:[%s2533_s3 + $0x28] sm:$0xff]  ;;  %v1888_v48 = vld [vmem:[%s2533_s3 + $0x20] sm:$0xff] }
   0xb   :  { %vm1794_vm3 = vmand %vm28_vm1, %vm29_vm2  ;;  %1525 = vset.pattern.permute.xlu2 %v1676_v26  ;;  %1526 = vset.pattern.permute.xlu0 %v1676_v26  ;;  %v1918_v61 = vld [vmem:[%s2534_s4 + $0x1] ss:$0 sm:$0xff]  ;;  %v268_v10 = vsel %vm214_vm6, 1, %v1676_v26  ;;  %vm369_vm8 = vcmp.gt.s32.totalorder %v1813_v31, 2  ;;  %vm528_vm10 = vcmp.gt.s32.totalorder %v1813_v31, 3  ;;  %vm687_vm12 = vcmp.gt.s32.totalorder %v1813_v31, 4 }
   0xc   :  { %391 = vmatpush.msrb.mxu2 %v1732_v2  ;;  %306 = vmatpush.msra.mxu3 %v1845_v41  ;;  %vm846_vm14 = vcmp.gt.s32.totalorder %v1813_v31, 5  ;;  %vm1005_vm1 = vcmp.gt.s32.totalorder %v1813_v31, 6  ;;  %s1450_s20 = sshll.u32 %s2537_s7, 4  ;;  %s1680_s23 = smov [#allocation4]   ;;  %s1451_s20 = int_to_ptr.hbm [resolvable:$true] %s1450_s20 }
   0xd   :  { %326 = vmatpush.msrb.mxu1 %v1869_v45  ;;  %s1423_s24 = sshll.u32 %s1680_s23, 4  ;;  %s1425_s28 = sshll.u32 %s2535_s5, 4  ;;  %s1424_s24 = int_to_ptr.vmem [resolvable:$true] %s1423_s24  ;;  %s1426_s28 = int_to_ptr.hbm [resolvable:$true] %s1425_s28 }
   0xe   :  { %392 = vmatpush.msrb.mxu2 %v1738_v3  ;;  %307 = vmatpush.msra.mxu3 %v1850_v42  ;;  %s1682_s29 = smov 8  }
   0xf   :  { %327 = vmatpush.msrb.mxu1 %v1876_v46 }
  0x10   :  { %393 = vmatpush.msrb.mxu2 %v1748_v6  ;;  %308 = vmatpush.msra.mxu3 %v1856_v43 }
  0x11   :  { %1478 = vmatmul.msk.f32.gmra.mxu0 %vm63_vm0, %v1831_v37  ;;  %328 = vmatpush.msrb.mxu1 %v1883_v47 }
  0x12   :  { %394 = vmatpush.msrb.mxu2 %v1762_v8  ;;  %309 = vmatpush.msra.mxu3 %v1863_v44 }
  0x13   :  { %329 = vmatpush.msrb.mxu1 %v1888_v48 }
  0x14   :  { %458 = vmatpush.msrb.mxu3 %v1845_v41  ;;  %330 = vmatmul.f32.vlgmr.msrb.gmra.mxu1 %v1673_v4 }
  0x15   :  { %483 = vmatpush.msra.mxu1 %v1869_v45 }
  0x16   :  { %459 = vmatpush.msrb.mxu3 %v1850_v42 }
  0x17   :  { %484 = vmatpush.msra.mxu1 %v1876_v46 }
  0x18   :  { %460 = vmatpush.msrb.mxu3 %v1856_v43 }
  0x19   :  { %485 = vmatpush.msra.mxu1 %v1883_v47 }
  0x1a   :  { %461 = vmatpush.msrb.mxu3 %v1863_v44 }
  0x1b   :  { %486 = vmatpush.msra.mxu1 %v1888_v48 }
  0x1d   :  { %642 = vmatpush.msrb.mxu1 %v1869_v45 }
  0x1f   :  { %643 = vmatpush.msrb.mxu1 %v1876_v46 }
  0x21   :  { %644 = vmatpush.msrb.mxu1 %v1883_v47 }
  0x23   :  { %645 = vmatpush.msrb.mxu1 %v1888_v48 }
  0x86   :  { %v105_v13 = vpop.f32.mrf.mxu0 }
  0x87   :  { %v168_v14 = vpop.f32.mrf.mxu1  ;;  %v106_v15 = vadd.f32 %v1791_v11, %v105_v13 }
  0x89   :  { %v171_v16 = vadd.f32 %v168_v14, %v106_v15 }
  0x8b   :  { %v172_v18 = vmul.f32 0.5, %v171_v16 }
  0x8d   :  { %v173_v19 = vsel %vm1794_vm3, %v171_v16, %v172_v18 }
  0x8e   :  { %1529 = vtanh.f32 %v173_v19  ;;  %v108_v50 = vpop.f32.mrf.mxu0 }
  0x8f   :  { %v109_v51 = vadd.f32 %v1791_v11, %v108_v50 }
  0x91   :  { %v331_v1 = vpop.f32.mrf.mxu1 }
  0x94   :  { %v1530_v20 = vpop.eup %1529 }
  0x95   :  { %v175_v21 = vmul.f32 0.5, %v1530_v20 }
  0x97   :  { %v176_v22 = vadd.f32 0.5, %v175_v21 }
  0x99   :  { %v177_v23 = vsel %vm1794_vm3, %v1530_v20, %v176_v22 }
  0x9a   :  { %180 = vrot.lane.b32.xlu0 %v177_v23, %s1674_s21  ;;  %v178_v27 = vmul.f32 0.0, %v177_v23 }
 0x10c   :  { %v181_v24 = vpop.permute.xlu0 %180 }
 0x10d   :  { %v183_v25 = vmul.f32 %v181_v24, %v177_v23 }
 0x10f   :  { %185 = vrot.lane.b32.xlu0 %v183_v25, %s1675_s22 }
 0x181   :  { %v186_v28 = vpop.permute.xlu0 %185 }
 0x182   :  { %v1807_v29 = vadd.f32 %v186_v28, %v178_v27 }
 0x184   :  { %1531 = vtanh.f32 %v1807_v29 }
 0x18a   :  { %v1532_v30 = vpop.eup %1531 }
 0x18b   :  { %191 = vrot.lane.b32.xlu1 %v1532_v30, %s1674_s21 }
 0x193   :  { %197 = vperm.xlu1 %1524, %v195_v32  }
 0x1fd   :  { %v192_v33 = vpop.permute.xlu1 %191 }
 0x1fe   :  { %v194_v34 = vmul.f32 %v192_v33, %v177_v23 }
 0x205   :  { %v1818_v35 = vpop.permute.xlu1 %197 }
 0x206   :  { %vm199_vm5 = vcmp.eq.s32.totalorder %v1818_v35, 1 }
 0x207   :  { %v1823_v36 = vsel %vm199_vm5, %v194_v34, 0.0  ;;  %v1932_v16 = vsel %vm199_vm5, %v1807_v29, 0.0 }
 0x208   :  { %220 = vrot.lane.b32.xlu2 %v1823_v36, %s1675_s22 }
 0x210   :  { %203 = vrot.lane.b32.xlu2 %v52_v9, %s1677_s25 }
 0x262   :  { %v221_v38 = vpop.permute.xlu2 %220 }
 0x263   :  { %1486 = vmatmul.msk.f32.vlgmr.msra.gmra.mxu2 %vm63_vm0, %v221_v38 }
 0x264   :  { %550 = vmatpush.msra.mxu2 %v1732_v2 }
 0x266   :  { %551 = vmatpush.msra.mxu2 %v1738_v3 }
 0x268   :  { %552 = vmatpush.msra.mxu2 %v1748_v6 }
 0x26a   :  { %v204_v39 = vpop.permute.xlu2 %203  ;;  %553 = vmatpush.msra.mxu2 %v1762_v8 }
 0x26b   :  { %v206_v40 = vadd.f32 %v204_v39, %v1823_v36 }
 0x26d   :  { %208 = vrot.lane.b32.xlu0 %v206_v40, %s1675_s22 }
 0x2df   :  { %v209_v49 = vpop.permute.xlu0 %208 }
 0x2e0   :  { %211 = vst.msk [vmem:[#allocation3] sm:$0xff] %vm63_vm0, %v209_v49 }
 0x2e6   :  { %v241_v52 = vpop.f32.mrf.mxu2 }
 0x2e7   :  { %v244_v53 = vadd.f32 %v241_v52, %v109_v51  ;;  %v287_v54 = vld [vmem:[#allocation3] sm:$0xff] }
 0x2e8   :  { %1487 = vmatmul.msk.f32.vlgmr.msra.gmra.mxu3 %vm63_vm0, %v287_v54 }
 0x2e9   :  { %v245_v55 = vmul.f32 0.5, %v244_v53  ;;  %617 = vmatpush.msra.mxu3 %v1845_v41 }
 0x2eb   :  { %v246_v56 = vsel %vm1794_vm3, %v244_v53, %v245_v55  ;;  %618 = vmatpush.msra.mxu3 %v1850_v42 }
 0x2ec   :  { %1533 = vtanh.f32 %v246_v56 }
 0x2ed   :  { %619 = vmatpush.msra.mxu3 %v1856_v43 }
 0x2ef   :  { %620 = vmatpush.msra.mxu3 %v1863_v44 }
 0x2f2   :  { %v1534_v57 = vpop.eup %1533 }
 0x2f3   :  { %v248_v58 = vmul.f32 0.5, %v1534_v57 }
 0x2f5   :  { %v249_v59 = vadd.f32 0.5, %v248_v58 }
 0x2f7   :  { %v250_v60 = vsel %vm1794_vm3, %v1534_v57, %v249_v59 }
 0x2f8   :  { %253 = vrot.lane.b32.xlu1 %v250_v60, %s1674_s21  ;;  %v251_v18 = vmul.f32 %v250_v60, %v1932_v16 }
 0x36a   :  { %v254_v62 = vpop.permute.xlu1 %253 }
 0x36b   :  { %v256_v63 = vmul.f32 %v254_v62, %v250_v60  ;;  %v311_v0 = vpop.f32.mrf.mxu3 }
 0x36c   :  { %v312_v4 = vadd.f32 %v1918_v61, %v311_v0 }
 0x36d   :  { %258 = vrot.lane.b32.xlu2 %v256_v63, %s1675_s22 }
 0x36e   :  { %v334_v5 = vadd.f32 %v331_v1, %v312_v4 }
 0x370   :  { %v335_v7 = vmul.f32 0.5, %v334_v5 }
 0x372   :  { %v336_v9 = vsel %vm1794_vm3, %v334_v5, %v335_v7  ;;  %v423_v5 = vsel %vm369_vm8, 1, %v1676_v26 }
 0x373   :  { %1535 = vtanh.f32 %v336_v9 }
 0x375   :  { %270 = vperm.xlu2 %1525, %v268_v10  }
 0x379   :  { %v1536_v12 = vpop.eup %1535 }
 0x37a   :  { %v338_v13 = vmul.f32 0.5, %v1536_v12 }
 0x37c   :  { %v339_v14 = vadd.f32 0.5, %v338_v13 }
 0x37e   :  { %v340_v15 = vsel %vm1794_vm3, %v1536_v12, %v339_v14 }
 0x37f   :  { %343 = vrot.lane.b32.xlu0 %v340_v15, %s1674_s21  ;;  %v341_v33 = vmul.f32 0.0, %v340_v15 }
 0x3c7   :  { %v259_v19 = vpop.permute.xlu2 %258 }
 0x3c8   :  { %v1935_v20 = vadd.f32 %v259_v19, %v251_v18 }
 0x3ca   :  { %1537 = vtanh.f32 %v1935_v20 }
 0x3cf   :  { %v1942_v24 = vpop.permute.xlu2 %270 }
 0x3d0   :  { %v1538_v21 = vpop.eup %1537  ;;  %vm272_vm7 = vcmp.eq.s32.totalorder %v1942_v24, 1 }
 0x3d1   :  { %264 = vrot.lane.b32.xlu1 %v1538_v21, %s1674_s21 }
 0x3d9   :  { %277 = vrot.lane.b32.xlu1 %v1831_v37, %s1677_s25 }
 0x3f1   :  { %v344_v22 = vpop.permute.xlu0 %343 }
 0x3f2   :  { %v346_v23 = vmul.f32 %v344_v22, %v340_v15  ;;  %v2010_v22 = vsel %vm272_vm7, %v1935_v20, %v1932_v16 }
 0x3f4   :  { %348 = vrot.lane.b32.xlu0 %v346_v23, %s1675_s22 }
 0x443   :  { %v265_v25 = vpop.permute.xlu1 %264 }
 0x444   :  { %v267_v27 = vmul.f32 %v265_v25, %v250_v60 }
 0x446   :  { %v1948_v28 = vsel %vm272_vm7, %v267_v27, %v1823_v36  ;;  %v275_v30 = vsel %vm272_vm7, %v267_v27, 0.0  ;;  %v1962_v36 = vld [vmem:[%s2531_s1 + $0x10] sm:$0xff] }
 0x447   :  { %375 = vrot.lane.b32.xlu2 %v1948_v28, %s1675_s22  ;;  %1479 = vmatmul.msk.f32.gmra.mxu0 %vm63_vm0, %v1962_v36 }
 0x44b   :  { %v278_v29 = vpop.permute.xlu1 %277 }
 0x44c   :  { %v280_v32 = vadd.f32 %v278_v29, %v275_v30 }
 0x44e   :  { %282 = vrot.lane.b32.xlu1 %v280_v32, %s1675_s22 }
 0x466   :  { %v349_v34 = vpop.permute.xlu0 %348 }
 0x467   :  { %v1955_v37 = vadd.f32 %v349_v34, %v341_v33 }
 0x469   :  { %1539 = vtanh.f32 %v1955_v37  ;;  %v2023_v16 = vsel %vm199_vm5, %v1955_v37, 0.0 }
 0x46f   :  { %v1540_v38 = vpop.eup %1539 }
 0x470   :  { %354 = vrot.lane.b32.xlu0 %v1540_v38, %s1674_s21 }
 0x4a1   :  { %v376_v39 = vpop.permute.xlu2 %375 }
 0x4a2   :  { %1489 = vmatmul.msk.f32.vlgmr.msrb.gmra.mxu2 %vm63_vm0, %v376_v39 }
 0x4a3   :  { %709 = vmatpush.msrb.mxu2 %v1732_v2 }
 0x4a5   :  { %710 = vmatpush.msrb.mxu2 %v1738_v3 }
 0x4a7   :  { %711 = vmatpush.msrb.mxu2 %v1748_v6 }
 0x4a9   :  { %712 = vmatpush.msrb.mxu2 %v1762_v8 }
 0x4c0   :  { %v283_v40 = vpop.permute.xlu1 %282 }
 0x4c1   :  { %286 = vst.msk [vmem:[#allocation3 + $0x8] sm:$0xff] %vm63_vm0, %v283_v40 }
 0x4c4   :  { %v111_v53 = vpop.f32.mrf.mxu0 }
 0x4c5   :  { %v112_v54 = vadd.f32 %v1791_v11, %v111_v53 }
 0x4c8   :  { %v1972_v49 = vld [vmem:[#allocation3 + $0x8] sm:$0xff] }
 0x4c9   :  { %1490 = vmatmul.msk.f32.vlgmr.msrb.gmra.mxu3 %vm63_vm0, %v1972_v49 }
 0x4ca   :  { %776 = vmatpush.msrb.mxu3 %v1845_v41 }
 0x4cc   :  { %777 = vmatpush.msrb.mxu3 %v1850_v42 }
 0x4ce   :  { %778 = vmatpush.msrb.mxu3 %v1856_v43 }
 0x4d0   :  { %779 = vmatpush.msrb.mxu3 %v1863_v44 }
 0x4e2   :  { %v355_v50 = vpop.permute.xlu0 %354 }
 0x4e3   :  { %v357_v51 = vmul.f32 %v355_v50, %v340_v15 }
 0x4e5   :  { %v1982_v52 = vsel %vm199_vm5, %v357_v51, 0.0 }
 0x4e6   :  { %467 = vrot.lane.b32.xlu2 %v1982_v52, %s1675_s22 }
 0x525   :  { %v396_v55 = vpop.f32.mrf.mxu2 }
 0x526   :  { %v399_v56 = vadd.f32 %v396_v55, %v112_v54 }
 0x528   :  { %v400_v57 = vmul.f32 0.5, %v399_v56 }
 0x52a   :  { %v401_v58 = vsel %vm1794_vm3, %v399_v56, %v400_v57 }
 0x52b   :  { %1541 = vtanh.f32 %v401_v58 }
 0x531   :  { %v1542_v59 = vpop.eup %1541 }
 0x532   :  { %v403_v60 = vmul.f32 0.5, %v1542_v59 }
 0x534   :  { %v404_v62 = vadd.f32 0.5, %v403_v60 }
 0x536   :  { %v405_v63 = vsel %vm1794_vm3, %v1542_v59, %v404_v62 }
 0x537   :  { %408 = vrot.lane.b32.xlu0 %v405_v63, %s1674_s21  ;;  %v406_v23 = vmul.f32 %v405_v63, %v2010_v22 }
 0x540   :  { %v468_v0 = vpop.permute.xlu2 %467 }
 0x541   :  { %1491 = vmatmul.msk.f32.vlgmr.msra.gmra.mxu1 %vm63_vm0, %v468_v0 }
 0x542   :  { %801 = vmatpush.msra.mxu1 %v1869_v45 }
 0x544   :  { %802 = vmatpush.msra.mxu1 %v1876_v46 }
 0x546   :  { %803 = vmatpush.msra.mxu1 %v1883_v47 }
 0x548   :  { %804 = vmatpush.msra.mxu1 %v1888_v48 }
 0x54c   :  { %v463_v7 = vpop.f32.mrf.mxu3 }
 0x54d   :  { %v464_v9 = vadd.f32 %v1918_v61, %v463_v7 }
 0x5a9   :  { %v409_v1 = vpop.permute.xlu0 %408 }
 0x5aa   :  { %v411_v4 = vmul.f32 %v409_v1, %v405_v63 }
 0x5ac   :  { %413 = vrot.lane.b32.xlu1 %v411_v4, %s1675_s22 }
 0x5b4   :  { %425 = vperm.xlu1 %1524, %v423_v5  }
 0x5be   :  { %v488_v10 = vpop.f32.mrf.mxu1 }
 0x5bf   :  { %v491_v12 = vadd.f32 %v488_v10, %v464_v9 }
 0x5c1   :  { %v492_v13 = vmul.f32 0.5, %v491_v12 }
 0x5c3   :  { %v493_v14 = vsel %vm1794_vm3, %v491_v12, %v492_v13 }
 0x5c4   :  { %1543 = vtanh.f32 %v493_v14 }
 0x5ca   :  { %v1544_v15 = vpop.eup %1543 }
 0x5cb   :  { %v495_v18 = vmul.f32 0.5, %v1544_v15 }
 0x5cd   :  { %v496_v19 = vadd.f32 0.5, %v495_v18 }
 0x5cf   :  { %v497_v21 = vsel %vm1794_vm3, %v1544_v15, %v496_v19 }
 0x5d0   :  { %500 = vrot.lane.b32.xlu2 %v497_v21, %s1674_s21  ;;  %v498_v20 = vmul.f32 %v497_v21, %v2023_v16 }
 0x61e   :  { %v414_v25 = vpop.permute.xlu1 %413 }
 0x61f   :  { %v2013_v27 = vadd.f32 %v414_v25, %v406_v23 }
 0x621   :  { %1545 = vtanh.f32 %v2013_v27 }
 0x626   :  { %v2030_v39 = vpop.permute.xlu1 %425 }
 0x627   :  { %v1546_v29 = vpop.eup %1545  ;;  %vm427_vm9 = vcmp.eq.s32.totalorder %v2030_v39, 1 }
 0x628   :  { %419 = vrot.lane.b32.xlu0 %v1546_v29, %s1674_s21 }
 0x62a   :  { %v501_v30 = vpop.permute.xlu2 %500 }
 0x62b   :  { %v503_v32 = vmul.f32 %v501_v30, %v497_v21  ;;  %v582_v30 = vsel %vm528_vm10, 1, %v1676_v26 }
 0x62d   :  { %505 = vrot.lane.b32.xlu2 %v503_v32, %s1675_s22 }
 0x630   :  { %432 = vrot.lane.b32.xlu0 %v1962_v36, %s1677_s25 }
 0x687   :  { %v506_v33 = vpop.permute.xlu2 %505 }
 0x688   :  { %v2026_v34 = vadd.f32 %v506_v33, %v498_v20 }
 0x68a   :  { %1547 = vtanh.f32 %v2026_v34 }
 0x690   :  { %v1548_v38 = vpop.eup %1547 }
 0x691   :  { %511 = vrot.lane.b32.xlu2 %v1548_v38, %s1674_s21 }
 0x69a   :  { %v420_v40 = vpop.permute.xlu0 %419 }
 0x69b   :  { %v422_v50 = vmul.f32 %v420_v40, %v405_v63  ;;  %v2097_v40 = vsel %vm427_vm9, %v2013_v27, %v2010_v22 }
 0x69d   :  { %v2036_v35 = vsel %vm427_vm9, %v422_v50, %v1948_v28  ;;  %v430_v37 = vsel %vm427_vm9, %v422_v50, 0.0  ;;  %v55_v28 = vld [vmem:[%s2531_s1 + $0x18] sm:$0xff] }
 0x69e   :  { %534 = vrot.lane.b32.xlu1 %v2036_v35, %s1675_s22  ;;  %1480 = vmatmul.msk.f32.gmra.mxu0 %vm63_vm0, %v55_v28 }
 0x6a2   :  { %v433_v36 = vpop.permute.xlu0 %432 }
 0x6a3   :  { %v435_v51 = vadd.f32 %v433_v36, %v430_v37 }
 0x6a5   :  { %437 = vrot.lane.b32.xlu0 %v435_v51, %s1675_s22 }
 0x6eb   :  { %v512_v53 = vpop.permute.xlu2 %511 }
 0x6ec   :  { %v2043_v54 = vmul.f32 %v512_v53, %v497_v21  ;;  %v2108_v53 = vsel %vm272_vm7, %v2026_v34, %v2023_v16 }
 0x6ee   :  { %v2049_v55 = vsel %vm272_vm7, %v2043_v54, %v1982_v52 }
 0x6ef   :  { %626 = vrot.lane.b32.xlu1 %v2049_v55, %s1675_s22 }
 0x710   :  { %v535_v56 = vpop.permute.xlu1 %534 }
 0x711   :  { %1493 = vmatmul.msk.f32.vlgmr.msra.gmra.mxu2 %vm63_vm0, %v535_v56 }
 0x712   :  { %868 = vmatpush.msra.mxu2 %v1732_v2 }
 0x714   :  { %869 = vmatpush.msra.mxu2 %v1738_v3 }
 0x716   :  { %870 = vmatpush.msra.mxu2 %v1748_v6 }
 0x717   :  { %v438_v57 = vpop.permute.xlu0 %437 }
 0x718   :  { %441 = vst.msk [vmem:[#allocation3 + $0x10] sm:$0xff] %vm63_vm0, %v438_v57  ;;  %871 = vmatpush.msra.mxu2 %v1762_v8 }
 0x71b   :  { %v114_v60 = vpop.f32.mrf.mxu0 }
 0x71c   :  { %v115_v62 = vadd.f32 %v1791_v11, %v114_v60 }
 0x71f   :  { %v2063_v58 = vld [vmem:[#allocation3 + $0x10] sm:$0xff] }
 0x720   :  { %1494 = vmatmul.msk.f32.vlgmr.msra.gmra.mxu3 %vm63_vm0, %v2063_v58 }
 0x721   :  { %935 = vmatpush.msra.mxu3 %v1845_v41 }
 0x723   :  { %936 = vmatpush.msra.mxu3 %v1850_v42 }
 0x725   :  { %937 = vmatpush.msra.mxu3 %v1856_v43 }
 0x727   :  { %938 = vmatpush.msra.mxu3 %v1863_v44 }
 0x761   :  { %v627_v59 = vpop.permute.xlu1 %626 }
 0x762   :  { %1495 = vmatmul.msk.f32.vlgmr.msrb.gmra.mxu1 %vm63_vm0, %v627_v59 }
 0x763   :  { %960 = vmatpush.msrb.mxu1 %v1869_v45 }
 0x765   :  { %961 = vmatpush.msrb.mxu1 %v1876_v46 }
 0x767   :  { %962 = vmatpush.msrb.mxu1 %v1883_v47 }
 0x769   :  { %963 = vmatpush.msrb.mxu1 %v1888_v48 }
 0x794   :  { %v555_v63 = vpop.f32.mrf.mxu2 }
 0x795   :  { %v558_v0 = vadd.f32 %v555_v63, %v115_v62 }
 0x797   :  { %v559_v1 = vmul.f32 0.5, %v558_v0 }
 0x799   :  { %v560_v4 = vsel %vm1794_vm3, %v558_v0, %v559_v1 }
 0x79a   :  { %1549 = vtanh.f32 %v560_v4 }
 0x7a0   :  { %v1550_v5 = vpop.eup %1549 }
 0x7a1   :  { %v562_v7 = vmul.f32 0.5, %v1550_v5 }
 0x7a3   :  { %v563_v9 = vadd.f32 0.5, %v562_v7  ;;  %v622_v12 = vpop.f32.mrf.mxu3 }
 0x7a4   :  { %v623_v13 = vadd.f32 %v1918_v61, %v622_v12 }
 0x7a5   :  { %v564_v10 = vsel %vm1794_vm3, %v1550_v5, %v563_v9 }
 0x7a6   :  { %567 = vrot.lane.b32.xlu2 %v564_v10, %s1674_s21  ;;  %v565_v50 = vmul.f32 %v564_v10, %v2097_v40 }
 0x7df   :  { %v647_v14 = vpop.f32.mrf.mxu1 }
 0x7e0   :  { %v650_v15 = vadd.f32 %v647_v14, %v623_v13 }
 0x7e2   :  { %v651_v18 = vmul.f32 0.5, %v650_v15 }
 0x7e4   :  { %v652_v19 = vsel %vm1794_vm3, %v650_v15, %v651_v18 }
 0x7e5   :  { %1551 = vtanh.f32 %v652_v19 }
 0x7eb   :  { %v1552_v21 = vpop.eup %1551 }
 0x7ec   :  { %v654_v23 = vmul.f32 0.5, %v1552_v21 }
 0x7ee   :  { %v655_v25 = vadd.f32 0.5, %v654_v23 }
 0x7f0   :  { %v656_v29 = vsel %vm1794_vm3, %v1552_v21, %v655_v25 }
 0x7f1   :  { %659 = vrot.lane.b32.xlu1 %v656_v29, %s1674_s21 }
 0x7f9   :  { %584 = vperm.xlu1 %1524, %v582_v30  }
 0x800   :  { %v568_v32 = vpop.permute.xlu2 %567 }
 0x801   :  { %v570_v20 = vmul.f32 %v568_v32, %v564_v10 }
 0x803   :  { %572 = vrot.lane.b32.xlu0 %v570_v20, %s1675_s22 }
 0x863   :  { %v660_v33 = vpop.permute.xlu1 %659 }
 0x864   :  { %v662_v38 = vmul.f32 %v660_v33, %v656_v29 }
 0x866   :  { %664 = vrot.lane.b32.xlu2 %v662_v38, %s1675_s22 }
 0x86b   :  { %v2115_v57 = vpop.permute.xlu1 %584 }
 0x86c   :  { %vm586_vm11 = vcmp.eq.s32.totalorder %v2115_v57, 1 }
 0x86e   :  { %591 = vrot.lane.b32.xlu2 %v55_v28, %s1677_s25  ;;  %v657_v28 = vmul.f32 %v656_v29, %v2108_v53 }
 0x875   :  { %v573_v37 = vpop.permute.xlu0 %572 }
 0x876   :  { %v2100_v36 = vadd.f32 %v573_v37, %v565_v50 }
 0x878   :  { %1553 = vtanh.f32 %v2100_v36 }
 0x87e   :  { %v1554_v51 = vpop.eup %1553 }
 0x87f   :  { %578 = vrot.lane.b32.xlu0 %v1554_v51, %s1674_s21 }
 0x8c0   :  { %v665_v22 = vpop.permute.xlu2 %664 }
 0x8c1   :  { %v2111_v27 = vadd.f32 %v665_v22, %v657_v28 }
 0x8c3   :  { %1555 = vtanh.f32 %v2111_v27 }
 0x8c8   :  { %v592_v62 = vpop.permute.xlu2 %591 }
 0x8c9   :  { %v1556_v56 = vpop.eup %1555 }
 0x8ca   :  { %670 = vrot.lane.b32.xlu1 %v1556_v56, %s1674_s21 }
 0x8f1   :  { %v579_v59 = vpop.permute.xlu0 %578 }
 0x8f2   :  { %v581_v60 = vmul.f32 %v579_v59, %v564_v10  ;;  %v741_v59 = vsel %vm687_vm12, 1, %v1676_v26 }
 0x8f4   :  { %v589_v16 = vsel %vm586_vm11, %v581_v60, 0.0  ;;  %v2123_v34 = vsel %vm586_vm11, %v581_v60, %v2036_v35  ;;  %v56_v35 = vld [vmem:[%s2531_s1 + $0x20] sm:$0xff] }
 0x8f5   :  { %v594_v63 = vadd.f32 %v592_v62, %v589_v16  ;;  %693 = vrot.lane.b32.xlu0 %v2123_v34, %s1675_s22  ;;  %1481 = vmatmul.msk.f32.gmra.mxu0 %vm63_vm0, %v56_v35  ;;  %v2182_v16 = vsel %vm586_vm11, %v2100_v36, %v2097_v40 }
 0x8f7   :  { %596 = vrot.lane.b32.xlu2 %v594_v63, %s1675_s22 }
 0x93c   :  { %v671_v0 = vpop.permute.xlu1 %670 }
 0x93d   :  { %v2128_v1 = vmul.f32 %v671_v0, %v656_v29 }
 0x93f   :  { %v2134_v4 = vsel %vm427_vm9, %v2128_v1, %v2049_v55 }
 0x940   :  { %785 = vrot.lane.b32.xlu0 %v2134_v4, %s1675_s22 }
 0x951   :  { %v597_v5 = vpop.permute.xlu2 %596 }
 0x952   :  { %600 = vst.msk [vmem:[#allocation3 + $0x18] sm:$0xff] %vm63_vm0, %v597_v5 }
 0x959   :  { %v2143_v7 = vld [vmem:[#allocation3 + $0x18] sm:$0xff] }
 0x95a   :  { %1498 = vmatmul.msk.f32.vlgmr.msrb.gmra.mxu3 %vm63_vm0, %v2143_v7 }
 0x95b   :  { %1094 = vmatpush.msrb.mxu3 %v1845_v41 }
 0x95d   :  { %1095 = vmatpush.msrb.mxu3 %v1850_v42 }
 0x95f   :  { %1096 = vmatpush.msrb.mxu3 %v1856_v43 }
 0x961   :  { %1097 = vmatpush.msrb.mxu3 %v1863_v44 }
 0x967   :  { %v694_v55 = vpop.permute.xlu0 %693 }
 0x968   :  { %1497 = vmatmul.msk.f32.vlgmr.msrb.gmra.mxu2 %vm63_vm0, %v694_v55 }
 0x969   :  { %1027 = vmatpush.msrb.mxu2 %v1732_v2 }
 0x96b   :  { %1028 = vmatpush.msrb.mxu2 %v1738_v3 }
 0x96d   :  { %1029 = vmatpush.msrb.mxu2 %v1748_v6 }
 0x96f   :  { %1030 = vmatpush.msrb.mxu2 %v1762_v8 }
 0x972   :  { %v117_v10 = vpop.f32.mrf.mxu0 }
 0x973   :  { %v118_v12 = vadd.f32 %v1791_v11, %v117_v10 }
 0x9b2   :  { %v786_v9 = vpop.permute.xlu0 %785 }
 0x9b3   :  { %1499 = vmatmul.msk.f32.vlgmr.msra.gmra.mxu1 %vm63_vm0, %v786_v9 }
 0x9b4   :  { %1119 = vmatpush.msra.mxu1 %v1869_v45 }
 0x9b6   :  { %1120 = vmatpush.msra.mxu1 %v1876_v46 }
 0x9b8   :  { %1121 = vmatpush.msra.mxu1 %v1883_v47 }
 0x9ba   :  { %1122 = vmatpush.msra.mxu1 %v1888_v48 }
 0x9dd   :  { %v781_v29 = vpop.f32.mrf.mxu3 }
 0x9de   :  { %v782_v30 = vadd.f32 %v1918_v61, %v781_v29 }
 0x9eb   :  { %v714_v13 = vpop.f32.mrf.mxu2 }
 0x9ec   :  { %v717_v14 = vadd.f32 %v714_v13, %v118_v12 }
 0x9ee   :  { %v718_v15 = vmul.f32 0.5, %v717_v14 }
 0x9f0   :  { %v719_v18 = vsel %vm1794_vm3, %v717_v14, %v718_v15 }
 0x9f1   :  { %1557 = vtanh.f32 %v719_v18 }
 0x9f7   :  { %v1558_v19 = vpop.eup %1557 }
 0x9f8   :  { %v721_v21 = vmul.f32 0.5, %v1558_v19 }
 0x9fa   :  { %v722_v23 = vadd.f32 0.5, %v721_v21 }
 0x9fc   :  { %v723_v25 = vsel %vm1794_vm3, %v1558_v19, %v722_v23 }
 0x9fd   :  { %726 = vrot.lane.b32.xlu1 %v723_v25, %s1674_s21  ;;  %v724_v63 = vmul.f32 %v723_v25, %v2182_v16 }
 0xa30   :  { %v806_v32 = vpop.f32.mrf.mxu1 }
 0xa31   :  { %v809_v20 = vadd.f32 %v806_v32, %v782_v30 }
 0xa33   :  { %v810_v33 = vmul.f32 0.5, %v809_v20 }
 0xa35   :  { %v811_v38 = vsel %vm1794_vm3, %v809_v20, %v810_v33 }
 0xa36   :  { %1559 = vtanh.f32 %v811_v38 }
 0xa3c   :  { %v1560_v50 = vpop.eup %1559 }
 0xa3d   :  { %v813_v37 = vmul.f32 0.5, %v1560_v50 }
 0xa3f   :  { %v814_v51 = vadd.f32 0.5, %v813_v37 }
 0xa41   :  { %v815_v28 = vsel %vm1794_vm3, %v1560_v50, %v814_v51 }
 0xa42   :  { %818 = vrot.lane.b32.xlu2 %v815_v28, %s1674_s21 }
 0xa6f   :  { %v727_v22 = vpop.permute.xlu1 %726 }
 0xa70   :  { %v729_v56 = vmul.f32 %v727_v22, %v723_v25 }
 0xa72   :  { %731 = vrot.lane.b32.xlu0 %v729_v56, %s1675_s22 }
 0xa7a   :  { %743 = vperm.xlu0 %1526, %v741_v59  }
 0xa9c   :  { %v819_v60 = vpop.permute.xlu2 %818 }
 0xa9d   :  { %v821_v62 = vmul.f32 %v819_v60, %v815_v28 }
 0xa9f   :  { %823 = vrot.lane.b32.xlu1 %v821_v62, %s1675_s22 }
 0xaa7   :  { %750 = vrot.lane.b32.xlu1 %v56_v35, %s1677_s25  ;;  %v2193_v35 = vsel %vm427_vm9, %v2111_v27, %v2108_v53 }
 0xaa8   :  { %v816_v9 = vmul.f32 %v815_v28, %v2193_v35 }
 0xae4   :  { %v732_v0 = vpop.permute.xlu0 %731 }
 0xae5   :  { %v2185_v5 = vadd.f32 %v732_v0, %v724_v63 }
 0xae7   :  { %1561 = vtanh.f32 %v2185_v5 }
 0xaec   :  { %v2200_v12 = vpop.permute.xlu0 %743 }
 0xaed   :  { %v1562_v55 = vpop.eup %1561  ;;  %vm745_vm13 = vcmp.eq.s32.totalorder %v2200_v12, 1 }
 0xaee   :  { %737 = vrot.lane.b32.xlu2 %v1562_v55, %s1674_s21 }
 0xb11   :  { %v824_v40 = vpop.permute.xlu1 %823 }
 0xb12   :  { %v2196_v36 = vadd.f32 %v824_v40, %v816_v9 }
 0xb14   :  { %1563 = vtanh.f32 %v2196_v36 }
 0xb19   :  { %v751_v15 = vpop.permute.xlu1 %750 }
 0xb1a   :  { %v1564_v10 = vpop.eup %1563 }
 0xb1b   :  { %829 = vrot.lane.b32.xlu2 %v1564_v10, %s1674_s21  ;;  %v900_v10 = vsel %vm846_vm14, 1, %v1676_v26 }
 0xb48   :  { %v738_v13 = vpop.permute.xlu2 %737 }
 0xb49   :  { %v740_v14 = vmul.f32 %v738_v13, %v723_v25 }
 0xb4b   :  { %v748_v53 = vsel %vm745_vm13, %v740_v14, 0.0  ;;  %v2208_v27 = vsel %vm745_vm13, %v740_v14, %v2123_v34  ;;  %v57_v34 = vld [vmem:[%s2531_s1 + $0x28] sm:$0xff] }
 0xb4c   :  { %v753_v18 = vadd.f32 %v751_v15, %v748_v53  ;;  %852 = vrot.lane.b32.xlu1 %v2208_v27, %s1675_s22  ;;  %1482 = vmatmul.msk.f32.gmra.mxu0 %vm63_vm0, %v57_v34  ;;  %v2267_v15 = vsel %vm745_vm13, %v2185_v5, %v2182_v16 }
 0xb4e   :  { %755 = vrot.lane.b32.xlu2 %v753_v18, %s1675_s22 }
 0xb75   :  { %v830_v19 = vpop.permute.xlu2 %829 }
 0xb76   :  { %v2213_v21 = vmul.f32 %v830_v19, %v815_v28 }
 0xb78   :  { %v2219_v23 = vsel %vm586_vm11, %v2213_v21, %v2134_v4  ;;  %v835_v17 = vsel %vm586_vm11, %v2213_v21, 0.0 }
 0xb79   :  { %944 = vrot.lane.b32.xlu0 %v2219_v23, %s1675_s22 }
 0xba8   :  { %v756_v25 = vpop.permute.xlu2 %755 }
 0xba9   :  { %759 = vst.msk [vmem:[#allocation3 + $0x20] sm:$0xff] %vm63_vm0, %v756_v25 }
 0xbb0   :  { %v2228_v29 = vld [vmem:[#allocation3 + $0x20] sm:$0xff] }
 0xbb1   :  { %1502 = vmatmul.msk.f32.vlgmr.msra.gmra.mxu3 %vm63_vm0, %v2228_v29 }
 0xbb2   :  { %1251 = vmatpush.msra.mxu3 %v1845_v41 }
 0xbb4   :  { %1252 = vmatpush.msra.mxu3 %v1850_v42 }
 0xbb6   :  { %1253 = vmatpush.msra.mxu3 %v1856_v43 }
 0xbb8   :  { %1254 = vmatpush.msra.mxu3 %v1863_v44 }
 0xbbe   :  { %v853_v4 = vpop.permute.xlu1 %852 }
 0xbbf   :  { %1501 = vmatmul.msk.f32.vlgmr.msra.gmra.mxu2 %vm63_vm0, %v853_v4 }
 0xbc0   :  { %1186 = vmatpush.msra.mxu2 %v1732_v2 }
 0xbc2   :  { %1187 = vmatpush.msra.mxu2 %v1738_v3 }
 0xbc4   :  { %1188 = vmatpush.msra.mxu2 %v1748_v6 }
 0xbc6   :  { %1189 = vmatpush.msra.mxu2 %v1762_v8 }
 0xbc9   :  { %v120_v32 = vpop.f32.mrf.mxu0 }
 0xbca   :  { %v121_v2 = vadd.f32 %v1791_v11, %v120_v32 }
 0xbeb   :  { %v945_v30 = vpop.permute.xlu0 %944 }
 0xbec   :  { %1503 = vmatmul.msk.f32.vlgmr.msrb.gmra.mxu1 %vm63_vm0, %v945_v30 }
 0xbed   :  { %1276 = vmatpush.msrb.mxu1 %v1869_v45 }
 0xbef   :  { %1277 = vmatpush.msrb.mxu1 %v1876_v46 }
 0xbf1   :  { %1278 = vmatpush.msrb.mxu1 %v1883_v47 }
 0xbf3   :  { %1279 = vmatpush.msrb.mxu1 %v1888_v48 }
 0xc34   :  { %v940_v51 = vpop.f32.mrf.mxu3 }
 0xc35   :  { %v941_v28 = vadd.f32 %v1918_v61, %v940_v51 }
 0xc42   :  { %v873_v20 = vpop.f32.mrf.mxu2 }
 0xc43   :  { %v876_v3 = vadd.f32 %v873_v20, %v121_v2 }
 0xc45   :  { %v877_v33 = vmul.f32 0.5, %v876_v3 }
 0xc47   :  { %v878_v6 = vsel %vm1794_vm3, %v876_v3, %v877_v33 }
 0xc48   :  { %1565 = vtanh.f32 %v878_v6 }
 0xc4e   :  { %v1566_v8 = vpop.eup %1565 }
 0xc4f   :  { %v880_v38 = vmul.f32 0.5, %v1566_v8 }
 0xc51   :  { %v881_v50 = vadd.f32 0.5, %v880_v38 }
 0xc53   :  { %v882_v37 = vsel %vm1794_vm3, %v1566_v8, %v881_v50 }
 0xc54   :  { %885 = vrot.lane.b32.xlu1 %v882_v37, %s1674_s21  ;;  %v883_v53 = vmul.f32 %v882_v37, %v2267_v15 }
 0xc69   :  { %v965_v22 = vpop.f32.mrf.mxu1 }
 0xc6a   :  { %v968_v56 = vadd.f32 %v965_v22, %v941_v28 }
 0xc6c   :  { %v969_v59 = vmul.f32 0.5, %v968_v56 }
 0xc6e   :  { %v970_v60 = vsel %vm1794_vm3, %v968_v56, %v969_v59 }
 0xc6f   :  { %1567 = vtanh.f32 %v970_v60 }
 0xc75   :  { %v1568_v62 = vpop.eup %1567 }
 0xc76   :  { %v972_v63 = vmul.f32 0.5, %v1568_v62 }
 0xc78   :  { %v973_v0 = vadd.f32 0.5, %v972_v63 }
 0xc7a   :  { %v974_v55 = vsel %vm1794_vm3, %v1568_v62, %v973_v0 }
 0xc7b   :  { %977 = vrot.lane.b32.xlu2 %v974_v55, %s1674_s21 }
 0xcc6   :  { %v886_v9 = vpop.permute.xlu1 %885 }
 0xcc7   :  { %v888_v40 = vmul.f32 %v886_v9, %v882_v37 }
 0xcc9   :  { %890 = vrot.lane.b32.xlu0 %v888_v40, %s1675_s22 }
 0xcd1   :  { %902 = vperm.xlu0 %1526, %v900_v10  }
 0xcd5   :  { %v978_v13 = vpop.permute.xlu2 %977 }
 0xcd6   :  { %v980_v14 = vmul.f32 %v978_v13, %v974_v55 }
 0xcd8   :  { %982 = vrot.lane.b32.xlu1 %v980_v14, %s1675_s22  ;;  %v1059_v14 = vsel %vm1005_vm1, 1, %v1676_v26 }
 0xce0   :  { %909 = vrot.lane.b32.xlu1 %v57_v34, %s1677_s25  ;;  %v2278_v34 = vsel %vm586_vm11, %v2196_v36, %v2193_v35 }
 0xce1   :  { %v975_v4 = vmul.f32 %v974_v55, %v2278_v34 }
 0xd3b   :  { %v891_v18 = vpop.permute.xlu0 %890 }
 0xd3c   :  { %v2270_v19 = vadd.f32 %v891_v18, %v883_v53 }
 0xd3e   :  { %1569 = vtanh.f32 %v2270_v19 }
 0xd43   :  { %v2285_v32 = vpop.permute.xlu0 %902 }
 0xd44   :  { %v1570_v25 = vpop.eup %1569  ;;  %vm904_vm15 = vcmp.eq.s32.totalorder %v2285_v32, 1 }
 0xd45   :  { %896 = vrot.lane.b32.xlu2 %v1570_v25, %s1674_s21  ;;  %v2348_v25 = vsel %vm904_vm15, %v2270_v19, %v2267_v15 }
 0xd4a   :  { %v983_v16 = vpop.permute.xlu1 %982 }
 0xd4b   :  { %v2281_v5 = vadd.f32 %v983_v16, %v975_v4 }
 0xd4d   :  { %1571 = vtanh.f32 %v2281_v5 }
 0xd52   :  { %v910_v3 = vpop.permute.xlu1 %909 }
 0xd53   :  { %v1572_v30 = vpop.eup %1571 }
 0xd54   :  { %988 = vrot.lane.b32.xlu2 %v1572_v30, %s1674_s21 }
 0xd9f   :  { %v897_v2 = vpop.permute.xlu2 %896 }
 0xda0   :  { %v899_v20 = vmul.f32 %v897_v2, %v882_v37  ;;  %v2359_v2 = vsel %vm745_vm13, %v2281_v5, %v2278_v34 }
 0xda2   :  { %v907_v35 = vsel %vm904_vm15, %v899_v20, 0.0  ;;  %v2293_v36 = vsel %vm904_vm15, %v899_v20, %v2208_v27  ;;  %v58_v27 = vld [vmem:[%s2531_s1 + $0x30] sm:$0xff] }
 0xda3   :  { %v912_v33 = vadd.f32 %v910_v3, %v907_v35  ;;  %1011 = vrot.lane.b32.xlu0 %v2293_v36, %s1675_s22  ;;  %1483 = vmatmul.msk.f32.gmra.mxu0 %vm63_vm0, %v58_v27 }
 0xda5   :  { %914 = vrot.lane.b32.xlu1 %v912_v33, %s1675_s22 }
 0xdae   :  { %v989_v6 = vpop.permute.xlu2 %988 }
 0xdaf   :  { %v2298_v8 = vmul.f32 %v989_v6, %v974_v55 }
 0xdb1   :  { %v2304_v38 = vsel %vm745_vm13, %v2298_v8, %v2219_v23 }
 0xdb2   :  { %1103 = vrot.lane.b32.xlu2 %v2304_v38, %s1675_s22 }
 0xe0c   :  { %v1104_v50 = vpop.permute.xlu2 %1103 }
 0xe0d   :  { %1507 = vmatmul.msk.f32.vlgmr.msra.gmra.mxu1 %vm63_vm0, %v1104_v50 }
 0xe15   :  { %v1012_v37 = vpop.permute.xlu0 %1011 }
 0xe16   :  { %1505 = vmatmul.msk.f32.vlgmr.msrb.gmra.mxu2 %vm63_vm0, %v1012_v37 }
 0xe17   :  { %v915_v51 = vpop.permute.xlu1 %914  ;;  %1339 = vmatpush.msrb.mxu2 %v1845_v41 }
 0xe18   :  { %918 = vst.msk [vmem:[#allocation3 + $0x28] sm:$0xff] %vm63_vm0, %v915_v51 }
 0xe19   :  { %1340 = vmatpush.msrb.mxu2 %v1850_v42 }
 0xe1b   :  { %1341 = vmatpush.msrb.mxu2 %v1856_v43 }
 0xe1d   :  { %1342 = vmatpush.msrb.mxu2 %v1863_v44 }
 0xe1f   :  { %v2319_v23 = vld [vmem:[#allocation3 + $0x28] sm:$0xff] }
 0xe20   :  { %1506 = vmatmul.msk.f32.vlgmr.msrb.gmra.mxu3 %vm63_vm0, %v2319_v23  ;;  %v123_v41 = vpop.f32.mrf.mxu0 }
 0xe21   :  { %1364 = vmatpush.msrb.mxu3 %v1869_v45  ;;  %v124_v42 = vadd.f32 %v1791_v11, %v123_v41 }
 0xe23   :  { %1365 = vmatpush.msrb.mxu3 %v1876_v46 }
 0xe25   :  { %1366 = vmatpush.msrb.mxu3 %v1883_v47 }
 0xe27   :  { %1367 = vmatpush.msrb.mxu3 %v1888_v48 }
 0xe8a   :  { %v1124_v60 = vpop.f32.mrf.mxu1 }
 0xe99   :  { %v1032_v28 = vpop.f32.mrf.mxu2 }
 0xe9a   :  { %v1035_v43 = vadd.f32 %v1032_v28, %v124_v42 }
 0xe9c   :  { %v1036_v22 = vmul.f32 0.5, %v1035_v43 }
 0xe9e   :  { %v1037_v44 = vsel %vm1794_vm3, %v1035_v43, %v1036_v22 }
 0xe9f   :  { %1573 = vtanh.f32 %v1037_v44  ;;  %v1593_v44 = vld [vmem:[%s2534_s4] ss:$0 sm:$0xff] }
 0xea3   :  { %v1099_v56 = vpop.f32.mrf.mxu3 }
 0xea4   :  { %v1100_v59 = vadd.f32 %v1918_v61, %v1099_v56 }
 0xea5   :  { %v1574_v45 = vpop.eup %1573 }
 0xea6   :  { %v1127_v46 = vadd.f32 %v1124_v60, %v1100_v59  ;;  %v1039_v62 = vmul.f32 0.5, %v1574_v45 }
 0xea8   :  { %v1128_v47 = vmul.f32 0.5, %v1127_v46  ;;  %v1040_v63 = vadd.f32 0.5, %v1039_v62 }
 0xeaa   :  { %v1129_v48 = vsel %vm1794_vm3, %v1127_v46, %v1128_v47  ;;  %v1041_v11 = vsel %vm1794_vm3, %v1574_v45, %v1040_v63 }
 0xeab   :  { %1575 = vtanh.f32 %v1129_v48  ;;  %1044 = vrot.lane.b32.xlu0 %v1041_v11, %s1674_s21  ;;  %v1042_v4 = vmul.f32 %v1041_v11, %v2348_v25 }
 0xeb1   :  { %v1576_v0 = vpop.eup %1575 }
 0xeb2   :  { %v1131_v55 = vmul.f32 0.5, %v1576_v0 }
 0xeb4   :  { %v1132_v9 = vadd.f32 0.5, %v1131_v55 }
 0xeb6   :  { %v1133_v40 = vsel %vm1794_vm3, %v1576_v0, %v1132_v9 }
 0xeb7   :  { %1136 = vrot.lane.b32.xlu1 %v1133_v40, %s1674_s21  ;;  %v1134_v20 = vmul.f32 %v1133_v40, %v2359_v2 }
 0xf1d   :  { %v1045_v10 = vpop.permute.xlu0 %1044 }
 0xf1e   :  { %v1047_v13 = vmul.f32 %v1045_v10, %v1041_v11 }
 0xf20   :  { %1049 = vrot.lane.b32.xlu2 %v1047_v13, %s1675_s22 }
 0xf28   :  { %1061 = vperm.xlu2 %1525, %v1059_v14  }
 0xf29   :  { %v1137_v53 = vpop.permute.xlu1 %1136 }
 0xf2a   :  { %v1139_v18 = vmul.f32 %v1137_v53, %v1133_v40 }
 0xf2c   :  { %1141 = vrot.lane.b32.xlu0 %v1139_v18, %s1675_s22 }
 0xf34   :  { %1068 = vrot.lane.b32.xlu0 %v58_v27, %s1677_s25 }
 0xf7a   :  { %v1050_v16 = vpop.permute.xlu2 %1049 }
 0xf7b   :  { %v2351_v30 = vadd.f32 %v1050_v16, %v1042_v4 }
 0xf7d   :  { %1577 = vtanh.f32 %v2351_v30 }
 0xf82   :  { %v2366_v35 = vpop.permute.xlu2 %1061 }
 0xf83   :  { %v1578_v31 = vpop.eup %1577  ;;  %vm1063_vm2 = vcmp.eq.s32.totalorder %v2366_v35, 1  ;;  %v994_v35 = vsel %vm745_vm13, %v2298_v8, 0.0 }
 0xf84   :  { %1055 = vrot.lane.b32.xlu1 %v1578_v31, %s1674_s21 }
 0xf9e   :  { %v1142_v15 = vpop.permute.xlu0 %1141 }
 0xf9f   :  { %v2362_v19 = vadd.f32 %v1142_v15, %v1134_v20 }
 0xfa1   :  { %1579 = vtanh.f32 %v2362_v19 }
 0xfa6   :  { %v1069_v27 = vpop.permute.xlu0 %1068 }
 0xfa7   :  { %v1580_v3 = vpop.eup %1579 }
 0xfa8   :  { %1147 = vrot.lane.b32.xlu1 %v1580_v3, %s1674_s21  ;;  %v1065_v3 = vsel %vm1063_vm2, %v2351_v30, %v2348_v25 }
 0xff6   :  { %v1056_v33 = vpop.permute.xlu1 %1055 }
 0xff7   :  { %v1058_v6 = vmul.f32 %v1056_v33, %v1041_v11 }
 0xff9   :  { %v1066_v34 = vsel %vm1063_vm2, %v1058_v6, 0.0  ;;  %v1064_v5 = vsel %vm1063_vm2, %v1058_v6, %v2293_v36  ;;  %v59_v36 = vld [vmem:[%s2531_s1 + $0x38] sm:$0xff] }
 0xffa   :  { %v1071_v50 = vadd.f32 %v1069_v27, %v1066_v34  ;;  %1170 = vrot.lane.b32.xlu2 %v1064_v5, %s1675_s22  ;;  %1484 = vmatmul.msk.f32.gmra.mxu0 %vm63_vm0, %v59_v36 }
 0xffc   :  { %1073 = vrot.lane.b32.xlu0 %v1071_v50, %s1675_s22 }
0x101a   :  { %v1148_v37 = vpop.permute.xlu1 %1147 }
0x101b   :  { %v2376_v51 = vmul.f32 %v1148_v37, %v1133_v40 }
0x101d   :  { %v2382_v41 = vsel %vm904_vm15, %v2376_v51, %v2304_v38  ;;  %v1153_v39 = vsel %vm904_vm15, %v2376_v51, 0.0 }
0x101e   :  { %1260 = vrot.lane.b32.xlu1 %v2382_v41, %s1675_s22 }
0x1054   :  { %v1171_v42 = vpop.permute.xlu2 %1170 }
0x1055   :  { %1509 = vmatmul.msk.f32.vlgmr.msra.gmra.mxu2 %vm63_vm0, %v1171_v42 }
0x106e   :  { %v1074_v28 = vpop.permute.xlu0 %1073 }
0x106f   :  { %1077 = vst.msk [vmem:[#allocation3 + $0x30] sm:$0xff] %vm63_vm0, %v1074_v28 }
0x1076   :  { %v2392_v43 = vld [vmem:[#allocation3 + $0x30] sm:$0xff] }
0x1077   :  { %1510 = vmatmul.msk.f32.vlgmr.msra.gmra.mxu3 %vm63_vm0, %v2392_v43  ;;  %v126_v22 = vpop.f32.mrf.mxu0 }
0x1078   :  { %v127_v56 = vadd.f32 %v1593_v44, %v126_v22 }
0x1090   :  { %v1261_v38 = vpop.permute.xlu1 %1260 }
0x1091   :  { %1511 = vmatmul.msk.f32.vlgmr.msrb.gmra.mxu1 %vm63_vm0, %v1261_v38 }
0x10d8   :  { %v1191_v59 = vpop.f32.mrf.mxu2 }
0x10d9   :  { %v1194_v45 = vadd.f32 %v1191_v59, %v127_v56 }
0x10db   :  { %v1195_v60 = vmul.f32 0.5, %v1194_v45 }
0x10dd   :  { %v1196_v46 = vsel %vm1794_vm3, %v1194_v45, %v1195_v60 }
0x10de   :  { %1581 = vtanh.f32 %v1196_v46  ;;  %v1595_v46 = vld [vmem:[%s2534_s4 + $0x1] ss:$0 sm:$0xff]  ;;  %s1678_s4 = smov [#allocation6]  }
0x10e4   :  { %v1582_v62 = vpop.eup %1581 }
0x10e5   :  { %v1198_v47 = vmul.f32 0.5, %v1582_v62 }
0x10e7   :  { %v1199_v63 = vadd.f32 0.5, %v1198_v47 }
0x10e9   :  { %v1200_v48 = vsel %vm1794_vm3, %v1582_v62, %v1199_v63 }
0x10ea   :  { %1203 = vrot.lane.b32.xlu2 %v1200_v48, %s1674_s21  ;;  %v1201_v33 = vmul.f32 %v1200_v48, %v1065_v3 }
0x10fa   :  { %v1256_v11 = vpop.f32.mrf.mxu3 }
0x10fb   :  { %v1257_v0 = vadd.f32 %v1918_v61, %v1256_v11  ;;  %v1594_v61 = vld [vmem:[%s2530_s0] sm:$0xff] }
0x10fc   :  { %vm1164_vm4 = vcmp.gt.s32.totalorder %v1594_v61, 7  ;;  %v517_v61 = vsel %vm272_vm7, %v2043_v54, 0.0  ;;  %v676_v54 = vsel %vm427_vm9, %v2128_v1, 0.0 }
0x10fd   :  { %v1218_v31 = vsel %vm1164_vm4, 1, %v1676_v26  ;;  %v2427_v26 = vsel %vm904_vm15, %v2362_v19, %v2359_v2 }
0x110e   :  { %v1281_v55 = vpop.f32.mrf.mxu1 }
0x110f   :  { %v1284_v9 = vadd.f32 %v1281_v55, %v1257_v0 }
0x1111   :  { %v1285_v40 = vmul.f32 0.5, %v1284_v9 }
0x1113   :  { %v1286_v10 = vsel %vm1794_vm3, %v1284_v9, %v1285_v40  ;;  %v1596_v40 = vld [vmem:[#allocation3] sm:$0xff] }
0x1114   :  { %1583 = vtanh.f32 %v1286_v10 }
0x111a   :  { %v1584_v13 = vpop.eup %1583 }
0x111b   :  { %v1288_v14 = vmul.f32 0.5, %v1584_v13 }
0x111d   :  { %v1289_v53 = vadd.f32 0.5, %v1288_v14 }
0x111f   :  { %v1290_v18 = vsel %vm1794_vm3, %v1584_v13, %v1289_v53 }
0x1120   :  { %1293 = vrot.lane.b32.xlu0 %v1290_v18, %s1674_s21  ;;  %v1291_v5 = vmul.f32 %v1290_v18, %v2427_v26 }
0x1144   :  { %v1204_v4 = vpop.permute.xlu2 %1203 }
0x1145   :  { %v1206_v16 = vmul.f32 %v1204_v4, %v1200_v48 }
0x1147   :  { %1208 = vrot.lane.b32.xlu1 %v1206_v16, %s1675_s22 }
0x114f   :  { %1220 = vperm.xlu1 %1524, %v1218_v31  }
0x1192   :  { %v1294_v20 = vpop.permute.xlu0 %1293 }
0x1193   :  { %v1296_v15 = vmul.f32 %v1294_v20, %v1290_v18 }
0x1195   :  { %1298 = vrot.lane.b32.xlu2 %v1296_v15, %s1675_s22 }
0x119d   :  { %1225 = vrot.lane.b32.xlu2 %v59_v36, %s1677_s25 }
0x11b9   :  { %v1209_v6 = vpop.permute.xlu1 %1208 }
0x11ba   :  { %v1211_v27 = vadd.f32 %v1209_v6, %v1201_v33 }
0x11bc   :  { %1585 = vtanh.f32 %v1211_v27 }
0x11c1   :  { %v2431_v25 = vpop.permute.xlu1 %1220 }
0x11c2   :  { %v1586_v34 = vpop.eup %1585  ;;  %vm1222_vm5 = vcmp.eq.s32.totalorder %v2431_v25, 1 }
0x11c3   :  { %1214 = vrot.lane.b32.xlu0 %v1586_v34, %s1674_s21 }
0x11ef   :  { %v1299_v50 = vpop.permute.xlu2 %1298 }
0x11f0   :  { %v1301_v37 = vadd.f32 %v1299_v50, %v1291_v5 }
0x11f2   :  { %1587 = vtanh.f32 %v1301_v37  ;;  %v1309_v57 = vsel %vm1063_vm2, %v1301_v37, %v2427_v26 }
0x11f7   :  { %v1226_v28 = vpop.permute.xlu2 %1225 }
0x11f8   :  { %v1588_v36 = vpop.eup %1587 }
0x11f9   :  { %1304 = vrot.lane.b32.xlu0 %v1588_v36, %s1674_s21 }
0x1235   :  { %v1215_v30 = vpop.permute.xlu0 %1214 }
0x1236   :  { %v1217_v42 = vmul.f32 %v1215_v30, %v1200_v48 }
0x1238   :  { %v1223_v38 = vsel %vm1222_vm5, %v1217_v42, 0.0 }
0x1239   :  { %v1228_v2 = vadd.f32 %v1226_v28, %v1223_v38 }
0x123b   :  { %1230 = vrot.lane.b32.xlu1 %v1228_v2, %s1675_s22 }
0x126b   :  { %v1305_v19 = vpop.permute.xlu0 %1304 }
0x126c   :  { %v1307_v22 = vmul.f32 %v1305_v19, %v1290_v18 }
0x126e   :  { %v2440_v44 = vsel %vm1063_vm2, %v1307_v22, %v2382_v41 }
0x126f   :  { %1348 = vrot.lane.b32.xlu2 %v2440_v44, %s1675_s22 }
0x1277   :  { %677 = vrot.lane.b32.xlu2 %v2063_v58, %s1677_s25 }
0x12ad   :  { %v1231_v56 = vpop.permute.xlu1 %1230 }
0x12ae   :  { %1234 = vst.msk [vmem:[#allocation3 + $0x38] sm:$0xff] %vm63_vm0, %v1231_v56 }
0x12b5   :  { %v1321_v59 = vld [vmem:[#allocation3 + $0x38] sm:$0xff] }
0x12b6   :  { %1322 = vst.msk [vmem:[#allocation3 + $0x38] sm:$0xff] %vm63_vm0, %v1321_v59 }
0x12bd   :  { %v1323_v45 = vld [vmem:[#allocation3 + $0x38] sm:$0xff] }
0x12be   :  { %1512 = vmatmul.msk.f32.vlgmr.msrb.gmra.mxu2 %vm63_vm0, %v1323_v45 }
0x12c9   :  { %v1349_v60 = vpop.permute.xlu2 %1348 }
0x12ca   :  { %1513 = vmatmul.msk.f32.vlgmr.msrb.gmra.mxu3 %vm63_vm0, %v1349_v60 }
0x12d1   :  { %v678_v24 = vpop.permute.xlu2 %677 }
0x12d2   :  { %v680_v34 = vadd.f32 %v678_v24, %v676_v54 }
0x1341   :  { %v1344_v41 = vpop.f32.mrf.mxu2 }
0x1342   :  { %v1345_v62 = vadd.f32 %v1595_v46, %v1344_v41 }
0x134d   :  { %v1369_v47 = vpop.f32.mrf.mxu3 }
0x134e   :  { %v1372_v58 = vadd.f32 %v1369_v47, %v1345_v62 }
0x1350   :  { %v1373_v63 = vmul.f32 0.5, %v1372_v58 }
0x1352   :  { %v1374_v48 = vsel %vm1794_vm3, %v1372_v58, %v1373_v63 }
0x1353   :  { %1589 = vtanh.f32 %v1374_v48 }
0x1359   :  { %v1590_v11 = vpop.eup %1589 }
0x135a   :  { %v1376_v0 = vmul.f32 0.5, %v1590_v11 }
0x135c   :  { %v1377_v55 = vadd.f32 0.5, %v1376_v0 }
0x135e   :  { %v1378_v9 = vsel %vm1794_vm3, %v1590_v11, %v1377_v55 }
0x135f   :  { %1381 = vrot.lane.b32.xlu0 %v1378_v9, %s1674_s21  ;;  %v1379_v21 = vmul.f32 %v1378_v9, %v1309_v57 }
0x1367   :  { %360 = vrot.lane.b32.xlu0 %v1596_v40, %s1677_s25 }
0x136f   :  { %836 = vrot.lane.b32.xlu0 %v2143_v7, %s1677_s25 }
0x1377   :  { %1311 = vrot.lane.b32.xlu0 %v2392_v43, %s1677_s25  ;;  %v1310_v43 = vsel %vm1063_vm2, %v1307_v22, 0.0 }
0x13d1   :  { %v1382_v10 = vpop.permute.xlu0 %1381 }
0x13d2   :  { %v1384_v13 = vmul.f32 %v1382_v10, %v1378_v9 }
0x13d4   :  { %1386 = vrot.lane.b32.xlu1 %v1384_v13, %s1675_s22 }
0x13d9   :  { %v361_v14 = vpop.permute.xlu0 %360 }
0x13da   :  { %v363_v53 = vadd.f32 %v361_v14, %v1982_v52 }
0x13dc   :  { %518 = vrot.lane.b32.xlu1 %v1972_v49, %s1677_s25  ;;  %365 = vrot.lane.b32.xlu0 %v363_v53, %s1675_s22  ;;  %v212_v49 = vld [vmem:[#allocation4] sm:$0xff] }
0x13dd   :  { %213 = vst.msk [vmem:[#allocation4] sm:$0xff] %vm63_vm0, %v212_v49 }
0x13e1   :  { %v837_v7 = vpop.permute.xlu0 %836 }
0x13e2   :  { %v839_v18 = vadd.f32 %v837_v7, %v835_v17 }
0x13e4   :  { %995 = vrot.lane.b32.xlu1 %v2228_v29, %s1677_s25  ;;  %841 = vrot.lane.b32.xlu0 %v839_v18, %s1675_s22 }
0x13e9   :  { %v1312_v52 = vpop.permute.xlu0 %1311 }
0x13ea   :  { %v1314_v4 = vadd.f32 %v1312_v52, %v1310_v43 }
0x13ec   :  { %1399 = vrot.lane.b32.xlu1 %v1323_v45, %s1677_s25  ;;  %1316 = vrot.lane.b32.xlu0 %v1314_v4, %s1675_s22 }
0x1446   :  { %v1387_v29 = vpop.permute.xlu1 %1386 }
0x1447   :  { %v1389_v16 = vadd.f32 %v1387_v29, %v1379_v21 }
0x1449   :  { %1591 = vtanh.f32 %v1389_v16  ;;  %v1397_v32 = vsel %vm1222_vm5, %v1389_v16, %v1309_v57 }
0x144e   :  { %v519_v31 = vpop.permute.xlu1 %518  ;;  %v366_v20 = vpop.permute.xlu0 %365 }
0x144f   :  { %v1592_v15 = vpop.eup %1591  ;;  %v521_v3 = vadd.f32 %v519_v31, %v517_v61  ;;  %368 = vst.msk [vmem:[#allocation4] sm:$0xff] %vm63_vm0, %v366_v20 }
0x1450   :  { %1392 = vrot.lane.b32.xlu2 %v1592_v15, %s1674_s21  ;;  %s1437_s21 = sshll.u32 %s1678_s4, 4  ;;  %s1438_s21 = int_to_ptr.vmem [resolvable:$true] %s1437_s21 }
0x1451   :  { %523 = vrot.lane.b32.xlu1 %v521_v3, %s1675_s22 }
0x1456   :  { %v996_v33 = vpop.permute.xlu1 %995  ;;  %v842_v6 = vpop.permute.xlu0 %841 }
0x1457   :  { %v998_v27 = vadd.f32 %v996_v33, %v994_v35  ;;  %845 = vst.msk [vmem:[#allocation4 + $0x18] sm:$0xff] %vm63_vm0, %v842_v6 }
0x1458   :  { %1154 = vrot.lane.b32.xlu2 %v2319_v23, %s1677_s25 }
0x1459   :  { %1000 = vrot.lane.b32.xlu1 %v998_v27, %s1675_s22 }
0x145e   :  { %v1317_v26 = vpop.permute.xlu0 %1316  ;;  %v1400_v5 = vpop.permute.xlu1 %1399 }
0x145f   :  { %1320 = vst.msk [vmem:[#allocation4 + $0x30] sm:$0xff] %vm63_vm0, %v1317_v26 }
0x1460   :  { %682 = vrot.lane.b32.xlu2 %v680_v34, %s1675_s22 }
0x14aa   :  { %v1393_v12 = vpop.permute.xlu2 %1392 }
0x14ab   :  { %v1395_v8 = vmul.f32 %v1393_v12, %v1378_v9 }
0x14ad   :  { %v1398_v50 = vsel %vm1222_vm5, %v1395_v8, 0.0  ;;  %v1396_v30 = vsel %vm1222_vm5, %v1395_v8, %v2440_v44 }
0x14ae   :  { %v1402_v23 = vadd.f32 %v1400_v5, %v1398_v50 }
0x14b0   :  { %1404 = vrot.lane.b32.xlu1 %v1402_v23, %s1675_s22 }
0x14b2   :  { %v1155_v1 = vpop.permute.xlu2 %1154 }
0x14b3   :  { %v1157_v37 = vadd.f32 %v1155_v1, %v1153_v39 }
0x14b5   :  { %1159 = vrot.lane.b32.xlu2 %v1157_v37, %s1675_s22 }
0x14ba   :  { %v683_v36 = vpop.permute.xlu2 %682 }
0x14bb   :  { %686 = vst.msk [vmem:[#allocation4 + $0x10] sm:$0xff] %vm63_vm0, %v683_v36 }
0x14bd   :  { %1410 = vrot.lane.b32.xlu2 %v1396_v30, %s1675_s22  ;;  %s1439_s22 = sshll.u32 %s2536_s6, 4  ;;  %s1681_s6 = smov 128   ;;  %s1440_s22 = int_to_ptr.hbm [resolvable:$true] %s1439_s22 }
0x14c3   :  { %v524_v42 = vpop.permute.xlu1 %523 }
0x14c4   :  { %527 = vst.msk [vmem:[#allocation4 + $0x8] sm:$0xff] %vm63_vm0, %v524_v42 }
0x14c5   :  { %1415 = vrot.lane.b32.xlu2 %v1397_v32, %s1677_s25  ;;  %s1448_s25 = sshll.u32 %s1679_s18, 4  ;;  %s1449_s25 = int_to_ptr.vmem [resolvable:$true] %s1448_s25 }
0x14cb   :  { %v1001_v51 = vpop.permute.xlu1 %1000 }
0x14cc   :  { %1004 = vst.msk [vmem:[#allocation4 + $0x20] sm:$0xff] %vm63_vm0, %v1001_v51 }
0x150f   :  { %v1160_v28 = vpop.permute.xlu2 %1159 }
0x1510   :  { %1163 = vst.msk [vmem:[#allocation4 + $0x28] sm:$0xff] %vm63_vm0, %v1160_v28 }
0x1517   :  { %v1411_v38 = vpop.permute.xlu2 %1410 }
0x1518   :  { %1413 = vst.msk [vmem:[#allocation6] sm:$0xff] %vm63_vm0, %v1411_v38 }
0x1519   :  { %1442 = dma.vmem_to_hbm [thread:$0]  %s1438_s21, 128, %s1440_s22, [#allocation7]  }
0x151f   :  { %v1416_v25 = vpop.permute.xlu2 %1415 }
0x1520   :  { %1418 = vst.msk [vmem:[#allocation8] sm:$0xff] %vm63_vm0, %v1416_v25 }
0x1521   :  { %1453 = dma.vmem_to_hbm [thread:$0]  %s1449_s25, 128, %s1451_s20, [#allocation7]  }
0x1522   :  { %v1405_v2 = vpop.permute.xlu1 %1404 }
0x1523   :  { %1408 = vst.msk [vmem:[#allocation4 + $0x38] sm:$0xff] %vm63_vm0, %v1405_v2 }
0x1524   :  { %1431 = dma.vmem_to_hbm [thread:$0]  %s1424_s24, 1024, %s1426_s28, [#allocation5], %s1681_s6, %s1681_s6, %s1682_s29  }
0x1525   :  { %1669 = dma.done.wait [#allocation5], 1024  }
0x1526   :  { %1670 = vsyncadd [#allocation5], 4294966272 }
0x1527   :  { %1671 = dma.done.wait [#allocation7], 256  }
0x1528   :  { %1672 = vsyncadd [#allocation7], 4294967040 }
0x1529   :  { %1466 = vsyncpa [#allocation5], 1 }
0x152a   :  { %1467 = vsyncpa [#allocation7], 1 }

</bundles_post_ra>
